<compile_context>
chip_gen: v7x
topology: tpu7x:2x2x1
jax: 0.10.0
libtpu: 0.0.40
codegen_flags: <defaults>
</compile_context>

<pallas_src>
import functools

import jax
import jax.numpy as jnp
import numpy as np
from jax.experimental import pallas as pl
from jax.experimental.pallas import tpu as pltpu

BT = 8  # images per grid step (multiple of 8 keeps every row block sublane-aligned)


# ---------------------------------------------------------------------------
# Fused kernel: conv1+pool -> conv2+pool -> fc1 -> fc2 -> fc3, BT images/step
# ---------------------------------------------------------------------------
def _encoder_kernel(xcol_ref, w1_ref, b1_ref, ce1_ref, co1_ref, re1_ref, ro1_ref,
                    w2_ref, b2_ref, ce2_ref, co2_ref, re2_ref, ro2_ref,
                    w1r_ref, b1f_ref, w2f_ref, b2f_ref, w3f_ref, b3f_ref,
                    out_ref):
    f32 = jnp.float32

    def dot(a, b):
        return jnp.dot(a, b, preferred_element_type=f32)

    # ---- stage 1: conv(1->6, 3x3, pad=1) for all BT images in ONE GEMM ------
    # xcol rows = (image, y) stacked (M = BT*28), lanes = (dy, x_in) (K = 84).
    acc1 = dot(xcol_ref[...], w1_ref[...]) + b1_ref[...]        # [BT*28, 168]
    acc1 = jnp.maximum(acc1, 0.0)                               # ReLU

    # 2x2 max-pool along x for all 6 channels at once (block-diag 0/1 selectors)
    colmax1 = jnp.maximum(dot(acc1, ce1_ref[...]),
                          dot(acc1, co1_ref[...]))              # [BT*28, 84]

    # ---- stage 2: conv(6->16, 3x3, pad=1) ------------------------------------
    # y-pooling of stage 1 is fused with the stage-2 dy tap shift + y-padding:
    # re1[j]/ro1[j] are block-diagonal selectors over the batch-stacked rows.
    acc2 = jnp.zeros((BT * 14, 16 * 14), f32) + b2_ref[...]     # [BT*14, 224]
    for j in range(3):
        tap = jnp.maximum(dot(re1_ref[j], colmax1),
                          dot(ro1_ref[j], colmax1))             # [BT*14, 84]
        acc2 = acc2 + dot(tap, w2_ref[j])                       # K folds (ci, dx)
    acc2 = jnp.maximum(acc2, 0.0)                               # ReLU

    colmax2 = jnp.maximum(dot(acc2, ce2_ref[...]),
                          dot(acc2, co2_ref[...]))              # [BT*14, 112]

    # ---- fc1: y-pooling of stage 2 fused into per-output-row selectors -------
    h = jnp.zeros((BT, 128), f32) + b1f_ref[...]
    for y in range(7):
        p2y = jnp.maximum(dot(re2_ref[y], colmax2),
                          dot(ro2_ref[y], colmax2))             # [BT, 112]
        h = h + dot(p2y, w1r_ref[y])                            # [BT, 128]
    h = jnp.maximum(h, 0.0)

    # ---- fc2 + ReLU, fc3 + Tanh (N padded to 128 lanes, lane-dense store) ----
    h = jnp.maximum(dot(h, w2f_ref[...]) + b2f_ref[...], 0.0)
    out_ref[...] = jnp.tanh(dot(h, w3f_ref[...]) + b3f_ref[...])


def _full_spec(a):
    nd = a.ndim
    return pl.BlockSpec(a.shape, lambda *i: (0,) * nd)


_WEIGHT_KEYS = ("w1col", "b1row", "ce1", "co1", "re1", "ro1",
                "w2col", "b2row", "ce2", "co2", "re2", "ro2",
                "w1r", "b1f", "w2f", "b2f", "w3f", "b3f")


def _encoder_call(xcol, kp):
    """xcol: [Bp*28, 84] stacked dy-im2col rows -> [Bp, 128] (z padded to 128)."""
    n_tiles = xcol.shape[0] // (BT * 28)
    bp = n_tiles * BT
    weights = [kp[k] for k in _WEIGHT_KEYS]
    in_specs = [pl.BlockSpec((BT * 28, 3 * 28), lambda i: (i, 0))]
    in_specs += [_full_spec(w) for w in weights]
    return pl.pallas_call(
        _encoder_kernel,
        out_shape=jax.ShapeDtypeStruct((bp, 128), jnp.float32),
        grid=(n_tiles,),
        in_specs=in_specs,
        out_specs=pl.BlockSpec((BT, 128), lambda i: (i, 0)),
        compiler_params=pltpu.CompilerParams(
            dimension_semantics=("parallel",),
            vmem_limit_bytes=32 * 1024 * 1024),
    )(xcol, *weights)


# ---------------------------------------------------------------------------
# Parameters (PyTorch shapes) and one-time kernel-layout preparation
# ---------------------------------------------------------------------------
def init_params(z_dim, key):
    ks = jax.random.split(key, 10)
    s = 0.1
    return {
        "conv1_w": s * jax.random.normal(ks[0], (6, 1, 3, 3), jnp.float32),
        "conv1_b": s * jax.random.normal(ks[1], (6,), jnp.float32),
        "conv2_w": s * jax.random.normal(ks[2], (16, 6, 3, 3), jnp.float32),
        "conv2_b": s * jax.random.normal(ks[3], (16,), jnp.float32),
        "fc1_w": s * jax.random.normal(ks[4], (128, 16 * 7 * 7), jnp.float32),
        "fc1_b": s * jax.random.normal(ks[5], (128,), jnp.float32),
        "fc2_w": s * jax.random.normal(ks[6], (84, 128), jnp.float32),
        "fc2_b": s * jax.random.normal(ks[7], (84,), jnp.float32),
        "fc3_w": s * jax.random.normal(ks[8], (z_dim, 84), jnp.float32),
        "fc3_b": s * jax.random.normal(ks[9], (z_dim,), jnp.float32),
    }
    # Note: x_dim and h_dim2 from __init__ are unused by Encoder.forward.


def prepare_params(p, bt=BT):
    """One-time re-layout of the PyTorch-shaped weights into kernel matrices."""
    f32 = np.float32
    c1w = np.asarray(p["conv1_w"], f32)    # [6, 1, 3, 3]
    c1b = np.asarray(p["conv1_b"], f32)
    c2w = np.asarray(p["conv2_w"], f32)    # [16, 6, 3, 3]
    c2b = np.asarray(p["conv2_b"], f32)
    f1w = np.asarray(p["fc1_w"], f32)      # [128, 784]
    f1b = np.asarray(p["fc1_b"], f32)
    f2w = np.asarray(p["fc2_w"], f32)      # [84, 128]
    f2b = np.asarray(p["fc2_b"], f32)
    f3w = np.asarray(p["fc3_w"], f32)      # [z_dim, 84]
    f3b = np.asarray(p["fc3_b"], f32)
    z_dim = f3b.shape[0]

    # conv1 as one GEMM: K = (dy, x_in) = 3*28, N = (co, x_out) = 6*28.
    # dx is a shifted diagonal (boundary taps dropped -> implicit zero x-pad).
    w1col = np.zeros((3 * 28, 6 * 28), f32)
    for co in range(6):
        for dy in range(3):
            for dx in range(3):
                for xo in range(28):
                    xi = xo + dx - 1
                    if 0 <= xi < 28:
                        w1col[dy * 28 + xi, co * 28 + xo] = c1w[co, 0, dy, dx]
    b1row = np.repeat(c1b, 28)[None, :]                        # [1, 168]

    # stage-1 x-pool selectors (block diagonal over 6 channels): [168, 84]
    ce1 = np.zeros((6 * 28, 6 * 14), f32)
    co1 = np.zeros((6 * 28, 6 * 14), f32)
    for c in range(6):
        for xo in range(14):
            ce1[c * 28 + 2 * xo, c * 14 + xo] = 1.0
            co1[c * 28 + 2 * xo + 1, c * 14 + xo] = 1.0

    # stage-1 y-pool selectors fused with the stage-2 dy shift + zero y-padding
    # (block diagonal over the bt batch-stacked images): [3, bt*14, bt*28]
    re1 = np.zeros((3, bt * 14, bt * 28), f32)
    ro1 = np.zeros((3, bt * 14, bt * 28), f32)
    for j in range(3):
        for b in range(bt):
            for y in range(14):
                yp = y + j - 1
                if 0 <= yp < 14:
                    re1[j, b * 14 + y, b * 28 + 2 * yp] = 1.0
                    ro1[j, b * 14 + y, b * 28 + 2 * yp + 1] = 1.0

    # conv2 per-dy GEMMs: K folds (ci, x_in) = 6*14, N = (co, x_out) = 16*14
    w2col = np.zeros((3, 6 * 14, 16 * 14), f32)
    for dy in range(3):
        for co in range(16):
            for ci in range(6):
                for dx in range(3):
                    for xo in range(14):
                        xi = xo + dx - 1
                        if 0 <= xi < 14:
                            w2col[dy, ci * 14 + xi, co * 14 + xo] = c2w[co, ci, dy, dx]
    b2row = np.repeat(c2b, 14)[None, :]                        # [1, 224]

    # stage-2 x-pool selectors (block diagonal over 16 channels): [224, 112]
    ce2 = np.zeros((16 * 14, 16 * 7), f32)
    co2 = np.zeros((16 * 14, 16 * 7), f32)
    for c in range(16):
        for xo in range(7):
            ce2[c * 14 + 2 * xo, c * 7 + xo] = 1.0
            co2[c * 14 + 2 * xo + 1, c * 7 + xo] = 1.0

    # stage-2 y-pool selectors, one pair per pooled output row y: [7, bt, bt*14]
    re2 = np.zeros((7, bt, bt * 14), f32)
    ro2 = np.zeros((7, bt, bt * 14), f32)
    for y in range(7):
        for b in range(bt):
            re2[y, b, b * 14 + 2 * y] = 1.0
            ro2[y, b, b * 14 + 2 * y + 1] = 1.0

    # fc1 split per pooled row y, rows permuted to the on-chip (co, x) lane order
    w1r = np.zeros((7, 16 * 7, 128), f32)
    for y in range(7):
        for c in range(16):
            for xx in range(7):
                w1r[y, c * 7 + xx, :] = f1w[:, c * 49 + y * 7 + xx]
    b1f = f1b[None, :]                                          # [1, 128]

    # fc2 / fc3: transpose once and zero-pad K/N to a full 128 lanes.
    w2f = np.zeros((128, 128), f32); w2f[:, :84] = f2w.T
    b2f = np.zeros((1, 128), f32);   b2f[0, :84] = f2b
    w3f = np.zeros((128, 128), f32); w3f[:84, :z_dim] = f3w.T
    b3f = np.zeros((1, 128), f32);   b3f[0, :z_dim] = f3b

    kp = dict(w1col=w1col, b1row=b1row, ce1=ce1, co1=co1, re1=re1, ro1=ro1,
              w2col=w2col, b2row=b2row, ce2=ce2, co2=co2, re2=re2, ro2=ro2,
              w1r=w1r, b1f=b1f, w2f=w2f, b2f=b2f, w3f=w3f, b3f=b3f)
    return {k: jnp.asarray(v) for k, v in kp.items()}


# ---------------------------------------------------------------------------
# Forward pass (matches Encoder.forward)
# ---------------------------------------------------------------------------
def encoder_forward(x, kp, z_dim):
    x0 = x[0]                                    # PyTorch: x = x[0]
    x0 = x0.reshape(-1, 1, 28, 28)               # view(-1, 1, 28, 28)
    b = x0.shape[0]
    imgs = x0.reshape(b, 28, 28)                 # Cin = 1
    bp = ((b + BT - 1) // BT) * BT               # pad batch to a multiple of BT
    imgs = jnp.pad(imgs, ((0, bp - b), (1, 1), (0, 0)))   # batch pad + y pad only
    # Layout plumbing: stack the 3 dy taps along K (dx handled by the shifted
    # diagonal weights), then collapse (b, y) into the M/sublane axis.
    xcol = jnp.concatenate(
        [imgs[:, 0:28, :], imgs[:, 1:29, :], imgs[:, 2:30, :]], axis=2)
    xcol = xcol.reshape(bp * 28, 3 * 28)

    out = _encoder_call(xcol, kp)                # [bp, 128] lane-dense
    return out[:b, :z_dim].reshape(1, -1)        # view(1, -1)


# ---------------------------------------------------------------------------
# Plain-JAX reference (for a one-shot correctness check)
# ---------------------------------------------------------------------------
def encoder_reference(x, params):
    hp = jax.lax.Precision.HIGHEST
    x0 = x[0].reshape(-1, 1, 28, 28)

    h = jax.lax.conv_general_dilated(
        x0, params["conv1_w"], (1, 1), [(1, 1), (1, 1)],
        dimension_numbers=("NCHW", "OIHW", "NCHW"), precision=hp)
    h = jax.nn.relu(h + params["conv1_b"][None, :, None, None])
    B, C, H, W = h.shape
    h = h.reshape(B, C, H // 2, 2, W // 2, 2).max(axis=(3, 5))

    h = jax.lax.conv_general_dilated(
        h, params["conv2_w"], (1, 1), [(1, 1), (1, 1)],
        dimension_numbers=("NCHW", "OIHW", "NCHW"), precision=hp)
    h = jax.nn.relu(h + params["conv2_b"][None, :, None, None])
    B, C, H, W = h.shape
    h = h.reshape(B, C, H // 2, 2, W // 2, 2).max(axis=(3, 5))

    z = h.reshape(B, 16 * 7 * 7)
    z = jax.nn.relu(jnp.dot(z, params["fc1_w"].T, precision=hp) + params["fc1_b"])
    z = jax.nn.relu(jnp.dot(z, params["fc2_w"].T, precision=hp) + params["fc2_b"])
    z = jnp.tanh(jnp.dot(z, params["fc3_w"].T, precision=hp) + params["fc3_b"])
    return z.reshape(1, -1)


# ---------------------------------------------------------------------------
if __name__ == "__main__":
    z_dim = 10
    batch = 2

    key = jax.random.PRNGKey(0)
    k_x, k_p = jax.random.split(key)
    # Input mimics a "list"-like leading dim so that x[0] yields [B, 1, 28, 28].
    x = jax.random.normal(k_x, (1, batch, 1, 28, 28), jnp.float32)
    params = init_params(z_dim, k_p)
    kparams = prepare_params(params)             # one-time weight re-layout

    fwd = jax.jit(functools.partial(encoder_forward, z_dim=z_dim))
    z = jax.block_until_ready(fwd(x, kparams))

    assert z.shape == (1, batch * z_dim), z.shape
    assert bool(jnp.all(jnp.isfinite(z))), "non-finite output"

    ref = encoder_reference(x, params)
    np.testing.assert_allclose(np.asarray(z), np.asarray(ref),
                               rtol=5e-3, atol=5e-3)
    print("KERNEL_OK")
</pallas_src>

<mosaic_0001>
module attributes {stable_mosaic.version = 11 : i64} {
  func.func @_encoder_kernel(%arg0: i32, %arg1: memref<224x84xf32, #tpu.memory_space<vmem>>, %arg2: memref<84x168xf32, #tpu.memory_space<vmem>>, %arg3: memref<1x168xf32, #tpu.memory_space<vmem>>, %arg4: memref<168x84xf32, #tpu.memory_space<vmem>>, %arg5: memref<168x84xf32, #tpu.memory_space<vmem>>, %arg6: memref<3x112x224xf32, #tpu.memory_space<vmem>>, %arg7: memref<3x112x224xf32, #tpu.memory_space<vmem>>, %arg8: memref<3x84x224xf32, #tpu.memory_space<vmem>>, %arg9: memref<1x224xf32, #tpu.memory_space<vmem>>, %arg10: memref<224x112xf32, #tpu.memory_space<vmem>>, %arg11: memref<224x112xf32, #tpu.memory_space<vmem>>, %arg12: memref<7x8x112xf32, #tpu.memory_space<vmem>>, %arg13: memref<7x8x112xf32, #tpu.memory_space<vmem>>, %arg14: memref<7x112x128xf32, #tpu.memory_space<vmem>>, %arg15: memref<1x128xf32, #tpu.memory_space<vmem>>, %arg16: memref<128x128xf32, #tpu.memory_space<vmem>>, %arg17: memref<1x128xf32, #tpu.memory_space<vmem>>, %arg18: memref<128x128xf32, #tpu.memory_space<vmem>>, %arg19: memref<1x128xf32, #tpu.memory_space<vmem>>, %arg20: memref<8x128xf32, #tpu.memory_space<vmem>>) attributes {dimension_semantics = [#tpu.dimension_semantics<parallel>], iteration_bounds = array<i64: 1>, scalar_prefetch = 0 : i64, scratch_operands = 0 : i64, tpu.core_type = #tpu.core_type<tc>, window_params = [{transform_indices = @transform_0, window_bounds = array<i64: 224, 84>}, {pipeline_mode = #tpu.pipeline_mode<synchronous>, transform_indices = @transform_1, window_bounds = array<i64: 84, 168>}, {pipeline_mode = #tpu.pipeline_mode<synchronous>, transform_indices = @transform_2, window_bounds = array<i64: 1, 168>}, {pipeline_mode = #tpu.pipeline_mode<synchronous>, transform_indices = @transform_3, window_bounds = array<i64: 168, 84>}, {pipeline_mode = #tpu.pipeline_mode<synchronous>, transform_indices = @transform_4, window_bounds = array<i64: 168, 84>}, {pipeline_mode = #tpu.pipeline_mode<synchronous>, transform_indices = @transform_5, window_bounds = array<i64: 3, 112, 224>}, {pipeline_mode = #tpu.pipeline_mode<synchronous>, transform_indices = @transform_6, window_bounds = array<i64: 3, 112, 224>}, {pipeline_mode = #tpu.pipeline_mode<synchronous>, transform_indices = @transform_7, window_bounds = array<i64: 3, 84, 224>}, {pipeline_mode = #tpu.pipeline_mode<synchronous>, transform_indices = @transform_8, window_bounds = array<i64: 1, 224>}, {pipeline_mode = #tpu.pipeline_mode<synchronous>, transform_indices = @transform_9, window_bounds = array<i64: 224, 112>}, {pipeline_mode = #tpu.pipeline_mode<synchronous>, transform_indices = @transform_10, window_bounds = array<i64: 224, 112>}, {pipeline_mode = #tpu.pipeline_mode<synchronous>, transform_indices = @transform_11, window_bounds = array<i64: 7, 8, 112>}, {pipeline_mode = #tpu.pipeline_mode<synchronous>, transform_indices = @transform_12, window_bounds = array<i64: 7, 8, 112>}, {pipeline_mode = #tpu.pipeline_mode<synchronous>, transform_indices = @transform_13, window_bounds = array<i64: 7, 112, 128>}, {pipeline_mode = #tpu.pipeline_mode<synchronous>, transform_indices = @transform_14, window_bounds = array<i64: 1, 128>}, {pipeline_mode = #tpu.pipeline_mode<synchronous>, transform_indices = @transform_15, window_bounds = array<i64: 128, 128>}, {pipeline_mode = #tpu.pipeline_mode<synchronous>, transform_indices = @transform_16, window_bounds = array<i64: 1, 128>}, {pipeline_mode = #tpu.pipeline_mode<synchronous>, transform_indices = @transform_17, window_bounds = array<i64: 128, 128>}, {pipeline_mode = #tpu.pipeline_mode<synchronous>, transform_indices = @transform_18, window_bounds = array<i64: 1, 128>}, {transform_indices = @transform_19, window_bounds = array<i64: 8, 128>}]} {
    %c0 = arith.constant 0 : index
    %c0_0 = arith.constant 0 : index
    %0 = vector.load %arg1[%c0, %c0_0] : memref<224x84xf32, #tpu.memory_space<vmem>>, vector<224x84xf32>
    %c0_1 = arith.constant 0 : index
    %c0_2 = arith.constant 0 : index
    %1 = vector.load %arg2[%c0_1, %c0_2] : memref<84x168xf32, #tpu.memory_space<vmem>>, vector<84x168xf32>
    %cst = arith.constant dense<0.000000e+00> : vector<224x168xf32>
    %2 = tpu.matmul %0, %1, %cst {dimension_numbers = #tpu.dot_dimension_numbers<[1], [0], [0], [1], [0, 0, 1, 1], [], []>} : vector<224x84xf32>, vector<84x168xf32>, vector<224x168xf32> -> vector<224x168xf32>
    %c0_3 = arith.constant 0 : index
    %c0_4 = arith.constant 0 : index
    %3 = vector.load %arg3[%c0_3, %c0_4] : memref<1x168xf32, #tpu.memory_space<vmem>>, vector<1x168xf32>
    %4 = vector.broadcast %3 : vector<1x168xf32> to vector<224x168xf32>
    %5 = arith.addf %2, %4 : vector<224x168xf32>
    %cst_5 = arith.constant 0.000000e+00 : f32
    %6 = vector.broadcast %cst_5 : f32 to vector<224x168xf32>
    %7 = arith.maximumf %5, %6 : vector<224x168xf32>
    %c0_6 = arith.constant 0 : index
    %c0_7 = arith.constant 0 : index
    %8 = vector.load %arg4[%c0_6, %c0_7] : memref<168x84xf32, #tpu.memory_space<vmem>>, vector<168x84xf32>
    %cst_8 = arith.constant dense<0.000000e+00> : vector<224x84xf32>
    %9 = tpu.matmul %7, %8, %cst_8 {dimension_numbers = #tpu.dot_dimension_numbers<[1], [0], [0], [1], [0, 0, 1, 1], [], []>} : vector<224x168xf32>, vector<168x84xf32>, vector<224x84xf32> -> vector<224x84xf32>
    %c0_9 = arith.constant 0 : index
    %c0_10 = arith.constant 0 : index
    %10 = vector.load %arg5[%c0_9, %c0_10] : memref<168x84xf32, #tpu.memory_space<vmem>>, vector<168x84xf32>
    %cst_11 = arith.constant dense<0.000000e+00> : vector<224x84xf32>
    %11 = tpu.matmul %7, %10, %cst_11 {dimension_numbers = #tpu.dot_dimension_numbers<[1], [0], [0], [1], [0, 0, 1, 1], [], []>} : vector<224x168xf32>, vector<168x84xf32>, vector<224x84xf32> -> vector<224x84xf32>
    %12 = arith.maximumf %9, %11 : vector<224x84xf32>
    %cst_12 = arith.constant 0.000000e+00 : f32
    %13 = vector.broadcast %cst_12 : f32 to vector<112x224xf32>
    %c0_13 = arith.constant 0 : index
    %c0_14 = arith.constant 0 : index
    %14 = vector.load %arg9[%c0_13, %c0_14] : memref<1x224xf32, #tpu.memory_space<vmem>>, vector<1x224xf32>
    %15 = vector.broadcast %14 : vector<1x224xf32> to vector<112x224xf32>
    %16 = arith.addf %13, %15 : vector<112x224xf32>
    %c0_15 = arith.constant 0 : index
    %c0_16 = arith.constant 0 : index
    %c0_17 = arith.constant 0 : index
    %17 = vector.load %arg6[%c0_15, %c0_16, %c0_17] : memref<3x112x224xf32, #tpu.memory_space<vmem>>, vector<1x112x224xf32>
    %18 = vector.shape_cast %17 : vector<1x112x224xf32> to vector<112x224xf32>
    %cst_18 = arith.constant dense<0.000000e+00> : vector<112x84xf32>
    %19 = tpu.matmul %18, %12, %cst_18 {dimension_numbers = #tpu.dot_dimension_numbers<[1], [0], [0], [1], [0, 0, 1, 1], [], []>} : vector<112x224xf32>, vector<224x84xf32>, vector<112x84xf32> -> vector<112x84xf32>
    %c0_19 = arith.constant 0 : index
    %c0_20 = arith.constant 0 : index
    %c0_21 = arith.constant 0 : index
    %20 = vector.load %arg7[%c0_19, %c0_20, %c0_21] : memref<3x112x224xf32, #tpu.memory_space<vmem>>, vector<1x112x224xf32>
    %21 = vector.shape_cast %20 : vector<1x112x224xf32> to vector<112x224xf32>
    %cst_22 = arith.constant dense<0.000000e+00> : vector<112x84xf32>
    %22 = tpu.matmul %21, %12, %cst_22 {dimension_numbers = #tpu.dot_dimension_numbers<[1], [0], [0], [1], [0, 0, 1, 1], [], []>} : vector<112x224xf32>, vector<224x84xf32>, vector<112x84xf32> -> vector<112x84xf32>
    %23 = arith.maximumf %19, %22 : vector<112x84xf32>
    %c0_23 = arith.constant 0 : index
    %c0_24 = arith.constant 0 : index
    %c0_25 = arith.constant 0 : index
    %24 = vector.load %arg8[%c0_23, %c0_24, %c0_25] : memref<3x84x224xf32, #tpu.memory_space<vmem>>, vector<1x84x224xf32>
    %25 = vector.shape_cast %24 : vector<1x84x224xf32> to vector<84x224xf32>
    %cst_26 = arith.constant dense<0.000000e+00> : vector<112x224xf32>
    %26 = tpu.matmul %23, %25, %cst_26 {dimension_numbers = #tpu.dot_dimension_numbers<[1], [0], [0], [1], [0, 0, 1, 1], [], []>} : vector<112x84xf32>, vector<84x224xf32>, vector<112x224xf32> -> vector<112x224xf32>
    %27 = arith.addf %16, %26 : vector<112x224xf32>
    %c1 = arith.constant 1 : index
    %c0_27 = arith.constant 0 : index
    %c0_28 = arith.constant 0 : index
    %28 = vector.load %arg6[%c1, %c0_27, %c0_28] : memref<3x112x224xf32, #tpu.memory_space<vmem>>, vector<1x112x224xf32>
    %29 = vector.shape_cast %28 : vector<1x112x224xf32> to vector<112x224xf32>
    %cst_29 = arith.constant dense<0.000000e+00> : vector<112x84xf32>
    %30 = tpu.matmul %29, %12, %cst_29 {dimension_numbers = #tpu.dot_dimension_numbers<[1], [0], [0], [1], [0, 0, 1, 1], [], []>} : vector<112x224xf32>, vector<224x84xf32>, vector<112x84xf32> -> vector<112x84xf32>
    %c1_30 = arith.constant 1 : index
    %c0_31 = arith.constant 0 : index
    %c0_32 = arith.constant 0 : index
    %31 = vector.load %arg7[%c1_30, %c0_31, %c0_32] : memref<3x112x224xf32, #tpu.memory_space<vmem>>, vector<1x112x224xf32>
    %32 = vector.shape_cast %31 : vector<1x112x224xf32> to vector<112x224xf32>
    %cst_33 = arith.constant dense<0.000000e+00> : vector<112x84xf32>
    %33 = tpu.matmul %32, %12, %cst_33 {dimension_numbers = #tpu.dot_dimension_numbers<[1], [0], [0], [1], [0, 0, 1, 1], [], []>} : vector<112x224xf32>, vector<224x84xf32>, vector<112x84xf32> -> vector<112x84xf32>
    %34 = arith.maximumf %30, %33 : vector<112x84xf32>
    %c1_34 = arith.constant 1 : index
    %c0_35 = arith.constant 0 : index
    %c0_36 = arith.constant 0 : index
    %35 = vector.load %arg8[%c1_34, %c0_35, %c0_36] : memref<3x84x224xf32, #tpu.memory_space<vmem>>, vector<1x84x224xf32>
    %36 = vector.shape_cast %35 : vector<1x84x224xf32> to vector<84x224xf32>
    %cst_37 = arith.constant dense<0.000000e+00> : vector<112x224xf32>
    %37 = tpu.matmul %34, %36, %cst_37 {dimension_numbers = #tpu.dot_dimension_numbers<[1], [0], [0], [1], [0, 0, 1, 1], [], []>} : vector<112x84xf32>, vector<84x224xf32>, vector<112x224xf32> -> vector<112x224xf32>
    %38 = arith.addf %27, %37 : vector<112x224xf32>
    %c2 = arith.constant 2 : index
    %c0_38 = arith.constant 0 : index
    %c0_39 = arith.constant 0 : index
    %39 = vector.load %arg6[%c2, %c0_38, %c0_39] : memref<3x112x224xf32, #tpu.memory_space<vmem>>, vector<1x112x224xf32>
    %40 = vector.shape_cast %39 : vector<1x112x224xf32> to vector<112x224xf32>
    %cst_40 = arith.constant dense<0.000000e+00> : vector<112x84xf32>
    %41 = tpu.matmul %40, %12, %cst_40 {dimension_numbers = #tpu.dot_dimension_numbers<[1], [0], [0], [1], [0, 0, 1, 1], [], []>} : vector<112x224xf32>, vector<224x84xf32>, vector<112x84xf32> -> vector<112x84xf32>
    %c2_41 = arith.constant 2 : index
    %c0_42 = arith.constant 0 : index
    %c0_43 = arith.constant 0 : index
    %42 = vector.load %arg7[%c2_41, %c0_42, %c0_43] : memref<3x112x224xf32, #tpu.memory_space<vmem>>, vector<1x112x224xf32>
    %43 = vector.shape_cast %42 : vector<1x112x224xf32> to vector<112x224xf32>
    %cst_44 = arith.constant dense<0.000000e+00> : vector<112x84xf32>
    %44 = tpu.matmul %43, %12, %cst_44 {dimension_numbers = #tpu.dot_dimension_numbers<[1], [0], [0], [1], [0, 0, 1, 1], [], []>} : vector<112x224xf32>, vector<224x84xf32>, vector<112x84xf32> -> vector<112x84xf32>
    %45 = arith.maximumf %41, %44 : vector<112x84xf32>
    %c2_45 = arith.constant 2 : index
    %c0_46 = arith.constant 0 : index
    %c0_47 = arith.constant 0 : index
    %46 = vector.load %arg8[%c2_45, %c0_46, %c0_47] : memref<3x84x224xf32, #tpu.memory_space<vmem>>, vector<1x84x224xf32>
    %47 = vector.shape_cast %46 : vector<1x84x224xf32> to vector<84x224xf32>
    %cst_48 = arith.constant dense<0.000000e+00> : vector<112x224xf32>
    %48 = tpu.matmul %45, %47, %cst_48 {dimension_numbers = #tpu.dot_dimension_numbers<[1], [0], [0], [1], [0, 0, 1, 1], [], []>} : vector<112x84xf32>, vector<84x224xf32>, vector<112x224xf32> -> vector<112x224xf32>
    %49 = arith.addf %38, %48 : vector<112x224xf32>
    %cst_49 = arith.constant 0.000000e+00 : f32
    %50 = vector.broadcast %cst_49 : f32 to vector<112x224xf32>
    %51 = arith.maximumf %49, %50 : vector<112x224xf32>
    %c0_50 = arith.constant 0 : index
    %c0_51 = arith.constant 0 : index
    %52 = vector.load %arg10[%c0_50, %c0_51] : memref<224x112xf32, #tpu.memory_space<vmem>>, vector<224x112xf32>
    %cst_52 = arith.constant dense<0.000000e+00> : vector<112x112xf32>
    %53 = tpu.matmul %51, %52, %cst_52 {dimension_numbers = #tpu.dot_dimension_numbers<[1], [0], [0], [1], [0, 0, 1, 1], [], []>} : vector<112x224xf32>, vector<224x112xf32>, vector<112x112xf32> -> vector<112x112xf32>
    %c0_53 = arith.constant 0 : index
    %c0_54 = arith.constant 0 : index
    %54 = vector.load %arg11[%c0_53, %c0_54] : memref<224x112xf32, #tpu.memory_space<vmem>>, vector<224x112xf32>
    %cst_55 = arith.constant dense<0.000000e+00> : vector<112x112xf32>
    %55 = tpu.matmul %51, %54, %cst_55 {dimension_numbers = #tpu.dot_dimension_numbers<[1], [0], [0], [1], [0, 0, 1, 1], [], []>} : vector<112x224xf32>, vector<224x112xf32>, vector<112x112xf32> -> vector<112x112xf32>
    %56 = arith.maximumf %53, %55 : vector<112x112xf32>
    %cst_56 = arith.constant 0.000000e+00 : f32
    %57 = vector.broadcast %cst_56 : f32 to vector<8x128xf32>
    %c0_57 = arith.constant 0 : index
    %c0_58 = arith.constant 0 : index
    %58 = vector.load %arg15[%c0_57, %c0_58] : memref<1x128xf32, #tpu.memory_space<vmem>>, vector<1x128xf32>
    %59 = vector.broadcast %58 : vector<1x128xf32> to vector<8x128xf32>
    %60 = arith.addf %57, %59 : vector<8x128xf32>
    %c0_59 = arith.constant 0 : index
    %c0_60 = arith.constant 0 : index
    %c0_61 = arith.constant 0 : index
    %61 = vector.load %arg12[%c0_59, %c0_60, %c0_61] : memref<7x8x112xf32, #tpu.memory_space<vmem>>, vector<1x8x112xf32>
    %62 = vector.shape_cast %61 : vector<1x8x112xf32> to vector<8x112xf32>
    %cst_62 = arith.constant dense<0.000000e+00> : vector<8x112xf32>
    %63 = tpu.matmul %62, %56, %cst_62 {dimension_numbers = #tpu.dot_dimension_numbers<[1], [0], [0], [1], [0, 0, 1, 1], [], []>} : vector<8x112xf32>, vector<112x112xf32>, vector<8x112xf32> -> vector<8x112xf32>
    %c0_63 = arith.constant 0 : index
    %c0_64 = arith.constant 0 : index
    %c0_65 = arith.constant 0 : index
    %64 = vector.load %arg13[%c0_63, %c0_64, %c0_65] : memref<7x8x112xf32, #tpu.memory_space<vmem>>, vector<1x8x112xf32>
    %65 = vector.shape_cast %64 : vector<1x8x112xf32> to vector<8x112xf32>
    %cst_66 = arith.constant dense<0.000000e+00> : vector<8x112xf32>
    %66 = tpu.matmul %65, %56, %cst_66 {dimension_numbers = #tpu.dot_dimension_numbers<[1], [0], [0], [1], [0, 0, 1, 1], [], []>} : vector<8x112xf32>, vector<112x112xf32>, vector<8x112xf32> -> vector<8x112xf32>
    %67 = arith.maximumf %63, %66 : vector<8x112xf32>
    %c0_67 = arith.constant 0 : index
    %c0_68 = arith.constant 0 : index
    %c0_69 = arith.constant 0 : index
    %68 = vector.load %arg14[%c0_67, %c0_68, %c0_69] : memref<7x112x128xf32, #tpu.memory_space<vmem>>, vector<1x112x128xf32>
    %69 = vector.shape_cast %68 : vector<1x112x128xf32> to vector<112x128xf32>
    %cst_70 = arith.constant dense<0.000000e+00> : vector<8x128xf32>
    %70 = tpu.matmul %67, %69, %cst_70 {dimension_numbers = #tpu.dot_dimension_numbers<[1], [0], [0], [1], [0, 0, 1, 1], [], []>} : vector<8x112xf32>, vector<112x128xf32>, vector<8x128xf32> -> vector<8x128xf32>
    %71 = arith.addf %60, %70 : vector<8x128xf32>
    %c1_71 = arith.constant 1 : index
    %c0_72 = arith.constant 0 : index
    %c0_73 = arith.constant 0 : index
    %72 = vector.load %arg12[%c1_71, %c0_72, %c0_73] : memref<7x8x112xf32, #tpu.memory_space<vmem>>, vector<1x8x112xf32>
    %73 = vector.shape_cast %72 : vector<1x8x112xf32> to vector<8x112xf32>
    %cst_74 = arith.constant dense<0.000000e+00> : vector<8x112xf32>
    %74 = tpu.matmul %73, %56, %cst_74 {dimension_numbers = #tpu.dot_dimension_numbers<[1], [0], [0], [1], [0, 0, 1, 1], [], []>} : vector<8x112xf32>, vector<112x112xf32>, vector<8x112xf32> -> vector<8x112xf32>
    %c1_75 = arith.constant 1 : index
    %c0_76 = arith.constant 0 : index
    %c0_77 = arith.constant 0 : index
    %75 = vector.load %arg13[%c1_75, %c0_76, %c0_77] : memref<7x8x112xf32, #tpu.memory_space<vmem>>, vector<1x8x112xf32>
    %76 = vector.shape_cast %75 : vector<1x8x112xf32> to vector<8x112xf32>
    %cst_78 = arith.constant dense<0.000000e+00> : vector<8x112xf32>
    %77 = tpu.matmul %76, %56, %cst_78 {dimension_numbers = #tpu.dot_dimension_numbers<[1], [0], [0], [1], [0, 0, 1, 1], [], []>} : vector<8x112xf32>, vector<112x112xf32>, vector<8x112xf32> -> vector<8x112xf32>
    %78 = arith.maximumf %74, %77 : vector<8x112xf32>
    %c1_79 = arith.constant 1 : index
    %c0_80 = arith.constant 0 : index
    %c0_81 = arith.constant 0 : index
    %79 = vector.load %arg14[%c1_79, %c0_80, %c0_81] : memref<7x112x128xf32, #tpu.memory_space<vmem>>, vector<1x112x128xf32>
    %80 = vector.shape_cast %79 : vector<1x112x128xf32> to vector<112x128xf32>
    %cst_82 = arith.constant dense<0.000000e+00> : vector<8x128xf32>
    %81 = tpu.matmul %78, %80, %cst_82 {dimension_numbers = #tpu.dot_dimension_numbers<[1], [0], [0], [1], [0, 0, 1, 1], [], []>} : vector<8x112xf32>, vector<112x128xf32>, vector<8x128xf32> -> vector<8x128xf32>
    %82 = arith.addf %71, %81 : vector<8x128xf32>
    %c2_83 = arith.constant 2 : index
    %c0_84 = arith.constant 0 : index
    %c0_85 = arith.constant 0 : index
    %83 = vector.load %arg12[%c2_83, %c0_84, %c0_85] : memref<7x8x112xf32, #tpu.memory_space<vmem>>, vector<1x8x112xf32>
    %84 = vector.shape_cast %83 : vector<1x8x112xf32> to vector<8x112xf32>
    %cst_86 = arith.constant dense<0.000000e+00> : vector<8x112xf32>
    %85 = tpu.matmul %84, %56, %cst_86 {dimension_numbers = #tpu.dot_dimension_numbers<[1], [0], [0], [1], [0, 0, 1, 1], [], []>} : vector<8x112xf32>, vector<112x112xf32>, vector<8x112xf32> -> vector<8x112xf32>
    %c2_87 = arith.constant 2 : index
    %c0_88 = arith.constant 0 : index
    %c0_89 = arith.constant 0 : index
    %86 = vector.load %arg13[%c2_87, %c0_88, %c0_89] : memref<7x8x112xf32, #tpu.memory_space<vmem>>, vector<1x8x112xf32>
    %87 = vector.shape_cast %86 : vector<1x8x112xf32> to vector<8x112xf32>
    %cst_90 = arith.constant dense<0.000000e+00> : vector<8x112xf32>
    %88 = tpu.matmul %87, %56, %cst_90 {dimension_numbers = #tpu.dot_dimension_numbers<[1], [0], [0], [1], [0, 0, 1, 1], [], []>} : vector<8x112xf32>, vector<112x112xf32>, vector<8x112xf32> -> vector<8x112xf32>
    %89 = arith.maximumf %85, %88 : vector<8x112xf32>
    %c2_91 = arith.constant 2 : index
    %c0_92 = arith.constant 0 : index
    %c0_93 = arith.constant 0 : index
    %90 = vector.load %arg14[%c2_91, %c0_92, %c0_93] : memref<7x112x128xf32, #tpu.memory_space<vmem>>, vector<1x112x128xf32>
    %91 = vector.shape_cast %90 : vector<1x112x128xf32> to vector<112x128xf32>
    %cst_94 = arith.constant dense<0.000000e+00> : vector<8x128xf32>
    %92 = tpu.matmul %89, %91, %cst_94 {dimension_numbers = #tpu.dot_dimension_numbers<[1], [0], [0], [1], [0, 0, 1, 1], [], []>} : vector<8x112xf32>, vector<112x128xf32>, vector<8x128xf32> -> vector<8x128xf32>
    %93 = arith.addf %82, %92 : vector<8x128xf32>
    %c3 = arith.constant 3 : index
    %c0_95 = arith.constant 0 : index
    %c0_96 = arith.constant 0 : index
    %94 = vector.load %arg12[%c3, %c0_95, %c0_96] : memref<7x8x112xf32, #tpu.memory_space<vmem>>, vector<1x8x112xf32>
    %95 = vector.shape_cast %94 : vector<1x8x112xf32> to vector<8x112xf32>
    %cst_97 = arith.constant dense<0.000000e+00> : vector<8x112xf32>
    %96 = tpu.matmul %95, %56, %cst_97 {dimension_numbers = #tpu.dot_dimension_numbers<[1], [0], [0], [1], [0, 0, 1, 1], [], []>} : vector<8x112xf32>, vector<112x112xf32>, vector<8x112xf32> -> vector<8x112xf32>
    %c3_98 = arith.constant 3 : index
    %c0_99 = arith.constant 0 : index
    %c0_100 = arith.constant 0 : index
    %97 = vector.load %arg13[%c3_98, %c0_99, %c0_100] : memref<7x8x112xf32, #tpu.memory_space<vmem>>, vector<1x8x112xf32>
    %98 = vector.shape_cast %97 : vector<1x8x112xf32> to vector<8x112xf32>
    %cst_101 = arith.constant dense<0.000000e+00> : vector<8x112xf32>
    %99 = tpu.matmul %98, %56, %cst_101 {dimension_numbers = #tpu.dot_dimension_numbers<[1], [0], [0], [1], [0, 0, 1, 1], [], []>} : vector<8x112xf32>, vector<112x112xf32>, vector<8x112xf32> -> vector<8x112xf32>
    %100 = arith.maximumf %96, %99 : vector<8x112xf32>
    %c3_102 = arith.constant 3 : index
    %c0_103 = arith.constant 0 : index
    %c0_104 = arith.constant 0 : index
    %101 = vector.load %arg14[%c3_102, %c0_103, %c0_104] : memref<7x112x128xf32, #tpu.memory_space<vmem>>, vector<1x112x128xf32>
    %102 = vector.shape_cast %101 : vector<1x112x128xf32> to vector<112x128xf32>
    %cst_105 = arith.constant dense<0.000000e+00> : vector<8x128xf32>
    %103 = tpu.matmul %100, %102, %cst_105 {dimension_numbers = #tpu.dot_dimension_numbers<[1], [0], [0], [1], [0, 0, 1, 1], [], []>} : vector<8x112xf32>, vector<112x128xf32>, vector<8x128xf32> -> vector<8x128xf32>
    %104 = arith.addf %93, %103 : vector<8x128xf32>
    %c4 = arith.constant 4 : index
    %c0_106 = arith.constant 0 : index
    %c0_107 = arith.constant 0 : index
    %105 = vector.load %arg12[%c4, %c0_106, %c0_107] : memref<7x8x112xf32, #tpu.memory_space<vmem>>, vector<1x8x112xf32>
    %106 = vector.shape_cast %105 : vector<1x8x112xf32> to vector<8x112xf32>
    %cst_108 = arith.constant dense<0.000000e+00> : vector<8x112xf32>
    %107 = tpu.matmul %106, %56, %cst_108 {dimension_numbers = #tpu.dot_dimension_numbers<[1], [0], [0], [1], [0, 0, 1, 1], [], []>} : vector<8x112xf32>, vector<112x112xf32>, vector<8x112xf32> -> vector<8x112xf32>
    %c4_109 = arith.constant 4 : index
    %c0_110 = arith.constant 0 : index
    %c0_111 = arith.constant 0 : index
    %108 = vector.load %arg13[%c4_109, %c0_110, %c0_111] : memref<7x8x112xf32, #tpu.memory_space<vmem>>, vector<1x8x112xf32>
    %109 = vector.shape_cast %108 : vector<1x8x112xf32> to vector<8x112xf32>
    %cst_112 = arith.constant dense<0.000000e+00> : vector<8x112xf32>
    %110 = tpu.matmul %109, %56, %cst_112 {dimension_numbers = #tpu.dot_dimension_numbers<[1], [0], [0], [1], [0, 0, 1, 1], [], []>} : vector<8x112xf32>, vector<112x112xf32>, vector<8x112xf32> -> vector<8x112xf32>
    %111 = arith.maximumf %107, %110 : vector<8x112xf32>
    %c4_113 = arith.constant 4 : index
    %c0_114 = arith.constant 0 : index
    %c0_115 = arith.constant 0 : index
    %112 = vector.load %arg14[%c4_113, %c0_114, %c0_115] : memref<7x112x128xf32, #tpu.memory_space<vmem>>, vector<1x112x128xf32>
    %113 = vector.shape_cast %112 : vector<1x112x128xf32> to vector<112x128xf32>
    %cst_116 = arith.constant dense<0.000000e+00> : vector<8x128xf32>
    %114 = tpu.matmul %111, %113, %cst_116 {dimension_numbers = #tpu.dot_dimension_numbers<[1], [0], [0], [1], [0, 0, 1, 1], [], []>} : vector<8x112xf32>, vector<112x128xf32>, vector<8x128xf32> -> vector<8x128xf32>
    %115 = arith.addf %104, %114 : vector<8x128xf32>
    %c5 = arith.constant 5 : index
    %c0_117 = arith.constant 0 : index
    %c0_118 = arith.constant 0 : index
    %116 = vector.load %arg12[%c5, %c0_117, %c0_118] : memref<7x8x112xf32, #tpu.memory_space<vmem>>, vector<1x8x112xf32>
    %117 = vector.shape_cast %116 : vector<1x8x112xf32> to vector<8x112xf32>
    %cst_119 = arith.constant dense<0.000000e+00> : vector<8x112xf32>
    %118 = tpu.matmul %117, %56, %cst_119 {dimension_numbers = #tpu.dot_dimension_numbers<[1], [0], [0], [1], [0, 0, 1, 1], [], []>} : vector<8x112xf32>, vector<112x112xf32>, vector<8x112xf32> -> vector<8x112xf32>
    %c5_120 = arith.constant 5 : index
    %c0_121 = arith.constant 0 : index
    %c0_122 = arith.constant 0 : index
    %119 = vector.load %arg13[%c5_120, %c0_121, %c0_122] : memref<7x8x112xf32, #tpu.memory_space<vmem>>, vector<1x8x112xf32>
    %120 = vector.shape_cast %119 : vector<1x8x112xf32> to vector<8x112xf32>
    %cst_123 = arith.constant dense<0.000000e+00> : vector<8x112xf32>
    %121 = tpu.matmul %120, %56, %cst_123 {dimension_numbers = #tpu.dot_dimension_numbers<[1], [0], [0], [1], [0, 0, 1, 1], [], []>} : vector<8x112xf32>, vector<112x112xf32>, vector<8x112xf32> -> vector<8x112xf32>
    %122 = arith.maximumf %118, %121 : vector<8x112xf32>
    %c5_124 = arith.constant 5 : index
    %c0_125 = arith.constant 0 : index
    %c0_126 = arith.constant 0 : index
    %123 = vector.load %arg14[%c5_124, %c0_125, %c0_126] : memref<7x112x128xf32, #tpu.memory_space<vmem>>, vector<1x112x128xf32>
    %124 = vector.shape_cast %123 : vector<1x112x128xf32> to vector<112x128xf32>
    %cst_127 = arith.constant dense<0.000000e+00> : vector<8x128xf32>
    %125 = tpu.matmul %122, %124, %cst_127 {dimension_numbers = #tpu.dot_dimension_numbers<[1], [0], [0], [1], [0, 0, 1, 1], [], []>} : vector<8x112xf32>, vector<112x128xf32>, vector<8x128xf32> -> vector<8x128xf32>
    %126 = arith.addf %115, %125 : vector<8x128xf32>
    %c6 = arith.constant 6 : index
    %c0_128 = arith.constant 0 : index
    %c0_129 = arith.constant 0 : index
    %127 = vector.load %arg12[%c6, %c0_128, %c0_129] : memref<7x8x112xf32, #tpu.memory_space<vmem>>, vector<1x8x112xf32>
    %128 = vector.shape_cast %127 : vector<1x8x112xf32> to vector<8x112xf32>
    %cst_130 = arith.constant dense<0.000000e+00> : vector<8x112xf32>
    %129 = tpu.matmul %128, %56, %cst_130 {dimension_numbers = #tpu.dot_dimension_numbers<[1], [0], [0], [1], [0, 0, 1, 1], [], []>} : vector<8x112xf32>, vector<112x112xf32>, vector<8x112xf32> -> vector<8x112xf32>
    %c6_131 = arith.constant 6 : index
    %c0_132 = arith.constant 0 : index
    %c0_133 = arith.constant 0 : index
    %130 = vector.load %arg13[%c6_131, %c0_132, %c0_133] : memref<7x8x112xf32, #tpu.memory_space<vmem>>, vector<1x8x112xf32>
    %131 = vector.shape_cast %130 : vector<1x8x112xf32> to vector<8x112xf32>
    %cst_134 = arith.constant dense<0.000000e+00> : vector<8x112xf32>
    %132 = tpu.matmul %131, %56, %cst_134 {dimension_numbers = #tpu.dot_dimension_numbers<[1], [0], [0], [1], [0, 0, 1, 1], [], []>} : vector<8x112xf32>, vector<112x112xf32>, vector<8x112xf32> -> vector<8x112xf32>
    %133 = arith.maximumf %129, %132 : vector<8x112xf32>
    %c6_135 = arith.constant 6 : index
    %c0_136 = arith.constant 0 : index
    %c0_137 = arith.constant 0 : index
    %134 = vector.load %arg14[%c6_135, %c0_136, %c0_137] : memref<7x112x128xf32, #tpu.memory_space<vmem>>, vector<1x112x128xf32>
    %135 = vector.shape_cast %134 : vector<1x112x128xf32> to vector<112x128xf32>
    %cst_138 = arith.constant dense<0.000000e+00> : vector<8x128xf32>
    %136 = tpu.matmul %133, %135, %cst_138 {dimension_numbers = #tpu.dot_dimension_numbers<[1], [0], [0], [1], [0, 0, 1, 1], [], []>} : vector<8x112xf32>, vector<112x128xf32>, vector<8x128xf32> -> vector<8x128xf32>
    %137 = arith.addf %126, %136 : vector<8x128xf32>
    %cst_139 = arith.constant 0.000000e+00 : f32
    %138 = vector.broadcast %cst_139 : f32 to vector<8x128xf32>
    %139 = arith.maximumf %137, %138 : vector<8x128xf32>
    %c0_140 = arith.constant 0 : index
    %c0_141 = arith.constant 0 : index
    %140 = vector.load %arg16[%c0_140, %c0_141] : memref<128x128xf32, #tpu.memory_space<vmem>>, vector<128x128xf32>
    %cst_142 = arith.constant dense<0.000000e+00> : vector<8x128xf32>
    %141 = tpu.matmul %139, %140, %cst_142 {dimension_numbers = #tpu.dot_dimension_numbers<[1], [0], [0], [1], [0, 0, 1, 1], [], []>} : vector<8x128xf32>, vector<128x128xf32>, vector<8x128xf32> -> vector<8x128xf32>
    %c0_143 = arith.constant 0 : index
    %c0_144 = arith.constant 0 : index
    %142 = vector.load %arg17[%c0_143, %c0_144] : memref<1x128xf32, #tpu.memory_space<vmem>>, vector<1x128xf32>
    %143 = vector.broadcast %142 : vector<1x128xf32> to vector<8x128xf32>
    %144 = arith.addf %141, %143 : vector<8x128xf32>
    %cst_145 = arith.constant 0.000000e+00 : f32
    %145 = vector.broadcast %cst_145 : f32 to vector<8x128xf32>
    %146 = arith.maximumf %144, %145 : vector<8x128xf32>
    %c0_146 = arith.constant 0 : index
    %c0_147 = arith.constant 0 : index
    %147 = vector.load %arg18[%c0_146, %c0_147] : memref<128x128xf32, #tpu.memory_space<vmem>>, vector<128x128xf32>
    %cst_148 = arith.constant dense<0.000000e+00> : vector<8x128xf32>
    %148 = tpu.matmul %146, %147, %cst_148 {dimension_numbers = #tpu.dot_dimension_numbers<[1], [0], [0], [1], [0, 0, 1, 1], [], []>} : vector<8x128xf32>, vector<128x128xf32>, vector<8x128xf32> -> vector<8x128xf32>
    %c0_149 = arith.constant 0 : index
    %c0_150 = arith.constant 0 : index
    %149 = vector.load %arg19[%c0_149, %c0_150] : memref<1x128xf32, #tpu.memory_space<vmem>>, vector<1x128xf32>
    %150 = vector.broadcast %149 : vector<1x128xf32> to vector<8x128xf32>
    %151 = arith.addf %148, %150 : vector<8x128xf32>
    %152 = math.tanh %151 : vector<8x128xf32>
    %c0_151 = arith.constant 0 : index
    %c0_152 = arith.constant 0 : index
    %153 = vector.load %arg20[%c0_151, %c0_152] : memref<8x128xf32, #tpu.memory_space<vmem>>, vector<8x128xf32>
    tpu.vector_store %arg20[%c0_151, %c0_152], %152 {strides = array<i32>} : memref<8x128xf32, #tpu.memory_space<vmem>>, vector<8x128xf32>,
    return
  }
  func.func @transform_0(%arg0: i32) -> (i32, i32) {
    %c0_i32 = arith.constant 0 : i32
    %c0_i32_0 = arith.constant 0 : i32
    return %arg0, %c0_i32 : i32, i32
  }
  func.func @transform_1(%arg0: i32) -> (i32, i32) {
    %c0_i32 = arith.constant 0 : i32
    %c0_i32_0 = arith.constant 0 : i32
    %c0_i32_1 = arith.constant 0 : i32
    return %c0_i32, %c0_i32_0 : i32, i32
  }
  func.func @transform_2(%arg0: i32) -> (i32, i32) {
    %c0_i32 = arith.constant 0 : i32
    %c0_i32_0 = arith.constant 0 : i32
    %c0_i32_1 = arith.constant 0 : i32
    return %c0_i32, %c0_i32_0 : i32, i32
  }
  func.func @transform_3(%arg0: i32) -> (i32, i32) {
    %c0_i32 = arith.constant 0 : i32
    %c0_i32_0 = arith.constant 0 : i32
    %c0_i32_1 = arith.constant 0 : i32
    return %c0_i32, %c0_i32_0 : i32, i32
  }
  func.func @transform_4(%arg0: i32) -> (i32, i32) {
    %c0_i32 = arith.constant 0 : i32
    %c0_i32_0 = arith.constant 0 : i32
    %c0_i32_1 = arith.constant 0 : i32
    return %c0_i32, %c0_i32_0 : i32, i32
  }
  func.func @transform_5(%arg0: i32) -> (i32, i32, i32) {
    %c0_i32 = arith.constant 0 : i32
    %c0_i32_0 = arith.constant 0 : i32
    %c0_i32_1 = arith.constant 0 : i32
    %c0_i32_2 = arith.constant 0 : i32
    return %c0_i32, %c0_i32_0, %c0_i32_1 : i32, i32, i32
  }
  func.func @transform_6(%arg0: i32) -> (i32, i32, i32) {
    %c0_i32 = arith.constant 0 : i32
    %c0_i32_0 = arith.constant 0 : i32
    %c0_i32_1 = arith.constant 0 : i32
    %c0_i32_2 = arith.constant 0 : i32
    return %c0_i32, %c0_i32_0, %c0_i32_1 : i32, i32, i32
  }
  func.func @transform_7(%arg0: i32) -> (i32, i32, i32) {
    %c0_i32 = arith.constant 0 : i32
    %c0_i32_0 = arith.constant 0 : i32
    %c0_i32_1 = arith.constant 0 : i32
    %c0_i32_2 = arith.constant 0 : i32
    return %c0_i32, %c0_i32_0, %c0_i32_1 : i32, i32, i32
  }
  func.func @transform_8(%arg0: i32) -> (i32, i32) {
    %c0_i32 = arith.constant 0 : i32
    %c0_i32_0 = arith.constant 0 : i32
    %c0_i32_1 = arith.constant 0 : i32
    return %c0_i32, %c0_i32_0 : i32, i32
  }
  func.func @transform_9(%arg0: i32) -> (i32, i32) {
    %c0_i32 = arith.constant 0 : i32
    %c0_i32_0 = arith.constant 0 : i32
    %c0_i32_1 = arith.constant 0 : i32
    return %c0_i32, %c0_i32_0 : i32, i32
  }
  func.func @transform_10(%arg0: i32) -> (i32, i32) {
    %c0_i32 = arith.constant 0 : i32
    %c0_i32_0 = arith.constant 0 : i32
    %c0_i32_1 = arith.constant 0 : i32
    return %c0_i32, %c0_i32_0 : i32, i32
  }
  func.func @transform_11(%arg0: i32) -> (i32, i32, i32) {
    %c0_i32 = arith.constant 0 : i32
    %c0_i32_0 = arith.constant 0 : i32
    %c0_i32_1 = arith.constant 0 : i32
    %c0_i32_2 = arith.constant 0 : i32
    return %c0_i32, %c0_i32_0, %c0_i32_1 : i32, i32, i32
  }
  func.func @transform_12(%arg0: i32) -> (i32, i32, i32) {
    %c0_i32 = arith.constant 0 : i32
    %c0_i32_0 = arith.constant 0 : i32
    %c0_i32_1 = arith.constant 0 : i32
    %c0_i32_2 = arith.constant 0 : i32
    return %c0_i32, %c0_i32_0, %c0_i32_1 : i32, i32, i32
  }
  func.func @transform_13(%arg0: i32) -> (i32, i32, i32) {
    %c0_i32 = arith.constant 0 : i32
    %c0_i32_0 = arith.constant 0 : i32
    %c0_i32_1 = arith.constant 0 : i32
    %c0_i32_2 = arith.constant 0 : i32
    return %c0_i32, %c0_i32_0, %c0_i32_1 : i32, i32, i32
  }
  func.func @transform_14(%arg0: i32) -> (i32, i32) {
    %c0_i32 = arith.constant 0 : i32
    %c0_i32_0 = arith.constant 0 : i32
    %c0_i32_1 = arith.constant 0 : i32
    return %c0_i32, %c0_i32_0 : i32, i32
  }
  func.func @transform_15(%arg0: i32) -> (i32, i32) {
    %c0_i32 = arith.constant 0 : i32
    %c0_i32_0 = arith.constant 0 : i32
    %c0_i32_1 = arith.constant 0 : i32
    return %c0_i32, %c0_i32_0 : i32, i32
  }
  func.func @transform_16(%arg0: i32) -> (i32, i32) {
    %c0_i32 = arith.constant 0 : i32
    %c0_i32_0 = arith.constant 0 : i32
    %c0_i32_1 = arith.constant 0 : i32
    return %c0_i32, %c0_i32_0 : i32, i32
  }
  func.func @transform_17(%arg0: i32) -> (i32, i32) {
    %c0_i32 = arith.constant 0 : i32
    %c0_i32_0 = arith.constant 0 : i32
    %c0_i32_1 = arith.constant 0 : i32
    return %c0_i32, %c0_i32_0 : i32, i32
  }
  func.func @transform_18(%arg0: i32) -> (i32, i32) {
    %c0_i32 = arith.constant 0 : i32
    %c0_i32_0 = arith.constant 0 : i32
    %c0_i32_1 = arith.constant 0 : i32
    return %c0_i32, %c0_i32_0 : i32, i32
  }
  func.func @transform_19(%arg0: i32) -> (i32, i32) {
    %c0_i32 = arith.constant 0 : i32
    %c0_i32_0 = arith.constant 0 : i32
    return %arg0, %c0_i32 : i32, i32
  }
}

</mosaic_0001>

<bundles_post_ra>
// kernel: encoder_forward.1
= control target key start
LH: loop header
LB: loop body
LE: loop exit
PB: predicated region body
PF: predicated region fallthrough
CT: control target
= control target key end

     0   :  { %s11041_s0 = inlined_call_operand.vmem [shape: f32[224,84], index: 0, kind: input, shape index: {}]   ;;  %s11042_s1 = inlined_call_operand.vmem [shape: f32[84,168], index: 1, kind: input, shape index: {}]   ;;  %s11043_s2 = inlined_call_operand.vmem [shape: f32[1,168], index: 2, kind: input, shape index: {}]   ;;  %s11044_s3 = inlined_call_operand.vmem [shape: f32[168,84], index: 3, kind: input, shape index: {}]   ;;  %s11045_s4 = inlined_call_operand.hbm [shape: f32[168,84], index: 4, kind: input, shape index: {}]   ;;  %s11046_s5 = inlined_call_operand.vmem [shape: f32[3,112,224], index: 5, kind: input, shape index: {}]   ;;  %s11047_s6 = inlined_call_operand.vmem [shape: f32[3,112,224], index: 6, kind: input, shape index: {}]   ;;  %s11048_s7 = inlined_call_operand.vmem [shape: f32[3,84,224], index: 7, kind: input, shape index: {}]   ;;  %s11049_s8 = inlined_call_operand.vmem [shape: f32[1,224], index: 8, kind: input, shape index: {}]   ;;  %s11050_s9 = inlined_call_operand.vmem [shape: f32[224,112], index: 9, kind: input, shape index: {}]   ;;  %s11051_s10 = inlined_call_operand.hbm [shape: f32[224,112], index: 10, kind: input, shape index: {}]   ;;  %s11052_s11 = inlined_call_operand.hbm [shape: f32[7,8,112], index: 11, kind: input, shape index: {}]   ;;  %s11053_s12 = inlined_call_operand.hbm [shape: f32[7,8,112], index: 12, kind: input, shape index: {}]   ;;  %s11054_s13 = inlined_call_operand.vmem [shape: f32[7,112,128], index: 13, kind: input, shape index: {}]   ;;  %s11055_s14 = inlined_call_operand.vmem [shape: f32[1,128], index: 14, kind: input, shape index: {}]   ;;  %s11056_s15 = inlined_call_operand.hbm [shape: f32[128,128], index: 15, kind: input, shape index: {}]   ;;  %s11057_s16 = inlined_call_operand.vmem [shape: f32[1,128], index: 16, kind: input, shape index: {}]   ;;  %s11058_s17 = inlined_call_operand.hbm [shape: f32[128,128], index: 17, kind: input, shape index: {}]   ;;  %s11059_s18 = inlined_call_operand.vmem [shape: f32[1,128], index: 18, kind: input, shape index: {}]   ;;  %s11060_s19 = inlined_call_operand.vmem [shape: f32[8,128], index: 19, kind: output, shape index: {}]  }
   0x1   :  { %11066 = sst [smem:[#allocation16_spill]] %s11041_s0 }
   0x2   :  { %11067 = sst [smem:[#allocation17_spill]] %s11042_s1 }
   0x3   :  { %11068 = sst [smem:[#allocation18_spill]] %s11043_s2 }
   0x4   :  { %11069 = sst [smem:[#allocation19_spill]] %s11044_s3 }
   0x5   :  { %24 = vsyncpa [#allocation3], 0 }
   0x6   :  { %25 = vsyncpa [#allocation5], 0 }
   0x7   :  { %26 = vsyncpa [#allocation8], 0 }
   0x8   :  { %27 = vsyncpa [#allocation11], 0  ;;  %s8275_s0 = smov [#allocation4]   ;;  %s8276_s20 = smov [#allocation7]  }
   0x9   :  { %s63_s30 = sshll.u32 %s8275_s0, 4  ;;  %s87_s21 = sshll.u32 %s8276_s20, 4  ;;  %s64_s30 = int_to_ptr.vmem [resolvable:$true] %s63_s30  ;;  %s8386_s21 = int_to_ptr.vmem [resolvable:$true] %s87_s21 }
   0xa   :  { %s8135_s2 = scalar_lea.hbm %s11051_s10, 3584 }
   0xb   :  { %p8136_p0 = scmp.ne.s32.totalorder %s11051_s10, %s8135_s2  ;;  %p8139_p1 = scmp.lt.u32.totalorder %s8135_s2, %s11051_s10 }
   0xd   :  { %p8141_p2 = pnand %p8139_p1, %p8136_p0 }
   0xf   :  { %8144 = shalt.err (!%p8141_p2)
}
  0x10   :  { %s8145_s26 = scalar_lea.vmem %s64_s30, 3584  ;;  %p8150_p4 = scmp.lt.s32.totalorder %s64_s30, %s64_s30 }
  0x11   :  { %p8146_p3 = scmp.ne.s32.totalorder %s64_s30, %s8145_s26  ;;  %p8151_p5 = scmp.lt.s32.totalorder %s8145_s26, %s8145_s26 }
  0x13   :  { %p8152_p6 = por %p8151_p5, %p8150_p4 }
  0x15   :  { %p8153_p7 = pnand %p8152_p6, %p8146_p3 }
  0x17   :  { %8156 = shalt.err (!%p8153_p7)
}
  0x18   :  { %s8277_s27 = smov 128   ;;  %s8278_s28 = smov 8  }
  0x19   :  { %69 = dma.hbm_to_vmem [thread:$0]  %s11051_s10, 3584, %s64_s30, [#allocation5], %s8277_s27, %s8277_s27, %s8278_s28  }
  0x1a   :  { %s8157_s22 = scalar_lea.hbm %s11053_s12, 896 }
  0x1b   :  { %p8158_p8 = scmp.ne.s32.totalorder %s11053_s12, %s8157_s22  ;;  %p8161_p9 = scmp.lt.u32.totalorder %s8157_s22, %s11053_s12 }
  0x1d   :  { %p8163_p10 = pnand %p8161_p9, %p8158_p8 }
  0x1f   :  { %8166 = shalt.err (!%p8163_p10)
}
  0x20   :  { %s8167_s3 = scalar_lea.vmem %s8386_s21, 896  ;;  %p8172_p12 = scmp.lt.s32.totalorder %s8386_s21, %s8386_s21 }
  0x21   :  { %p8168_p11 = scmp.ne.s32.totalorder %s8386_s21, %s8167_s3  ;;  %p8173_p13 = scmp.lt.s32.totalorder %s8167_s3, %s8167_s3 }
  0x23   :  { %p8174_p0 = por %p8173_p13, %p8172_p12 }
  0x25   :  { %p8175_p1 = pnand %p8174_p0, %p8168_p11 }
  0x27   :  { %8178 = shalt.err (!%p8175_p1)
}
  0x28   :  { %93 = dma.hbm_to_vmem [thread:$0]  %s11053_s12, 896, %s8386_s21, [#allocation8], %s8277_s27, %s8277_s27, %s8278_s28  }
  0x29   :  { %s8279_s26 = smov [#allocation2]   ;;  %s8280_s0 = smov [#allocation6]  }
  0x2a   :  { %s41_s29 = sshll.u32 %s8279_s26, 4  ;;  %s75_s20 = sshll.u32 %s8280_s0, 4  ;;  %s42_s29 = int_to_ptr.vmem [resolvable:$true] %s41_s29  ;;  %s8423_s20 = int_to_ptr.vmem [resolvable:$true] %s75_s20 }
  0x2b   :  { %s8179_s2 = scalar_lea.hbm %s11045_s4, 2688 }
  0x2c   :  { %p8180_p2 = scmp.ne.s32.totalorder %s11045_s4, %s8179_s2  ;;  %p8183_p3 = scmp.lt.u32.totalorder %s8179_s2, %s11045_s4 }
  0x2e   :  { %p8185_p4 = pnand %p8183_p3, %p8180_p2 }
  0x30   :  { %8188 = shalt.err (!%p8185_p4)
}
  0x31   :  { %s8189_s12 = scalar_lea.vmem %s42_s29, 2688  ;;  %p8194_p6 = scmp.lt.s32.totalorder %s42_s29, %s42_s29 }
  0x32   :  { %p8190_p5 = scmp.ne.s32.totalorder %s42_s29, %s8189_s12  ;;  %p8195_p7 = scmp.lt.s32.totalorder %s8189_s12, %s8189_s12 }
  0x34   :  { %p8196_p8 = por %p8195_p7, %p8194_p6 }
  0x36   :  { %p8197_p9 = pnand %p8196_p8, %p8190_p5 }
  0x38   :  { %8200 = shalt.err (!%p8197_p9)
}
  0x39   :  { %47 = dma.hbm_to_vmem [thread:$0]  %s11045_s4, 2688, %s42_s29, [#allocation3], %s8277_s27, %s8277_s27, %s8278_s28  }
  0x3a   :  { %s8201_s0 = scalar_lea.hbm %s11052_s11, 896 }
  0x3b   :  { %p8202_p10 = scmp.ne.s32.totalorder %s11052_s11, %s8201_s0  ;;  %p8205_p11 = scmp.lt.u32.totalorder %s8201_s0, %s11052_s11 }
  0x3d   :  { %p8207_p12 = pnand %p8205_p11, %p8202_p10 }
  0x3f   :  { %8210 = shalt.err (!%p8207_p12)
}
  0x40   :  { %s8211_s24 = scalar_lea.vmem %s8423_s20, 896  ;;  %p8216_p0 = scmp.lt.s32.totalorder %s8423_s20, %s8423_s20 }
  0x41   :  { %p8212_p13 = scmp.ne.s32.totalorder %s8423_s20, %s8211_s24  ;;  %p8217_p1 = scmp.lt.s32.totalorder %s8211_s24, %s8211_s24 }
  0x43   :  { %p8218_p2 = por %p8217_p1, %p8216_p0 }
  0x45   :  { %p8219_p3 = pnand %p8218_p2, %p8212_p13 }
  0x47   :  { %8222 = shalt.err (!%p8219_p3)
}
  0x48   :  { %81 = dma.hbm_to_vmem [thread:$0]  %s11052_s11, 896, %s8423_s20, [#allocation5], %s8277_s27, %s8277_s27, %s8278_s28  }
  0x49   :  { %s8281_s25 = smov [#allocation9]   ;;  %s8282_s12 = smov [#allocation10]  }
  0x4a   :  { %s103_s3 = sshll.u32 %s8281_s25, 4  ;;  %s117_s21 = sshll.u32 %s8282_s12, 4  ;;  %s104_s3 = int_to_ptr.vmem [resolvable:$true] %s103_s3  ;;  %s8460_s21 = int_to_ptr.vmem [resolvable:$true] %s117_s21 }
  0x4b   :  { %s8223_s26 = scalar_lea.hbm %s11056_s15, 2048 }
  0x4c   :  { %p8224_p4 = scmp.ne.s32.totalorder %s11056_s15, %s8223_s26  ;;  %p8227_p5 = scmp.lt.u32.totalorder %s8223_s26, %s11056_s15 }
  0x4e   :  { %p8229_p6 = pnand %p8227_p5, %p8224_p4 }
  0x50   :  { %8232 = shalt.err (!%p8229_p6)
}
  0x51   :  { %s8233_s11 = scalar_lea.vmem %s104_s3, 2048  ;;  %p8238_p8 = scmp.lt.s32.totalorder %s104_s3, %s104_s3 }
  0x52   :  { %p8234_p7 = scmp.ne.s32.totalorder %s104_s3, %s8233_s11  ;;  %p8239_p9 = scmp.lt.s32.totalorder %s8233_s11, %s8233_s11 }
  0x54   :  { %p8240_p10 = por %p8239_p9, %p8238_p8 }
  0x56   :  { %p8241_p11 = pnand %p8240_p10, %p8234_p7 }
  0x58   :  { %8244 = shalt.err (!%p8241_p11)
}
  0x59   :  { %109 = dma.hbm_to_vmem [thread:$0]  %s11056_s15, 2048, %s104_s3, [#allocation8], %s8277_s27, %s8277_s27, %s8278_s28  }
  0x5a   :  { %s8245_s29 = scalar_lea.hbm %s11058_s17, 2048 }
  0x5b   :  { %p8246_p12 = scmp.ne.s32.totalorder %s11058_s17, %s8245_s29  ;;  %p8249_p13 = scmp.lt.u32.totalorder %s8245_s29, %s11058_s17 }
  0x5d   :  { %p8251_p0 = pnand %p8249_p13, %p8246_p12 }
  0x5f   :  { %8254 = shalt.err (!%p8251_p0)
}
  0x60   :  { %s8255_s26 = scalar_lea.vmem %s8460_s21, 2048  ;;  %p8260_p2 = scmp.lt.s32.totalorder %s8460_s21, %s8460_s21 }
  0x61   :  { %p8256_p1 = scmp.ne.s32.totalorder %s8460_s21, %s8255_s26  ;;  %p8261_p3 = scmp.lt.s32.totalorder %s8255_s26, %s8255_s26 }
  0x63   :  { %p8262_p4 = por %p8261_p3, %p8260_p2 }
  0x65   :  { %p8263_p5 = pnand %p8262_p4, %p8256_p1 }
  0x67   :  { %8266 = shalt.err (!%p8263_p5)
}
  0x68   :  { %123 = dma.hbm_to_vmem [thread:$0]  %s11058_s17, 2048, %s8460_s21, [#allocation11], %s8277_s27, %s8277_s27, %s8278_s28  }
  0x69   :  { %8267 = dma.done.wait [#allocation3], 2688  }
  0x6a   :  { %8268 = vsyncadd [#allocation3], 4294964608 }
  0x6b   :  { %8269 = dma.done.wait [#allocation5], 4480  }
  0x6c   :  { %8270 = vsyncadd [#allocation5], 4294962816 }
  0x6d   :  { %8271 = dma.done.wait [#allocation8], 2944  }
  0x6e   :  { %8272 = vsyncadd [#allocation8], 4294964352 }
  0x6f   :  { %8273 = dma.done.wait [#allocation11], 2048  }
  0x70   :  { %8274 = vsyncadd [#allocation11], 4294965248  ;;  %v8283_v0 = vmov 0.0   ;;  %s11070_s22 = sld [smem:[#allocation17_spill]]  ;;  %v8284_v20 = vmov 0.0|0.0   ;;  %vm291_vm0 = vcmask 1043456  }
  0x71   :  { %362 = vmatprep.mubr.f32.mxu0 %v8283_v0  ;;  %7080 = vmatprep.subr.bf16.mxu1 %v8284_v20  ;;  %v898_v33 = vld [vmem:[#allocation2] sm:$0xff]  ;;  %v899_v34 = vld [vmem:[#allocation2 + $0x8] sm:$0xff]  ;;  %s11071_s28 = sld [smem:[#allocation19_spill]]  ;;  %s11072_s4 = sld [smem:[#allocation16_spill]]  ;;  %vm206_vm1 = vcmask 687104   ;;  %v900_v43 = vld [vmem:[#allocation2 + $0x10] sm:$0xff] }
  0x72   :  { %v7111_v39 = vpack.c.bf16 %v899_v34, %v898_v33  ;;  %v901_v44 = vld [vmem:[#allocation2 + $0x18] sm:$0xff]  ;;  %v902_v50 = vld [vmem:[#allocation2 + $0x20] sm:$0xff]  ;;  %v903_v51 = vld [vmem:[#allocation2 + $0x28] sm:$0xff]  ;;  %s11073_s23 = sld [smem:[#allocation18_spill]]  ;;  %vm608_vm2 = vcmask 326656   ;;  %vm1194_vm3 = vcmask 785408  }
  0x73   :  { %v7114_v49 = vpack.c.bf16 %v901_v44, %v900_v43  ;;  %v7117_v56 = vpack.c.bf16 %v903_v51, %v902_v50  ;;  %v904_v57 = vld [vmem:[#allocation2 + $0x30] sm:$0xff]  ;;  %v905_v58 = vld [vmem:[#allocation2 + $0x38] sm:$0xff]  ;;  %vm8285_vm4 = vmmov 0   ;;  %vm3605_vm5 = vcmask 916480  }
  0x74   :  { %v7120_v63 = vpack.c.bf16 %v905_v58, %v904_v57 }
  0x76   :  { %v173_v1 = vld [vmem:[%s11070_s22 + $0x8] sm:$0xff]  ;;  %v175_v2 = vld [vmem:[%s11070_s22 + $0x18] sm:$0xff]  ;;  %v172_v3 = vld [vmem:[%s11070_s22] sm:$0xff] }
  0x77   :  { %v7060_v4 = vpack.c.bf16 %v175_v2, %v173_v1  ;;  %v174_v5 = vld [vmem:[%s11070_s22 + $0x10] sm:$0xff]  ;;  %v177_v6 = vld [vmem:[%s11070_s22 + $0x28] sm:$0xff]  ;;  %v179_v7 = vld [vmem:[%s11070_s22 + $0x38] sm:$0xff] }
  0x78   :  { %v7062_v8 = vpack.c.bf16 %v174_v5, %v172_v3  ;;  %v7064_v9 = vpack.c.bf16 %v179_v7, %v177_v6  ;;  %v176_v10 = vld [vmem:[%s11070_s22 + $0x20] sm:$0xff]  ;;  %v178_v11 = vld [vmem:[%s11070_s22 + $0x30] sm:$0xff]  ;;  %v181_v12 = vld [vmem:[%s11070_s22 + $0x48] sm:$0xff] }
  0x79   :  { %7061 = vmatprep.subr.bf16.mxu0 %v7060_v4  ;;  %v183_v13 = vld [vmem:[%s11070_s22 + $0x58] sm:$0xff]  ;;  %v7066_v14 = vpack.c.bf16 %v178_v11, %v176_v10  ;;  %v180_v16 = vld [vmem:[%s11070_s22 + $0x40] sm:$0xff]  ;;  %v182_v17 = vld [vmem:[%s11070_s22 + $0x50] sm:$0xff] }
  0x7a   :  { %7063 = vmatpush1.bf16.msra.mxu0 %v7062_v8  ;;  %v7068_v15 = vpack.c.bf16 %v183_v13, %v181_v12  ;;  %v185_v18 = vld [vmem:[%s11070_s22 + $0x68] sm:$0xff]  ;;  %v187_v19 = vld [vmem:[%s11070_s22 + $0x78] sm:$0xff]  ;;  %v7070_v21 = vpack.c.bf16 %v182_v17, %v180_v16  ;;  %v184_v23 = vld [vmem:[%s11070_s22 + $0x60] sm:$0xff] }
  0x7b   :  { %7065 = vmatprep.subr.bf16.mxu0 %v7064_v9  ;;  %v7072_v22 = vpack.c.bf16 %v187_v19, %v185_v18  ;;  %v186_v24 = vld [vmem:[%s11070_s22 + $0x70] sm:$0xff]  ;;  %v189_v25 = vld [vmem:[%s11070_s22 + $0x88] sm:$0xff]  ;;  %v191_v26 = vld [vmem:[%s11070_s22 + $0x98] sm:$0xff] }
  0x7c   :  { %v7074_v27 = vpack.c.bf16 %v186_v24, %v184_v23  ;;  %v7076_v28 = vpack.c.bf16 %v191_v26, %v189_v25  ;;  %v188_v29 = vld [vmem:[%s11070_s22 + $0x80] sm:$0xff]  ;;  %v190_v30 = vld [vmem:[%s11070_s22 + $0x90] sm:$0xff]  ;;  %v193_v32 = vld [vmem:[%s11070_s22 + $0xa8] sm:$0xf] }
  0x7d   :  { %v7078_v31 = vpack.c.bf16 %v190_v30, %v188_v29  ;;  %v192_v35 = vld [vmem:[%s11070_s22 + $0xa0] sm:$0xf]  ;;  %v588_v37 = vld [vmem:[%s11071_s28 + $0x8] sm:$0xff]  ;;  %v589_v41 = vld [vmem:[%s11071_s28 + $0x10] sm:$0xff] }
  0x7e   :  { %7067 = vmatpush1.bf16.msra.mxu0 %v7066_v14  ;;  %v587_v36 = vld [vmem:[%s11071_s28] sm:$0xff]  ;;  %v590_v42 = vld [vmem:[%s11071_s28 + $0x18] sm:$0xff]  ;;  %v592_v47 = vld [vmem:[%s11071_s28 + $0x28] sm:$0xff] }
  0x7f   :  { %7069 = vmatprep.subr.bf16.mxu0 %v7068_v15  ;;  %v144_v38 = vld [vmem:[%s11072_s4] sm:$0xff]  ;;  %v7081_v40 = vpack.c.bf16 %v588_v37, %v587_v36  ;;  %v7084_v45 = vpack.c.bf16 %v590_v42, %v589_v41  ;;  %v145_v48 = vld [vmem:[%s11072_s4 + $0x8] sm:$0xff]  ;;  %v593_v53 = vld [vmem:[%s11071_s28 + $0x30] sm:$0xff] }
  0x80   :  { %v591_v46 = vld [vmem:[%s11071_s28 + $0x20] sm:$0xff]  ;;  %v594_v54 = vld [vmem:[%s11071_s28 + $0x38] sm:$0xff]  ;;  %v146_v55 = vld [vmem:[%s11072_s4 + $0x10] sm:$0xff] }
  0x81   :  { %7082 = vmatpush1.bf16.msra.mxu1 %v7081_v40  ;;  %v7087_v52 = vpack.c.bf16 %v592_v47, %v591_v46  ;;  %v7090_v59 = vpack.c.bf16 %v594_v54, %v593_v53  ;;  %v595_v60 = vld [vmem:[%s11071_s28 + $0x40] sm:$0xff]  ;;  %v596_v61 = vld [vmem:[%s11071_s28 + $0x48] sm:$0xff]  ;;  %v147_v62 = vld [vmem:[%s11072_s4 + $0x18] sm:$0xff] }
  0x82   :  { %7071 = vmatpush1.bf16.msra.mxu0 %v7070_v21  ;;  %7083 = vmatprep.subr.bf16.mxu1 %v8284_v20  ;;  %v906_v1 = vld [vmem:[#allocation2 + $0x40] sm:$0xff]  ;;  %v907_v2 = vld [vmem:[#allocation2 + $0x48] sm:$0xff]  ;;  %v7093_v3 = vpack.c.bf16 %v596_v61, %v595_v60  ;;  %v597_v4 = vld [vmem:[%s11071_s28 + $0x50] sm:$0xff] }
  0x83   :  { %7073 = vmatprep.subr.bf16.mxu0 %v7072_v22  ;;  %v598_v5 = vld [vmem:[%s11071_s28 + $0x58] sm:$0xff]  ;;  %v148_v6 = vld [vmem:[%s11072_s4 + $0x20] sm:$0xff]  ;;  %v7123_v7 = vpack.c.bf16 %v907_v2, %v906_v1  ;;  %v908_v8 = vld [vmem:[#allocation2 + $0x50] sm:$0xff] }
  0x84   :  { %v909_v9 = vld [vmem:[#allocation2 + $0x58] sm:$0xff]  ;;  %v7096_v10 = vpack.c.bf16 %v598_v5, %v597_v4  ;;  %v599_v11 = vld [vmem:[%s11071_s28 + $0x60] sm:$0xff]  ;;  %v600_v12 = vld [vmem:[%s11071_s28 + $0x68] sm:$0xff] }
  0x85   :  { %7085 = vmatpush1.bf16.msra.mxu1 %v7084_v45  ;;  %v149_v13 = vld [vmem:[%s11072_s4 + $0x28] sm:$0xff]  ;;  %v7126_v14 = vpack.c.bf16 %v909_v9, %v908_v8  ;;  %v910_v15 = vld [vmem:[#allocation2 + $0x60] sm:$0xff]  ;;  %v7099_v17 = vpack.c.bf16 %v600_v12, %v599_v11  ;;  %v601_v18 = vld [vmem:[%s11071_s28 + $0x70] sm:$0xff] }
  0x86   :  { %7075 = vmatpush1.bf16.msra.mxu0 %v7074_v27  ;;  %7086 = vmatprep.subr.bf16.mxu1 %v8284_v20  ;;  %v911_v16 = vld [vmem:[#allocation2 + $0x68] sm:$0xff]  ;;  %v602_v19 = vld [vmem:[%s11071_s28 + $0x78] sm:$0xff]  ;;  %v150_v21 = vld [vmem:[%s11072_s4 + $0x30] sm:$0xff] }
  0x87   :  { %7077 = vmatprep.subr.bf16.mxu0 %v7076_v28  ;;  %v7129_v22 = vpack.c.bf16 %v911_v16, %v910_v15  ;;  %v912_v23 = vld [vmem:[#allocation2 + $0x70] sm:$0xff]  ;;  %v913_v24 = vld [vmem:[#allocation2 + $0x78] sm:$0xff]  ;;  %v7102_v25 = vpack.c.bf16 %v602_v19, %v601_v18  ;;  %v603_v26 = vld [vmem:[%s11071_s28 + $0x80] sm:$0xff] }
  0x88   :  { %v604_v27 = vld [vmem:[%s11071_s28 + $0x88] sm:$0xff]  ;;  %v151_v28 = vld [vmem:[%s11072_s4 + $0x38] sm:$0xff]  ;;  %v7132_v29 = vpack.c.bf16 %v913_v24, %v912_v23  ;;  %v914_v30 = vld [vmem:[#allocation2 + $0x80] sm:$0xff] }
  0x89   :  { %7088 = vmatpush1.bf16.msra.mxu1 %v7087_v52  ;;  %v152_v33 = vld [vmem:[%s11072_s4 + $0x40] sm:$0xff]  ;;  %v917_v36 = vld [vmem:[#allocation2 + $0x98] sm:$0xff]  ;;  %v153_v37 = vld [vmem:[%s11072_s4 + $0x48] sm:$0xff] }
  0x8a   :  { %7079 = vmatpush1.bf16.msra.mxu0 %v7078_v31  ;;  %7089 = vmatprep.subr.bf16.mxu1 %v8284_v20  ;;  %v915_v31 = vld [vmem:[#allocation2 + $0x88] sm:$0xff]  ;;  %v155_v40 = vld [vmem:[%s11072_s4 + $0x58] sm:$0xff]  ;;  %v156_v41 = vld [vmem:[%s11072_s4 + $0x60] sm:$0xff] }
  0x8b   :  { %5480 = vmatprep.subr.msk.mxu0 %vm291_vm0, %v193_v32  ;;  %v7105_v32 = vpack.c.bf16 %v604_v27, %v603_v26  ;;  %v7135_v34 = vpack.c.bf16 %v915_v31, %v914_v30  ;;  %v157_v42 = vld [vmem:[%s11072_s4 + $0x68] sm:$0xff]  ;;  %v158_v43 = vld [vmem:[%s11072_s4 + $0x70] sm:$0xff]  ;;  %v159_v44 = vld [vmem:[%s11072_s4 + $0x78] sm:$0xff] }
  0x8c   :  { %v160_v45 = vld [vmem:[%s11072_s4 + $0x80] sm:$0xff]  ;;  %v161_v46 = vld [vmem:[%s11072_s4 + $0x88] sm:$0xff]  ;;  %v162_v47 = vld [vmem:[%s11072_s4 + $0x90] sm:$0xff] }
  0x8d   :  { %7091 = vmatpush1.bf16.msra.mxu1 %v7090_v59  ;;  %v165_v50 = vld [vmem:[%s11072_s4 + $0xa8] sm:$0xff]  ;;  %v605_v51 = vld [vmem:[%s11071_s28 + $0x90] sm:$0xff]  ;;  %v606_v52 = vld [vmem:[%s11071_s28 + $0x98] sm:$0xff] }
  0x8e   :  { %5481 = vmatpush1.msk.msra.mxu0 %vm291_vm0, %v192_v35  ;;  %7092 = vmatprep.subr.bf16.mxu1 %v8284_v20  ;;  %v916_v35 = vld [vmem:[#allocation2 + $0x90] sm:$0xff]  ;;  %v7108_v53 = vpack.c.bf16 %v606_v52, %v605_v51  ;;  %v167_v57 = vld [vmem:[%s11072_s4 + $0xb8] sm:$0xff]  ;;  %v168_v58 = vld [vmem:[%s11072_s4 + $0xc0] sm:$0xff] }
  0x8f   :  { %5482 = vmatmul.mubr.msk.f32.vlgmr.msra.gmra.mrb[0].mxu0 %vm206_vm1, %v144_v38  ;;  %7110 = vmatprep.subr.bf16.mxu0 %v8284_v20  ;;  %v7138_v38 = vpack.c.bf16 %v917_v36, %v916_v35  ;;  %v166_v54 = vld [vmem:[%s11072_s4 + $0xb0] sm:$0xff]  ;;  %v169_v59 = vld [vmem:[%s11072_s4 + $0xc8] sm:$0xff]  ;;  %v171_v61 = vld [vmem:[%s11072_s4 + $0xd8] sm:$0xff] }
  0x90   :  { %368 = vmatprep.mubr.f32.mxu0 %v8283_v0  ;;  %7112 = vmatpush1.bf16.msra.mxu0 %v7111_v39  ;;  %v154_v39 = vld [vmem:[%s11072_s4 + $0x50] sm:$0xff]  ;;  %v194_v2 = vld [vmem:[%s11073_s23] sm:$0x3] }
  0x91   :  { %7113 = vmatprep.subr.bf16.mxu0 %v8284_v20  ;;  %7094 = vmatpush1.bf16.msra.mxu1 %v7093_v3  ;;  %v170_v60 = vld [vmem:[%s11072_s4 + $0xd0] sm:$0xff] }
  0x92   :  { %7095 = vmatprep.subr.bf16.mxu1 %v8284_v20 }
  0x93   :  { %5483 = vmatmul.mubr.msk.f32.gmra.mrb[2].mxu0 %vm206_vm1, %v145_v48  ;;  %v163_v48 = vld [vmem:[%s11072_s4 + $0x98] sm:$0xff] }
  0x94   :  { %374 = vmatprep.mubr.f32.mxu0 %v8283_v0  ;;  %7115 = vmatpush1.bf16.msra.mxu0 %v7114_v49  ;;  %v164_v49 = vld [vmem:[%s11072_s4 + $0xa0] sm:$0xff] }
  0x95   :  { %7116 = vmatprep.subr.bf16.mxu0 %v8284_v20  ;;  %7097 = vmatpush1.bf16.msra.mxu1 %v7096_v10 }
  0x96   :  { %7098 = vmatprep.subr.bf16.mxu1 %v8284_v20 }
  0x97   :  { %5484 = vmatmul.mubr.msk.f32.gmra.mrb[4].mxu0 %vm206_vm1, %v146_v55  ;;  %v918_v55 = vld [vmem:[#allocation2 + $0xa0] sm:$0xff] }
  0x98   :  { %380 = vmatprep.mubr.f32.mxu0 %v8283_v0  ;;  %7118 = vmatpush1.bf16.msra.mxu0 %v7117_v56  ;;  %v607_v56 = vld [vmem:[%s11071_s28 + $0xa0] sm:$0xff] }
  0x99   :  { %7119 = vmatprep.subr.bf16.mxu0 %v8284_v20  ;;  %7100 = vmatpush1.bf16.msra.mxu1 %v7099_v17 }
  0x9a   :  { %7101 = vmatprep.subr.bf16.mxu1 %v8284_v20 }
  0x9b   :  { %5485 = vmatmul.mubr.msk.f32.gmra.mrb[6].mxu0 %vm206_vm1, %v147_v62  ;;  %v196_v62 = vlaneseq }
  0x9c   :  { %386 = vmatprep.mubr.f32.mxu0 %v8283_v0  ;;  %7121 = vmatpush1.bf16.msra.mxu0 %v7120_v63 }
  0x9d   :  { %7122 = vmatprep.subr.bf16.mxu0 %v8284_v20  ;;  %7103 = vmatpush1.bf16.msra.mxu1 %v7102_v25  ;;  %v8791_v63 = vshrl.u32 %v196_v62, 7 }
  0x9e   :  { %7104 = vmatprep.subr.bf16.mxu1 %v8284_v20 }
  0x9f   :  { %5486 = vmatmul.mubr.msk.f32.gmra.mrb[8].mxu0 %vm206_vm1, %v148_v6  ;;  %v11065_v1 = vsub.s32 0, %v8791_v63  ;;  %v11064_v3 = vsub.s32 1, %v8791_v63 }
  0xa0   :  { %392 = vmatprep.mubr.f32.mxu0 %v8283_v0  ;;  %7124 = vmatpush1.bf16.msra.mxu0 %v7123_v7 }
  0xa1   :  { %7125 = vmatprep.subr.bf16.mxu0 %v8284_v20  ;;  %7106 = vmatpush1.bf16.msra.mxu1 %v7105_v32  ;;  %v8800_v4 = vrot.slane %v194_v2, %v11065_v1  ;;  %v8804_v5 = vrot.slane %v194_v2, %v11064_v3 }
  0xa2   :  { %7107 = vmatprep.subr.bf16.mxu1 %v8284_v20 }
  0xa3   :  { %5487 = vmatmul.mubr.msk.f32.gmra.mrb[10].mxu0 %vm206_vm1, %v149_v13 }
  0xa4   :  { %398 = vmatprep.mubr.f32.mxu0 %v8283_v0  ;;  %7127 = vmatpush1.bf16.msra.mxu0 %v7126_v14 }
  0xa5   :  { %7128 = vmatprep.subr.bf16.mxu0 %v8284_v20  ;;  %7109 = vmatpush1.bf16.msra.mxu1 %v7108_v53 }
  0xa6   :  { %733 = vmatprep.subr.mxu1 %v8283_v0 }
  0xa7   :  { %5488 = vmatmul.mubr.msk.f32.gmra.mrb[12].mxu0 %vm206_vm1, %v150_v21 }
  0xa8   :  { %404 = vmatprep.mubr.f32.mxu0 %v8283_v0  ;;  %7130 = vmatpush1.bf16.msra.mxu0 %v7129_v22 }
  0xa9   :  { %7131 = vmatprep.subr.bf16.mxu0 %v8284_v20  ;;  %734 = vmatpush1.msra.mxu1 %v607_v56 }
  0xaa   :  { %7140 = vmatprep.subr.bf16.mxu1 %v8284_v20 }
  0xab   :  { %5489 = vmatmul.mubr.msk.f32.gmra.mrb[14].mxu0 %vm206_vm1, %v151_v28 }
  0xac   :  { %410 = vmatprep.mubr.f32.mxu0 %v8283_v0  ;;  %7133 = vmatpush1.bf16.msra.mxu0 %v7132_v29 }
  0xad   :  { %7134 = vmatprep.subr.bf16.mxu0 %v8284_v20 }
  0xaf   :  { %5490 = vmatmul.mubr.msk.f32.gmra.mrb[16].mxu0 %vm206_vm1, %v152_v33 }
  0xb0   :  { %416 = vmatprep.mubr.f32.mxu0 %v8283_v0  ;;  %7136 = vmatpush1.bf16.msra.mxu0 %v7135_v34 }
  0xb1   :  { %7137 = vmatprep.subr.bf16.mxu0 %v8284_v20 }
  0xb3   :  { %5491 = vmatmul.mubr.msk.f32.gmra.mrb[18].mxu0 %vm206_vm1, %v153_v37 }
  0xb4   :  { %422 = vmatprep.mubr.f32.mxu0 %v8283_v0  ;;  %7139 = vmatpush1.bf16.msra.mxu0 %v7138_v38 }
  0xb5   :  { %959 = vmatprep.subr.mxu0 %v8283_v0 }
  0xb7   :  { %5492 = vmatmul.mubr.msk.f32.gmra.mrb[20].mxu0 %vm206_vm1, %v154_v39 }
  0xb8   :  { %428 = vmatprep.mubr.f32.mxu0 %v8283_v0  ;;  %960 = vmatpush1.msra.mxu0 %v918_v55 }
  0xbb   :  { %5493 = vmatmul.mubr.msk.f32.gmra.mrb[22].mxu0 %vm206_vm1, %v155_v40 }
  0xbc   :  { %434 = vmatprep.mubr.f32.mxu0 %v8283_v0 }
  0xbf   :  { %5494 = vmatmul.mubr.msk.f32.gmra.mrb[24].mxu0 %vm206_vm1, %v156_v41 }
  0xc0   :  { %440 = vmatprep.mubr.f32.mxu0 %v8283_v0 }
  0xc3   :  { %5495 = vmatmul.mubr.msk.f32.gmra.mrb[26].mxu0 %vm206_vm1, %v157_v42 }
  0xc4   :  { %446 = vmatprep.mubr.f32.mxu0 %v8283_v0 }
  0xc7   :  { %5496 = vmatmul.mubr.msk.f32.gmra.mrb[28].mxu0 %vm206_vm1, %v158_v43 }
  0xc8   :  { %452 = vmatprep.mubr.f32.mxu0 %v8283_v0 }
  0xcb   :  { %5497 = vmatmul.mubr.msk.f32.gmra.mrb[30].mxu0 %vm206_vm1, %v159_v44 }
  0xcc   :  { %458 = vmatprep.mubr.f32.mxu0 %v8283_v0 }
  0xcf   :  { %5498 = vmatmul.mubr.msk.f32.gmra.mrb[32].mxu0 %vm206_vm1, %v160_v45 }
  0xd0   :  { %464 = vmatprep.mubr.f32.mxu0 %v8283_v0 }
  0xd3   :  { %5499 = vmatmul.mubr.msk.f32.gmra.mrb[34].mxu0 %vm206_vm1, %v161_v46 }
  0xd4   :  { %470 = vmatprep.mubr.f32.mxu0 %v8283_v0 }
  0xd7   :  { %5500 = vmatmul.mubr.msk.f32.gmra.mrb[36].mxu0 %vm206_vm1, %v162_v47 }
  0xd8   :  { %476 = vmatprep.mubr.f32.mxu0 %v8283_v0 }
  0xdb   :  { %5501 = vmatmul.mubr.msk.f32.gmra.mrb[38].mxu0 %vm206_vm1, %v163_v48 }
  0xdc   :  { %482 = vmatprep.mubr.f32.mxu0 %v8283_v0 }
  0xdf   :  { %5502 = vmatmul.mubr.msk.f32.gmra.mrb[40].mxu0 %vm206_vm1, %v164_v49 }
  0xe0   :  { %488 = vmatprep.mubr.f32.mxu0 %v8283_v0 }
  0xe3   :  { %5503 = vmatmul.mubr.msk.f32.gmra.mrb[42].mxu0 %vm206_vm1, %v165_v50 }
  0xe4   :  { %494 = vmatprep.mubr.f32.mxu0 %v8283_v0 }
  0xe7   :  { %5504 = vmatmul.mubr.msk.f32.gmra.mrb[44].mxu0 %vm206_vm1, %v166_v54 }
  0xe8   :  { %500 = vmatprep.mubr.f32.mxu0 %v8283_v0 }
  0xeb   :  { %5505 = vmatmul.mubr.msk.f32.gmra.mrb[46].mxu0 %vm206_vm1, %v167_v57 }
  0xec   :  { %506 = vmatprep.mubr.f32.mxu0 %v8283_v0 }
  0xef   :  { %5506 = vmatmul.mubr.msk.f32.gmra.mrb[48].mxu0 %vm206_vm1, %v168_v58 }
  0xf0   :  { %512 = vmatprep.mubr.f32.mxu0 %v8283_v0 }
  0xf3   :  { %5507 = vmatmul.mubr.msk.f32.gmra.mrb[50].mxu0 %vm206_vm1, %v169_v59 }
  0xf4   :  { %518 = vmatprep.mubr.f32.mxu0 %v8283_v0 }
  0xf7   :  { %5508 = vmatmul.mubr.msk.f32.gmra.mrb[52].mxu0 %vm206_vm1, %v170_v60 }
  0xf8   :  { %524 = vmatprep.mubr.f32.mxu0 %v8283_v0 }
  0xfb   :  { %5509 = vmatmul.mubr.msk.f32.gmra.mrb[54].mxu0 %vm206_vm1, %v171_v61 }
 0x162   :  { %v364_v6 = vpop.f32.mrb[0].mxu0 }
 0x163   :  { %v365_v7 = vadd.f32 %v364_v6, %v8800_v4  ;;  %v366_v8 = vpop.f32.mrb[1].mxu0 }
 0x164   :  { %v367_v9 = vadd.f32 %v366_v8, %v8804_v5 }
 0x165   :  { %v531_v12 = vmax.f32 %v365_v7, 0.0 }
 0x166   :  { %v532_v10 = vmax.f32 %v367_v9, 0.0  ;;  %v370_v11 = vpop.f32.mrb[2].mxu0 }
 0x167   :  { %v371_v13 = vadd.f32 %v370_v11, %v8800_v4  ;;  %v372_v14 = vpop.f32.mrb[3].mxu0 }
 0x168   :  { %v373_v15 = vadd.f32 %v372_v14, %v8804_v5  ;;  %5510 = vmatprep.mubr.msk.f32.mxu1 %vm608_vm2, %v532_v10  ;;  %5538 = vmatprep.mubr.msk.f32.mxu0 %vm608_vm2, %v532_v10 }
 0x169   :  { %758 = vmatmul.mubr.f32.vlgmr.msra.gmra.mrb[0].mxu1 %v531_v12  ;;  %984 = vmatmul.mubr.f32.vlgmr.msra.gmra.mrb[56].mxu0 %v531_v12  ;;  %v533_v18 = vmax.f32 %v371_v13, 0.0 }
 0x16a   :  { %v534_v16 = vmax.f32 %v373_v15, 0.0  ;;  %v376_v17 = vpop.f32.mrb[4].mxu0 }
 0x16b   :  { %v377_v19 = vadd.f32 %v376_v17, %v8800_v4  ;;  %v378_v21 = vpop.f32.mrb[5].mxu0 }
 0x16c   :  { %v379_v22 = vadd.f32 %v378_v21, %v8804_v5  ;;  %5511 = vmatprep.mubr.msk.f32.mxu1 %vm608_vm2, %v534_v16  ;;  %5539 = vmatprep.mubr.msk.f32.mxu0 %vm608_vm2, %v534_v16 }
 0x16d   :  { %763 = vmatmul.mubr.f32.gmra.mrb[2].mxu1 %v533_v18  ;;  %989 = vmatmul.mubr.f32.gmra.mrb[58].mxu0 %v533_v18  ;;  %v535_v25 = vmax.f32 %v377_v19, 0.0 }
 0x16e   :  { %v536_v23 = vmax.f32 %v379_v22, 0.0  ;;  %v382_v24 = vpop.f32.mrb[6].mxu0 }
 0x16f   :  { %v383_v26 = vadd.f32 %v382_v24, %v8800_v4  ;;  %v384_v27 = vpop.f32.mrb[7].mxu0 }
 0x170   :  { %v385_v28 = vadd.f32 %v384_v27, %v8804_v5  ;;  %5512 = vmatprep.mubr.msk.f32.mxu1 %vm608_vm2, %v536_v23  ;;  %5540 = vmatprep.mubr.msk.f32.mxu0 %vm608_vm2, %v536_v23 }
 0x171   :  { %768 = vmatmul.mubr.f32.gmra.mrb[4].mxu1 %v535_v25  ;;  %994 = vmatmul.mubr.f32.gmra.mrb[60].mxu0 %v535_v25  ;;  %v537_v31 = vmax.f32 %v383_v26, 0.0 }
 0x172   :  { %v538_v29 = vmax.f32 %v385_v28, 0.0  ;;  %v388_v30 = vpop.f32.mrb[8].mxu0 }
 0x173   :  { %v389_v32 = vadd.f32 %v388_v30, %v8800_v4  ;;  %v390_v33 = vpop.f32.mrb[9].mxu0 }
 0x174   :  { %v391_v34 = vadd.f32 %v390_v33, %v8804_v5  ;;  %5513 = vmatprep.mubr.msk.f32.mxu1 %vm608_vm2, %v538_v29  ;;  %5541 = vmatprep.mubr.msk.f32.mxu0 %vm608_vm2, %v538_v29 }
 0x175   :  { %773 = vmatmul.mubr.f32.gmra.mrb[6].mxu1 %v537_v31  ;;  %999 = vmatmul.mubr.f32.gmra.mrb[62].mxu0 %v537_v31  ;;  %v539_v37 = vmax.f32 %v389_v32, 0.0 }
 0x176   :  { %v540_v35 = vmax.f32 %v391_v34, 0.0  ;;  %v394_v36 = vpop.f32.mrb[10].mxu0 }
 0x177   :  { %v395_v38 = vadd.f32 %v394_v36, %v8800_v4  ;;  %v396_v39 = vpop.f32.mrb[11].mxu0 }
 0x178   :  { %v397_v40 = vadd.f32 %v396_v39, %v8804_v5  ;;  %5514 = vmatprep.mubr.msk.f32.mxu1 %vm608_vm2, %v540_v35  ;;  %5542 = vmatprep.mubr.msk.f32.mxu0 %vm608_vm2, %v540_v35 }
 0x179   :  { %778 = vmatmul.mubr.f32.gmra.mrb[8].mxu1 %v539_v37  ;;  %1004 = vmatmul.mubr.f32.gmra.mrb[64].mxu0 %v539_v37  ;;  %v541_v43 = vmax.f32 %v395_v38, 0.0 }
 0x17a   :  { %v542_v41 = vmax.f32 %v397_v40, 0.0  ;;  %v400_v42 = vpop.f32.mrb[12].mxu0 }
 0x17b   :  { %v401_v44 = vadd.f32 %v400_v42, %v8800_v4  ;;  %v402_v45 = vpop.f32.mrb[13].mxu0 }
 0x17c   :  { %v403_v46 = vadd.f32 %v402_v45, %v8804_v5  ;;  %5515 = vmatprep.mubr.msk.f32.mxu1 %vm608_vm2, %v542_v41  ;;  %5543 = vmatprep.mubr.msk.f32.mxu0 %vm608_vm2, %v542_v41 }
 0x17d   :  { %783 = vmatmul.mubr.f32.gmra.mrb[10].mxu1 %v541_v43  ;;  %1009 = vmatmul.mubr.f32.gmra.mrb[66].mxu0 %v541_v43  ;;  %v543_v49 = vmax.f32 %v401_v44, 0.0 }
 0x17e   :  { %v544_v47 = vmax.f32 %v403_v46, 0.0  ;;  %v406_v48 = vpop.f32.mrb[14].mxu0 }
 0x17f   :  { %v407_v50 = vadd.f32 %v406_v48, %v8800_v4  ;;  %v408_v51 = vpop.f32.mrb[15].mxu0 }
 0x180   :  { %v409_v52 = vadd.f32 %v408_v51, %v8804_v5  ;;  %5516 = vmatprep.mubr.msk.f32.mxu1 %vm608_vm2, %v544_v47  ;;  %5544 = vmatprep.mubr.msk.f32.mxu0 %vm608_vm2, %v544_v47 }
 0x181   :  { %788 = vmatmul.mubr.f32.gmra.mrb[12].mxu1 %v543_v49  ;;  %1014 = vmatmul.mubr.f32.gmra.mrb[68].mxu0 %v543_v49  ;;  %v545_v55 = vmax.f32 %v407_v50, 0.0 }
 0x182   :  { %v546_v53 = vmax.f32 %v409_v52, 0.0  ;;  %v412_v54 = vpop.f32.mrb[16].mxu0 }
 0x183   :  { %v413_v56 = vadd.f32 %v412_v54, %v8800_v4  ;;  %v414_v57 = vpop.f32.mrb[17].mxu0 }
 0x184   :  { %v415_v58 = vadd.f32 %v414_v57, %v8804_v5  ;;  %5517 = vmatprep.mubr.msk.f32.mxu1 %vm608_vm2, %v546_v53  ;;  %5545 = vmatprep.mubr.msk.f32.mxu0 %vm608_vm2, %v546_v53 }
 0x185   :  { %793 = vmatmul.mubr.f32.gmra.mrb[14].mxu1 %v545_v55  ;;  %1019 = vmatmul.mubr.f32.gmra.mrb[70].mxu0 %v545_v55  ;;  %v547_v61 = vmax.f32 %v413_v56, 0.0 }
 0x186   :  { %v548_v59 = vmax.f32 %v415_v58, 0.0  ;;  %v418_v60 = vpop.f32.mrb[18].mxu0 }
 0x187   :  { %v419_v62 = vadd.f32 %v418_v60, %v8800_v4  ;;  %v420_v2 = vpop.f32.mrb[19].mxu0 }
 0x188   :  { %v421_v6 = vadd.f32 %v420_v2, %v8804_v5  ;;  %5518 = vmatprep.mubr.msk.f32.mxu1 %vm608_vm2, %v548_v59  ;;  %5546 = vmatprep.mubr.msk.f32.mxu0 %vm608_vm2, %v548_v59 }
 0x189   :  { %798 = vmatmul.mubr.f32.gmra.mrb[16].mxu1 %v547_v61  ;;  %1024 = vmatmul.mubr.f32.gmra.mrb[72].mxu0 %v547_v61  ;;  %v549_v9 = vmax.f32 %v419_v62, 0.0 }
 0x18a   :  { %v550_v7 = vmax.f32 %v421_v6, 0.0  ;;  %v424_v8 = vpop.f32.mrb[20].mxu0 }
 0x18b   :  { %v425_v10 = vadd.f32 %v424_v8, %v8800_v4  ;;  %v426_v11 = vpop.f32.mrb[21].mxu0 }
 0x18c   :  { %v427_v12 = vadd.f32 %v426_v11, %v8804_v5  ;;  %5519 = vmatprep.mubr.msk.f32.mxu1 %vm608_vm2, %v550_v7  ;;  %5547 = vmatprep.mubr.msk.f32.mxu0 %vm608_vm2, %v550_v7 }
 0x18d   :  { %803 = vmatmul.mubr.f32.gmra.mrb[18].mxu1 %v549_v9  ;;  %1029 = vmatmul.mubr.f32.gmra.mrb[74].mxu0 %v549_v9  ;;  %v551_v15 = vmax.f32 %v425_v10, 0.0 }
 0x18e   :  { %v552_v13 = vmax.f32 %v427_v12, 0.0  ;;  %v430_v14 = vpop.f32.mrb[22].mxu0 }
 0x18f   :  { %v431_v16 = vadd.f32 %v430_v14, %v8800_v4  ;;  %v432_v17 = vpop.f32.mrb[23].mxu0 }
 0x190   :  { %v433_v18 = vadd.f32 %v432_v17, %v8804_v5  ;;  %5520 = vmatprep.mubr.msk.f32.mxu1 %vm608_vm2, %v552_v13  ;;  %5548 = vmatprep.mubr.msk.f32.mxu0 %vm608_vm2, %v552_v13 }
 0x191   :  { %808 = vmatmul.mubr.f32.gmra.mrb[20].mxu1 %v551_v15  ;;  %1034 = vmatmul.mubr.f32.gmra.mrb[76].mxu0 %v551_v15  ;;  %v553_v22 = vmax.f32 %v431_v16, 0.0 }
 0x192   :  { %v554_v19 = vmax.f32 %v433_v18, 0.0  ;;  %v436_v21 = vpop.f32.mrb[24].mxu0 }
 0x193   :  { %v437_v23 = vadd.f32 %v436_v21, %v8800_v4  ;;  %v438_v24 = vpop.f32.mrb[25].mxu0 }
 0x194   :  { %v439_v25 = vadd.f32 %v438_v24, %v8804_v5  ;;  %5521 = vmatprep.mubr.msk.f32.mxu1 %vm608_vm2, %v554_v19  ;;  %5549 = vmatprep.mubr.msk.f32.mxu0 %vm608_vm2, %v554_v19 }
 0x195   :  { %813 = vmatmul.mubr.f32.gmra.mrb[22].mxu1 %v553_v22  ;;  %1039 = vmatmul.mubr.f32.gmra.mrb[78].mxu0 %v553_v22  ;;  %v555_v28 = vmax.f32 %v437_v23, 0.0 }
 0x196   :  { %v556_v26 = vmax.f32 %v439_v25, 0.0  ;;  %v442_v27 = vpop.f32.mrb[26].mxu0 }
 0x197   :  { %v443_v29 = vadd.f32 %v442_v27, %v8800_v4  ;;  %v444_v30 = vpop.f32.mrb[27].mxu0 }
 0x198   :  { %v445_v31 = vadd.f32 %v444_v30, %v8804_v5  ;;  %5522 = vmatprep.mubr.msk.f32.mxu1 %vm608_vm2, %v556_v26  ;;  %5550 = vmatprep.mubr.msk.f32.mxu0 %vm608_vm2, %v556_v26 }
 0x199   :  { %818 = vmatmul.mubr.f32.gmra.mrb[24].mxu1 %v555_v28  ;;  %1044 = vmatmul.mubr.f32.gmra.mrb[80].mxu0 %v555_v28  ;;  %v557_v34 = vmax.f32 %v443_v29, 0.0 }
 0x19a   :  { %v558_v32 = vmax.f32 %v445_v31, 0.0  ;;  %v448_v33 = vpop.f32.mrb[28].mxu0 }
 0x19b   :  { %v449_v35 = vadd.f32 %v448_v33, %v8800_v4  ;;  %v450_v36 = vpop.f32.mrb[29].mxu0 }
 0x19c   :  { %v451_v37 = vadd.f32 %v450_v36, %v8804_v5  ;;  %5523 = vmatprep.mubr.msk.f32.mxu1 %vm608_vm2, %v558_v32  ;;  %5551 = vmatprep.mubr.msk.f32.mxu0 %vm608_vm2, %v558_v32 }
 0x19d   :  { %823 = vmatmul.mubr.f32.gmra.mrb[26].mxu1 %v557_v34  ;;  %1049 = vmatmul.mubr.f32.gmra.mrb[82].mxu0 %v557_v34  ;;  %v559_v40 = vmax.f32 %v449_v35, 0.0 }
 0x19e   :  { %v560_v38 = vmax.f32 %v451_v37, 0.0  ;;  %v454_v39 = vpop.f32.mrb[30].mxu0 }
 0x19f   :  { %v455_v41 = vadd.f32 %v454_v39, %v8800_v4  ;;  %v456_v42 = vpop.f32.mrb[31].mxu0 }
 0x1a0   :  { %v457_v43 = vadd.f32 %v456_v42, %v8804_v5  ;;  %5524 = vmatprep.mubr.msk.f32.mxu1 %vm608_vm2, %v560_v38  ;;  %5552 = vmatprep.mubr.msk.f32.mxu0 %vm608_vm2, %v560_v38 }
 0x1a1   :  { %828 = vmatmul.mubr.f32.gmra.mrb[28].mxu1 %v559_v40  ;;  %1054 = vmatmul.mubr.f32.gmra.mrb[84].mxu0 %v559_v40  ;;  %v561_v46 = vmax.f32 %v455_v41, 0.0 }
 0x1a2   :  { %v562_v44 = vmax.f32 %v457_v43, 0.0  ;;  %v460_v45 = vpop.f32.mrb[32].mxu0 }
 0x1a3   :  { %v461_v47 = vadd.f32 %v460_v45, %v8800_v4  ;;  %v462_v48 = vpop.f32.mrb[33].mxu0 }
 0x1a4   :  { %v463_v49 = vadd.f32 %v462_v48, %v8804_v5  ;;  %5525 = vmatprep.mubr.msk.f32.mxu1 %vm608_vm2, %v562_v44  ;;  %5553 = vmatprep.mubr.msk.f32.mxu0 %vm608_vm2, %v562_v44 }
 0x1a5   :  { %833 = vmatmul.mubr.f32.gmra.mrb[30].mxu1 %v561_v46  ;;  %1059 = vmatmul.mubr.f32.gmra.mrb[86].mxu0 %v561_v46  ;;  %v563_v52 = vmax.f32 %v461_v47, 0.0 }
 0x1a6   :  { %v564_v50 = vmax.f32 %v463_v49, 0.0  ;;  %v466_v51 = vpop.f32.mrb[34].mxu0 }
 0x1a7   :  { %v467_v53 = vadd.f32 %v466_v51, %v8800_v4  ;;  %v468_v54 = vpop.f32.mrb[35].mxu0 }
 0x1a8   :  { %v469_v55 = vadd.f32 %v468_v54, %v8804_v5  ;;  %5526 = vmatprep.mubr.msk.f32.mxu1 %vm608_vm2, %v564_v50  ;;  %5554 = vmatprep.mubr.msk.f32.mxu0 %vm608_vm2, %v564_v50 }
 0x1a9   :  { %838 = vmatmul.mubr.f32.gmra.mrb[32].mxu1 %v563_v52  ;;  %1064 = vmatmul.mubr.f32.gmra.mrb[88].mxu0 %v563_v52  ;;  %v565_v58 = vmax.f32 %v467_v53, 0.0 }
 0x1aa   :  { %v566_v56 = vmax.f32 %v469_v55, 0.0  ;;  %v472_v57 = vpop.f32.mrb[36].mxu0 }
 0x1ab   :  { %v473_v59 = vadd.f32 %v472_v57, %v8800_v4  ;;  %v474_v60 = vpop.f32.mrb[37].mxu0 }
 0x1ac   :  { %v475_v61 = vadd.f32 %v474_v60, %v8804_v5  ;;  %5527 = vmatprep.mubr.msk.f32.mxu1 %vm608_vm2, %v566_v56  ;;  %5555 = vmatprep.mubr.msk.f32.mxu0 %vm608_vm2, %v566_v56 }
 0x1ad   :  { %843 = vmatmul.mubr.f32.gmra.mrb[34].mxu1 %v565_v58  ;;  %1069 = vmatmul.mubr.f32.gmra.mrb[90].mxu0 %v565_v58  ;;  %v567_v6 = vmax.f32 %v473_v59, 0.0 }
 0x1ae   :  { %v568_v62 = vmax.f32 %v475_v61, 0.0  ;;  %v478_v2 = vpop.f32.mrb[38].mxu0 }
 0x1af   :  { %v479_v7 = vadd.f32 %v478_v2, %v8800_v4  ;;  %v480_v8 = vpop.f32.mrb[39].mxu0 }
 0x1b0   :  { %v481_v9 = vadd.f32 %v480_v8, %v8804_v5  ;;  %5528 = vmatprep.mubr.msk.f32.mxu1 %vm608_vm2, %v568_v62  ;;  %5556 = vmatprep.mubr.msk.f32.mxu0 %vm608_vm2, %v568_v62 }
 0x1b1   :  { %848 = vmatmul.mubr.f32.gmra.mrb[36].mxu1 %v567_v6  ;;  %1074 = vmatmul.mubr.f32.gmra.mrb[92].mxu0 %v567_v6  ;;  %v569_v12 = vmax.f32 %v479_v7, 0.0 }
 0x1b2   :  { %v570_v10 = vmax.f32 %v481_v9, 0.0  ;;  %v484_v11 = vpop.f32.mrb[40].mxu0 }
 0x1b3   :  { %v485_v13 = vadd.f32 %v484_v11, %v8800_v4  ;;  %v486_v14 = vpop.f32.mrb[41].mxu0 }
 0x1b4   :  { %v487_v15 = vadd.f32 %v486_v14, %v8804_v5  ;;  %5529 = vmatprep.mubr.msk.f32.mxu1 %vm608_vm2, %v570_v10  ;;  %5557 = vmatprep.mubr.msk.f32.mxu0 %vm608_vm2, %v570_v10 }
 0x1b5   :  { %853 = vmatmul.mubr.f32.gmra.mrb[38].mxu1 %v569_v12  ;;  %1079 = vmatmul.mubr.f32.gmra.mrb[94].mxu0 %v569_v12  ;;  %v571_v18 = vmax.f32 %v485_v13, 0.0 }
 0x1b6   :  { %v572_v16 = vmax.f32 %v487_v15, 0.0  ;;  %v490_v17 = vpop.f32.mrb[42].mxu0 }
 0x1b7   :  { %v491_v19 = vadd.f32 %v490_v17, %v8800_v4  ;;  %v492_v21 = vpop.f32.mrb[43].mxu0 }
 0x1b8   :  { %v493_v22 = vadd.f32 %v492_v21, %v8804_v5  ;;  %5530 = vmatprep.mubr.msk.f32.mxu1 %vm608_vm2, %v572_v16  ;;  %5558 = vmatprep.mubr.msk.f32.mxu0 %vm608_vm2, %v572_v16 }
 0x1b9   :  { %858 = vmatmul.mubr.f32.gmra.mrb[40].mxu1 %v571_v18  ;;  %1084 = vmatmul.mubr.f32.gmra.mrb[96].mxu0 %v571_v18  ;;  %v573_v25 = vmax.f32 %v491_v19, 0.0 }
 0x1ba   :  { %v574_v23 = vmax.f32 %v493_v22, 0.0  ;;  %v496_v24 = vpop.f32.mrb[44].mxu0 }
 0x1bb   :  { %v497_v26 = vadd.f32 %v496_v24, %v8800_v4  ;;  %v498_v27 = vpop.f32.mrb[45].mxu0 }
 0x1bc   :  { %v499_v28 = vadd.f32 %v498_v27, %v8804_v5  ;;  %5531 = vmatprep.mubr.msk.f32.mxu1 %vm608_vm2, %v574_v23  ;;  %5559 = vmatprep.mubr.msk.f32.mxu0 %vm608_vm2, %v574_v23 }
 0x1bd   :  { %863 = vmatmul.mubr.f32.gmra.mrb[42].mxu1 %v573_v25  ;;  %1089 = vmatmul.mubr.f32.gmra.mrb[98].mxu0 %v573_v25  ;;  %v575_v31 = vmax.f32 %v497_v26, 0.0 }
 0x1be   :  { %v576_v29 = vmax.f32 %v499_v28, 0.0  ;;  %v502_v30 = vpop.f32.mrb[46].mxu0 }
 0x1bf   :  { %v503_v32 = vadd.f32 %v502_v30, %v8800_v4  ;;  %v504_v33 = vpop.f32.mrb[47].mxu0 }
 0x1c0   :  { %v505_v34 = vadd.f32 %v504_v33, %v8804_v5  ;;  %5532 = vmatprep.mubr.msk.f32.mxu1 %vm608_vm2, %v576_v29  ;;  %5560 = vmatprep.mubr.msk.f32.mxu0 %vm608_vm2, %v576_v29 }
 0x1c1   :  { %868 = vmatmul.mubr.f32.gmra.mrb[44].mxu1 %v575_v31  ;;  %1094 = vmatmul.mubr.f32.gmra.mrb[100].mxu0 %v575_v31  ;;  %v577_v37 = vmax.f32 %v503_v32, 0.0 }
 0x1c2   :  { %v578_v35 = vmax.f32 %v505_v34, 0.0  ;;  %v508_v36 = vpop.f32.mrb[48].mxu0 }
 0x1c3   :  { %v509_v38 = vadd.f32 %v508_v36, %v8800_v4  ;;  %v510_v39 = vpop.f32.mrb[49].mxu0 }
 0x1c4   :  { %v511_v40 = vadd.f32 %v510_v39, %v8804_v5  ;;  %5533 = vmatprep.mubr.msk.f32.mxu1 %vm608_vm2, %v578_v35  ;;  %5561 = vmatprep.mubr.msk.f32.mxu0 %vm608_vm2, %v578_v35 }
 0x1c5   :  { %873 = vmatmul.mubr.f32.gmra.mrb[46].mxu1 %v577_v37  ;;  %1099 = vmatmul.mubr.f32.gmra.mrb[102].mxu0 %v577_v37  ;;  %v579_v43 = vmax.f32 %v509_v38, 0.0 }
 0x1c6   :  { %v580_v41 = vmax.f32 %v511_v40, 0.0  ;;  %v514_v42 = vpop.f32.mrb[50].mxu0 }
 0x1c7   :  { %v515_v44 = vadd.f32 %v514_v42, %v8800_v4  ;;  %v516_v45 = vpop.f32.mrb[51].mxu0 }
 0x1c8   :  { %v517_v46 = vadd.f32 %v516_v45, %v8804_v5  ;;  %5534 = vmatprep.mubr.msk.f32.mxu1 %vm608_vm2, %v580_v41  ;;  %5562 = vmatprep.mubr.msk.f32.mxu0 %vm608_vm2, %v580_v41 }
 0x1c9   :  { %878 = vmatmul.mubr.f32.gmra.mrb[48].mxu1 %v579_v43  ;;  %1104 = vmatmul.mubr.f32.gmra.mrb[104].mxu0 %v579_v43  ;;  %v581_v49 = vmax.f32 %v515_v44, 0.0 }
 0x1ca   :  { %v582_v47 = vmax.f32 %v517_v46, 0.0  ;;  %v520_v48 = vpop.f32.mrb[52].mxu0 }
 0x1cb   :  { %v521_v50 = vadd.f32 %v520_v48, %v8800_v4  ;;  %v522_v51 = vpop.f32.mrb[53].mxu0 }
 0x1cc   :  { %v523_v52 = vadd.f32 %v522_v51, %v8804_v5  ;;  %5535 = vmatprep.mubr.msk.f32.mxu1 %vm608_vm2, %v582_v47  ;;  %5563 = vmatprep.mubr.msk.f32.mxu0 %vm608_vm2, %v582_v47 }
 0x1cd   :  { %883 = vmatmul.mubr.f32.gmra.mrb[50].mxu1 %v581_v49  ;;  %1109 = vmatmul.mubr.f32.gmra.mrb[106].mxu0 %v581_v49  ;;  %v583_v55 = vmax.f32 %v521_v50, 0.0 }
 0x1ce   :  { %v584_v53 = vmax.f32 %v523_v52, 0.0  ;;  %v526_v54 = vpop.f32.mrb[54].mxu0 }
 0x1cf   :  { %v527_v56 = vadd.f32 %v526_v54, %v8800_v4  ;;  %v528_v57 = vpop.f32.mrb[55].mxu0  ;;  %v1167_v4 = vld [vmem:[%s11046_s5 + $0x8] sm:$0xff] }
 0x1d0   :  { %v529_v58 = vadd.f32 %v528_v57, %v8804_v5  ;;  %5536 = vmatprep.mubr.msk.f32.mxu1 %vm608_vm2, %v584_v53  ;;  %5564 = vmatprep.mubr.msk.f32.mxu0 %vm608_vm2, %v584_v53 }
 0x1d1   :  { %888 = vmatmul.mubr.f32.gmra.mrb[52].mxu1 %v583_v55  ;;  %1114 = vmatmul.mubr.f32.gmra.mrb[108].mxu0 %v583_v55  ;;  %v585_v60 = vmax.f32 %v527_v56, 0.0 }
 0x1d2   :  { %v586_v59 = vmax.f32 %v529_v58, 0.0 }
 0x1d4   :  { %5537 = vmatprep.mubr.msk.f32.mxu1 %vm608_vm2, %v586_v59  ;;  %5565 = vmatprep.mubr.msk.f32.mxu0 %vm608_vm2, %v586_v59 }
 0x1d5   :  { %893 = vmatmul.mubr.f32.gmra.mrb[54].mxu1 %v585_v60  ;;  %1119 = vmatmul.mubr.f32.gmra.mrb[110].mxu0 %v585_v60 }
 0x1d6   :  { %1725 = vmatprep.mubr.f32.mxu0 %v8283_v0  ;;  %5566 = vmatprep.mubr.msk.f32.mxu1 %vm1194_vm3, %v1167_v4 }
 0x23c   :  { %v759_v5 = vpop.f32.mrb[0].mxu1  ;;  %v985_v61 = vpop.f32.mrb[56].mxu0 }
 0x23d   :  { %v1124_v62 = vmax.f32 %v759_v5, %v985_v61  ;;  %v761_v2 = vpop.f32.mrb[1].mxu1  ;;  %v987_v6 = vpop.f32.mrb[57].mxu0 }
 0x240   :  { %v764_v7 = vpop.f32.mrb[2].mxu1  ;;  %v990_v8 = vpop.f32.mrb[58].mxu0 }
 0x241   :  { %v1125_v9 = vmax.f32 %v764_v7, %v990_v8  ;;  %v766_v10 = vpop.f32.mrb[3].mxu1  ;;  %v992_v11 = vpop.f32.mrb[59].mxu0 }
 0x243   :  { %v8923_v12 = vpack.c.bf16 %v1125_v9, %v1124_v62 }
 0x244   :  { %v769_v13 = vpop.f32.mrb[4].mxu1  ;;  %v995_v14 = vpop.f32.mrb[60].mxu0 }
 0x245   :  { %v1126_v15 = vmax.f32 %v769_v13, %v995_v14  ;;  %v771_v16 = vpop.f32.mrb[5].mxu1  ;;  %v997_v17 = vpop.f32.mrb[61].mxu0  ;;  %7142 = vmatpush1.bf16.msra.mxu1 %v8923_v12 }
 0x246   :  { %7143 = vmatprep.subr.bf16.mxu1 %v8284_v20 }
 0x248   :  { %v774_v18 = vpop.f32.mrb[6].mxu1  ;;  %v1000_v19 = vpop.f32.mrb[62].mxu0 }
 0x249   :  { %v1127_v21 = vmax.f32 %v774_v18, %v1000_v19  ;;  %v776_v22 = vpop.f32.mrb[7].mxu1  ;;  %v1002_v23 = vpop.f32.mrb[63].mxu0 }
 0x24b   :  { %v8927_v24 = vpack.c.bf16 %v1127_v21, %v1126_v15 }
 0x24c   :  { %v779_v25 = vpop.f32.mrb[8].mxu1  ;;  %v1005_v26 = vpop.f32.mrb[64].mxu0 }
 0x24d   :  { %v1128_v27 = vmax.f32 %v779_v25, %v1005_v26  ;;  %v781_v28 = vpop.f32.mrb[9].mxu1  ;;  %v1007_v29 = vpop.f32.mrb[65].mxu0  ;;  %7145 = vmatpush1.bf16.msra.mxu1 %v8927_v24 }
 0x24e   :  { %7146 = vmatprep.subr.bf16.mxu1 %v8284_v20 }
 0x250   :  { %v784_v30 = vpop.f32.mrb[10].mxu1  ;;  %v1010_v31 = vpop.f32.mrb[66].mxu0 }
 0x251   :  { %v1129_v32 = vmax.f32 %v784_v30, %v1010_v31  ;;  %v786_v33 = vpop.f32.mrb[11].mxu1  ;;  %v1012_v34 = vpop.f32.mrb[67].mxu0 }
 0x253   :  { %v8931_v35 = vpack.c.bf16 %v1129_v32, %v1128_v27 }
 0x254   :  { %v789_v36 = vpop.f32.mrb[12].mxu1  ;;  %v1015_v37 = vpop.f32.mrb[68].mxu0 }
 0x255   :  { %v1130_v38 = vmax.f32 %v789_v36, %v1015_v37  ;;  %v791_v39 = vpop.f32.mrb[13].mxu1  ;;  %v1017_v40 = vpop.f32.mrb[69].mxu0  ;;  %7148 = vmatpush1.bf16.msra.mxu1 %v8931_v35 }
 0x256   :  { %7149 = vmatprep.subr.bf16.mxu1 %v8284_v20 }
 0x258   :  { %v794_v41 = vpop.f32.mrb[14].mxu1  ;;  %v1020_v42 = vpop.f32.mrb[70].mxu0 }
 0x259   :  { %v1131_v43 = vmax.f32 %v794_v41, %v1020_v42  ;;  %v796_v44 = vpop.f32.mrb[15].mxu1  ;;  %v1022_v45 = vpop.f32.mrb[71].mxu0 }
 0x25b   :  { %v8935_v46 = vpack.c.bf16 %v1131_v43, %v1130_v38 }
 0x25c   :  { %v799_v47 = vpop.f32.mrb[16].mxu1  ;;  %v1025_v48 = vpop.f32.mrb[72].mxu0 }
 0x25d   :  { %v1132_v49 = vmax.f32 %v799_v47, %v1025_v48  ;;  %v801_v50 = vpop.f32.mrb[17].mxu1  ;;  %v1027_v51 = vpop.f32.mrb[73].mxu0  ;;  %7151 = vmatpush1.bf16.msra.mxu1 %v8935_v46 }
 0x25e   :  { %7152 = vmatprep.subr.bf16.mxu1 %v8284_v20 }
 0x260   :  { %v804_v52 = vpop.f32.mrb[18].mxu1  ;;  %v1030_v53 = vpop.f32.mrb[74].mxu0 }
 0x261   :  { %v1133_v54 = vmax.f32 %v804_v52, %v1030_v53  ;;  %v806_v55 = vpop.f32.mrb[19].mxu1  ;;  %v1032_v56 = vpop.f32.mrb[75].mxu0 }
 0x263   :  { %v8939_v57 = vpack.c.bf16 %v1133_v54, %v1132_v49 }
 0x264   :  { %v809_v58 = vpop.f32.mrb[20].mxu1  ;;  %v1035_v59 = vpop.f32.mrb[76].mxu0 }
 0x265   :  { %v1134_v60 = vmax.f32 %v809_v58, %v1035_v59  ;;  %v811_v4 = vpop.f32.mrb[21].mxu1  ;;  %v1037_v5 = vpop.f32.mrb[77].mxu0  ;;  %7154 = vmatpush1.bf16.msra.mxu1 %v8939_v57 }
 0x266   :  { %7155 = vmatprep.subr.bf16.mxu1 %v8284_v20 }
 0x268   :  { %v814_v61 = vpop.f32.mrb[22].mxu1  ;;  %v1040_v62 = vpop.f32.mrb[78].mxu0 }
 0x269   :  { %v1135_v2 = vmax.f32 %v814_v61, %v1040_v62  ;;  %v816_v6 = vpop.f32.mrb[23].mxu1  ;;  %v1042_v7 = vpop.f32.mrb[79].mxu0 }
 0x26b   :  { %v8943_v8 = vpack.c.bf16 %v1135_v2, %v1134_v60 }
 0x26c   :  { %v819_v9 = vpop.f32.mrb[24].mxu1  ;;  %v1045_v10 = vpop.f32.mrb[80].mxu0 }
 0x26d   :  { %v1136_v11 = vmax.f32 %v819_v9, %v1045_v10  ;;  %v821_v13 = vpop.f32.mrb[25].mxu1  ;;  %v1047_v14 = vpop.f32.mrb[81].mxu0  ;;  %7157 = vmatpush1.bf16.msra.mxu1 %v8943_v8 }
 0x26e   :  { %7158 = vmatprep.subr.bf16.mxu1 %v8284_v20 }
 0x270   :  { %v824_v15 = vpop.f32.mrb[26].mxu1  ;;  %v1050_v16 = vpop.f32.mrb[82].mxu0 }
 0x271   :  { %v1137_v17 = vmax.f32 %v824_v15, %v1050_v16  ;;  %v826_v18 = vpop.f32.mrb[27].mxu1  ;;  %v1052_v19 = vpop.f32.mrb[83].mxu0 }
 0x273   :  { %v8947_v21 = vpack.c.bf16 %v1137_v17, %v1136_v11 }
 0x274   :  { %v829_v22 = vpop.f32.mrb[28].mxu1  ;;  %v1055_v23 = vpop.f32.mrb[84].mxu0 }
 0x275   :  { %v1138_v25 = vmax.f32 %v829_v22, %v1055_v23  ;;  %v831_v26 = vpop.f32.mrb[29].mxu1  ;;  %v1057_v27 = vpop.f32.mrb[85].mxu0  ;;  %7160 = vmatpush1.bf16.msra.mxu1 %v8947_v21 }
 0x276   :  { %7161 = vmatprep.subr.bf16.mxu1 %v8284_v20 }
 0x278   :  { %v834_v28 = vpop.f32.mrb[30].mxu1  ;;  %v1060_v29 = vpop.f32.mrb[86].mxu0 }
 0x279   :  { %v1139_v30 = vmax.f32 %v834_v28, %v1060_v29  ;;  %v836_v31 = vpop.f32.mrb[31].mxu1  ;;  %v1062_v32 = vpop.f32.mrb[87].mxu0 }
 0x27b   :  { %v8951_v33 = vpack.c.bf16 %v1139_v30, %v1138_v25 }
 0x27c   :  { %v839_v34 = vpop.f32.mrb[32].mxu1  ;;  %v1065_v36 = vpop.f32.mrb[88].mxu0 }
 0x27d   :  { %v1140_v37 = vmax.f32 %v839_v34, %v1065_v36  ;;  %v841_v38 = vpop.f32.mrb[33].mxu1  ;;  %v1067_v39 = vpop.f32.mrb[89].mxu0  ;;  %7163 = vmatpush1.bf16.msra.mxu1 %v8951_v33 }
 0x27e   :  { %7164 = vmatprep.subr.bf16.mxu1 %v8284_v20 }
 0x280   :  { %v844_v40 = vpop.f32.mrb[34].mxu1  ;;  %v1070_v41 = vpop.f32.mrb[90].mxu0 }
 0x281   :  { %v1141_v42 = vmax.f32 %v844_v40, %v1070_v41  ;;  %v846_v43 = vpop.f32.mrb[35].mxu1  ;;  %v1072_v44 = vpop.f32.mrb[91].mxu0 }
 0x283   :  { %v8955_v45 = vpack.c.bf16 %v1141_v42, %v1140_v37 }
 0x284   :  { %v849_v47 = vpop.f32.mrb[36].mxu1  ;;  %v1075_v48 = vpop.f32.mrb[92].mxu0 }
 0x285   :  { %v1142_v49 = vmax.f32 %v849_v47, %v1075_v48  ;;  %v851_v50 = vpop.f32.mrb[37].mxu1  ;;  %v1077_v51 = vpop.f32.mrb[93].mxu0  ;;  %7166 = vmatpush1.bf16.msra.mxu1 %v8955_v45 }
 0x286   :  { %7167 = vmatprep.subr.bf16.mxu1 %v8284_v20 }
 0x288   :  { %v854_v52 = vpop.f32.mrb[38].mxu1  ;;  %v1080_v53 = vpop.f32.mrb[94].mxu0 }
 0x289   :  { %v1143_v54 = vmax.f32 %v854_v52, %v1080_v53  ;;  %v856_v55 = vpop.f32.mrb[39].mxu1  ;;  %v1082_v56 = vpop.f32.mrb[95].mxu0  ;;  %v1166_v52 = vld [vmem:[%s11046_s5] sm:$0xff]  ;;  %v1169_v53 = vld [vmem:[%s11046_s5 + $0x18] sm:$0xff] }
 0x28a   :  { %v1171_v55 = vld [vmem:[%s11046_s5 + $0x28] sm:$0xff]  ;;  %v1170_v56 = vld [vmem:[%s11046_s5 + $0x20] sm:$0xff] }
 0x28b   :  { %v8959_v58 = vpack.c.bf16 %v1143_v54, %v1142_v49  ;;  %v1168_v54 = vld [vmem:[%s11046_s5 + $0x10] sm:$0xff] }
 0x28c   :  { %v859_v59 = vpop.f32.mrb[40].mxu1  ;;  %v1085_v60 = vpop.f32.mrb[96].mxu0 }
 0x28d   :  { %v1144_v4 = vmax.f32 %v859_v59, %v1085_v60  ;;  %v861_v5 = vpop.f32.mrb[41].mxu1  ;;  %v1087_v61 = vpop.f32.mrb[97].mxu0  ;;  %7169 = vmatpush1.bf16.msra.mxu1 %v8959_v58  ;;  %v1173_v59 = vld [vmem:[%s11046_s5 + $0x38] sm:$0xff]  ;;  %v1172_v60 = vld [vmem:[%s11046_s5 + $0x30] sm:$0xff] }
 0x28e   :  { %7170 = vmatprep.subr.bf16.mxu1 %v8284_v20  ;;  %v1174_v5 = vld [vmem:[%s11046_s5 + $0x40] sm:$0xff]  ;;  %v1177_v61 = vld [vmem:[%s11046_s5 + $0x58] sm:$0xff] }
 0x290   :  { %v864_v62 = vpop.f32.mrb[42].mxu1  ;;  %v1090_v2 = vpop.f32.mrb[98].mxu0 }
 0x291   :  { %v1145_v6 = vmax.f32 %v864_v62, %v1090_v2  ;;  %v866_v7 = vpop.f32.mrb[43].mxu1  ;;  %v1092_v9 = vpop.f32.mrb[99].mxu0  ;;  %v1176_v62 = vld [vmem:[%s11046_s5 + $0x50] sm:$0xff]  ;;  %v1179_v2 = vld [vmem:[%s11046_s5 + $0x68] sm:$0xff] }
 0x292   :  { %v1181_v7 = vld [vmem:[%s11046_s5 + $0x78] sm:$0xff]  ;;  %v1180_v9 = vld [vmem:[%s11046_s5 + $0x70] sm:$0xff] }
 0x293   :  { %v8963_v10 = vpack.c.bf16 %v1145_v6, %v1144_v4  ;;  %v1175_v4 = vld [vmem:[%s11046_s5 + $0x48] sm:$0xff]  ;;  %v1178_v6 = vld [vmem:[%s11046_s5 + $0x60] sm:$0xff] }
 0x294   :  { %v869_v11 = vpop.f32.mrb[44].mxu1  ;;  %v1095_v13 = vpop.f32.mrb[100].mxu0 }
 0x295   :  { %v1146_v14 = vmax.f32 %v869_v11, %v1095_v13  ;;  %v871_v15 = vpop.f32.mrb[45].mxu1  ;;  %v1097_v16 = vpop.f32.mrb[101].mxu0  ;;  %7172 = vmatpush1.bf16.msra.mxu1 %v8963_v10  ;;  %v1183_v11 = vld [vmem:[%s11046_s5 + $0x88] sm:$0xff]  ;;  %v1182_v13 = vld [vmem:[%s11046_s5 + $0x80] sm:$0xff] }
 0x296   :  { %7173 = vmatprep.subr.bf16.mxu1 %v8284_v20  ;;  %v1184_v15 = vld [vmem:[%s11046_s5 + $0x90] sm:$0xff]  ;;  %v1592_v16 = vld [vmem:[%s11048_s7 + $0x8] sm:$0xff] }
 0x298   :  { %v874_v17 = vpop.f32.mrb[46].mxu1  ;;  %v1100_v18 = vpop.f32.mrb[102].mxu0 }
 0x299   :  { %v1147_v19 = vmax.f32 %v874_v17, %v1100_v18  ;;  %v876_v22 = vpop.f32.mrb[47].mxu1  ;;  %v1102_v23 = vpop.f32.mrb[103].mxu0  ;;  %v1594_v17 = vld [vmem:[%s11048_s7 + $0x18] sm:$0xff]  ;;  %v1591_v18 = vld [vmem:[%s11048_s7] sm:$0xff] }
 0x29a   :  { %v7224_v22 = vpack.c.bf16 %v1594_v17, %v1592_v16  ;;  %v1593_v23 = vld [vmem:[%s11048_s7 + $0x10] sm:$0xff]  ;;  %v1604_v17 = vld [vmem:[%s11048_s7 + $0x68] sm:$0xff] }
 0x29b   :  { %v8967_v25 = vpack.c.bf16 %v1147_v19, %v1146_v14  ;;  %v1185_v14 = vld [vmem:[%s11046_s5 + $0x98] sm:$0xff]  ;;  %v1187_v19 = vld [vmem:[%s11046_s5 + $0xa8] sm:$0xff]  ;;  %v1390_v16 = vld [vmem:[%s11047_s6 + $0x90] sm:$0xff] }
 0x29c   :  { %v879_v26 = vpop.f32.mrb[48].mxu1  ;;  %v1105_v27 = vpop.f32.mrb[104].mxu0  ;;  %7225 = vmatprep.subr.bf16.mxu0 %v7224_v22 }
 0x29d   :  { %v1148_v28 = vmax.f32 %v879_v26, %v1105_v27  ;;  %v881_v29 = vpop.f32.mrb[49].mxu1  ;;  %v1107_v30 = vpop.f32.mrb[105].mxu0  ;;  %7175 = vmatpush1.bf16.msra.mxu1 %v8967_v25  ;;  %v7226_v26 = vpack.c.bf16 %v1593_v23, %v1591_v18  ;;  %v1186_v27 = vld [vmem:[%s11046_s5 + $0xa0] sm:$0xff]  ;;  %v1606_v18 = vld [vmem:[%s11048_s7 + $0x78] sm:$0xff] }
 0x29e   :  { %7176 = vmatprep.subr.bf16.mxu1 %v8284_v20  ;;  %v1188_v29 = vld [vmem:[%s11046_s5 + $0xb0] sm:$0xff]  ;;  %v1191_v30 = vld [vmem:[%s11046_s5 + $0xc8] sm:$0xff]  ;;  %v7236_v22 = vpack.c.bf16 %v1606_v18, %v1604_v17  ;;  %v1603_v23 = vld [vmem:[%s11048_s7 + $0x60] sm:$0xff] }
 0x29f   :  { %7227 = vmatpush1.bf16.msra.mxu0 %v7226_v26  ;;  %v1605_v26 = vld [vmem:[%s11048_s7 + $0x70] sm:$0xff]  ;;  %v5635_v18 = vld [vmem:[%s11046_s5 + $0x1a8] sm:$0xff] }
 0x2a0   :  { %v884_v31 = vpop.f32.mrb[50].mxu1  ;;  %v1110_v32 = vpop.f32.mrb[106].mxu0  ;;  %v5632_v17 = vld [vmem:[%s11046_s5 + $0x190] sm:$0xff] }
 0x2a1   :  { %v1149_v34 = vmax.f32 %v884_v31, %v1110_v32  ;;  %v886_v36 = vpop.f32.mrb[51].mxu1  ;;  %v1112_v37 = vpop.f32.mrb[107].mxu0  ;;  %v1190_v31 = vld [vmem:[%s11046_s5 + $0xc0] sm:$0xff]  ;;  %v1193_v32 = vld [vmem:[%s11046_s5 + $0xd8] sm:$0xff] }
 0x2a2   :  { %v1373_v36 = vld [vmem:[%s11047_s6 + $0x8] sm:$0xff] }
 0x2a3   :  { %v8971_v38 = vpack.c.bf16 %v1149_v34, %v1148_v28  ;;  %v1189_v28 = vld [vmem:[%s11046_s5 + $0xb8] sm:$0xff]  ;;  %v1192_v34 = vld [vmem:[%s11046_s5 + $0xd0] sm:$0xff]  ;;  %v1596_v37 = vld [vmem:[%s11048_s7 + $0x28] sm:$0xff] }
 0x2a4   :  { %v889_v39 = vpop.f32.mrb[52].mxu1  ;;  %v1115_v40 = vpop.f32.mrb[108].mxu0 }
 0x2a5   :  { %v1150_v41 = vmax.f32 %v889_v39, %v1115_v40  ;;  %v891_v42 = vpop.f32.mrb[53].mxu1  ;;  %v1117_v43 = vpop.f32.mrb[109].mxu0  ;;  %7178 = vmatpush1.bf16.msra.mxu1 %v8971_v38  ;;  %v1598_v39 = vld [vmem:[%s11048_s7 + $0x38] sm:$0xff] }
 0x2a6   :  { %7179 = vmatprep.subr.bf16.mxu1 %v8284_v20  ;;  %v7228_v40 = vpack.c.bf16 %v1598_v39, %v1596_v37  ;;  %v1595_v42 = vld [vmem:[%s11048_s7 + $0x20] sm:$0xff]  ;;  %v1597_v43 = vld [vmem:[%s11048_s7 + $0x30] sm:$0xff]  ;;  %v5611_v37 = vld [vmem:[%s11046_s5 + $0xe8] sm:$0xff] }
 0x2a7   :  { %v1608_v39 = vld [vmem:[%s11048_s7 + $0x88] sm:$0xff] }
 0x2a8   :  { %v894_v44 = vpop.f32.mrb[54].mxu1  ;;  %v1120_v47 = vpop.f32.mrb[110].mxu0  ;;  %7229 = vmatprep.subr.bf16.mxu0 %v7228_v40  ;;  %v1610_v40 = vld [vmem:[%s11048_s7 + $0x98] sm:$0xff] }
 0x2a9   :  { %v1151_v48 = vmax.f32 %v894_v44, %v1120_v47  ;;  %v896_v49 = vpop.f32.mrb[55].mxu1  ;;  %v1122_v50 = vpop.f32.mrb[111].mxu0  ;;  %v1375_v44 = vld [vmem:[%s11047_s6 + $0x18] sm:$0xff]  ;;  %v7230_v47 = vpack.c.bf16 %v1597_v43, %v1595_v42  ;;  %v5610_v42 = vld [vmem:[%s11046_s5 + $0xe0] sm:$0xff]  ;;  %v7240_v43 = vpack.c.bf16 %v1610_v40, %v1608_v39  ;;  %v5742_v40 = vld [vmem:[%s11046_s5 + $0x210] sm:$0xff] }
 0x2aa   :  { %v1377_v49 = vld [vmem:[%s11047_s6 + $0x28] sm:$0xff]  ;;  %v1376_v50 = vld [vmem:[%s11047_s6 + $0x20] sm:$0xff]  ;;  %v5743_v39 = vld [vmem:[%s11046_s5 + $0x218] sm:$0xff] }
 0x2ab   :  { %v8975_v51 = vpack.c.bf16 %v1151_v48, %v1150_v41  ;;  %v1372_v41 = vld [vmem:[%s11047_s6] sm:$0xff]  ;;  %7231 = vmatpush1.bf16.msra.mxu0 %v7230_v47  ;;  %v1374_v48 = vld [vmem:[%s11047_s6 + $0x10] sm:$0xff]  ;;  %v5613_v47 = vld [vmem:[%s11046_s5 + $0xf8] sm:$0xff] }
 0x2ad   :  { %7181 = vmatpush1.bf16.msra.mxu1 %v8975_v51 }
 0x2ae   :  { %7182 = vmatprep.subr.bf16.mxu1 %v8284_v20 }
 0x2b0   :  { %1302 = vmatmul.mubr.f32.vlgmr.msra.gmra.mrb[56].mxu1 %v1166_v52  ;;  %v1379_v52 = vld [vmem:[%s11047_s6 + $0x38] sm:$0xff] }
 0x2b1   :  { %7184 = vmatpush1.bf16.msra.mxu1 %v8923_v12  ;;  %5567 = vmatprep.mubr.msk.f32.mxu1 %vm1194_vm3, %v1169_v53  ;;  %v1378_v53 = vld [vmem:[%s11047_s6 + $0x30] sm:$0xff] }
 0x2b2   :  { %7185 = vmatprep.subr.bf16.mxu1 %v8284_v20 }
 0x2b4   :  { %1307 = vmatmul.mubr.f32.gmra.mrb[58].mxu1 %v1168_v54  ;;  %v1381_v54 = vld [vmem:[%s11047_s6 + $0x48] sm:$0xff] }
 0x2b5   :  { %7187 = vmatpush1.bf16.msra.mxu1 %v8927_v24  ;;  %5568 = vmatprep.mubr.msk.f32.mxu1 %vm1194_vm3, %v1171_v55  ;;  %v1380_v55 = vld [vmem:[%s11047_s6 + $0x40] sm:$0xff] }
 0x2b6   :  { %7188 = vmatprep.subr.bf16.mxu1 %v8284_v20 }
 0x2b8   :  { %1312 = vmatmul.mubr.f32.gmra.mrb[60].mxu1 %v1170_v56  ;;  %v1600_v56 = vld [vmem:[%s11048_s7 + $0x48] sm:$0xff] }
 0x2b9   :  { %7190 = vmatpush1.bf16.msra.mxu1 %v8931_v35  ;;  %5569 = vmatprep.mubr.msk.f32.mxu1 %vm1194_vm3, %v1173_v59  ;;  %v1602_v59 = vld [vmem:[%s11048_s7 + $0x58] sm:$0xff] }
 0x2ba   :  { %7191 = vmatprep.subr.bf16.mxu1 %v8284_v20 }
 0x2bc   :  { %1317 = vmatmul.mubr.f32.gmra.mrb[62].mxu1 %v1172_v60  ;;  %v1383_v60 = vld [vmem:[%s11047_s6 + $0x58] sm:$0xff] }
 0x2bd   :  { %7193 = vmatpush1.bf16.msra.mxu1 %v8935_v46  ;;  %5570 = vmatprep.mubr.msk.f32.mxu1 %vm1194_vm3, %v1175_v4  ;;  %v7232_v4 = vpack.c.bf16 %v1602_v59, %v1600_v56  ;;  %v5618_v56 = vld [vmem:[%s11046_s5 + $0x120] sm:$0xff]  ;;  %v5621_v59 = vld [vmem:[%s11046_s5 + $0x138] sm:$0xff] }
 0x2be   :  { %7194 = vmatprep.subr.bf16.mxu1 %v8284_v20 }
 0x2bf   :  { %7233 = vmatprep.subr.bf16.mxu0 %v7232_v4  ;;  %v1611_v4 = vld [vmem:[%s11048_s7 + $0xa0] sm:$0xf] }
 0x2c0   :  { %1322 = vmatmul.mubr.f32.gmra.mrb[64].mxu1 %v1174_v5  ;;  %v1599_v5 = vld [vmem:[%s11048_s7 + $0x40] sm:$0xff] }
 0x2c1   :  { %7196 = vmatpush1.bf16.msra.mxu1 %v8939_v57  ;;  %5571 = vmatprep.mubr.msk.f32.mxu1 %vm1194_vm3, %v1177_v61  ;;  %v1601_v61 = vld [vmem:[%s11048_s7 + $0x50] sm:$0xff] }
 0x2c2   :  { %7197 = vmatprep.subr.bf16.mxu1 %v8284_v20 }
 0x2c4   :  { %1327 = vmatmul.mubr.f32.gmra.mrb[66].mxu1 %v1176_v62  ;;  %v7234_v62 = vpack.c.bf16 %v1601_v61, %v1599_v5  ;;  %v5620_v5 = vld [vmem:[%s11046_s5 + $0x130] sm:$0xff]  ;;  %v5623_v61 = vld [vmem:[%s11046_s5 + $0x148] sm:$0xff] }
 0x2c5   :  { %7199 = vmatpush1.bf16.msra.mxu1 %v8943_v8  ;;  %5572 = vmatprep.mubr.msk.f32.mxu1 %vm1194_vm3, %v1179_v2  ;;  %v1382_v2 = vld [vmem:[%s11047_s6 + $0x50] sm:$0xff] }
 0x2c6   :  { %7200 = vmatprep.subr.bf16.mxu1 %v8284_v20  ;;  %7235 = vmatpush1.bf16.msra.mxu0 %v7234_v62  ;;  %v5622_v62 = vld [vmem:[%s11046_s5 + $0x140] sm:$0xff] }
 0x2c7   :  { %7237 = vmatprep.subr.bf16.mxu0 %v7236_v22  ;;  %v5637_v22 = vld [vmem:[%s11046_s5 + $0x1b8] sm:$0xff] }
 0x2c8   :  { %1332 = vmatmul.mubr.f32.gmra.mrb[68].mxu1 %v1178_v6  ;;  %v1385_v6 = vld [vmem:[%s11047_s6 + $0x68] sm:$0xff] }
 0x2c9   :  { %7202 = vmatpush1.bf16.msra.mxu1 %v8947_v21  ;;  %5573 = vmatprep.mubr.msk.f32.mxu1 %vm1194_vm3, %v1181_v7  ;;  %v1384_v7 = vld [vmem:[%s11047_s6 + $0x60] sm:$0xff] }
 0x2ca   :  { %7203 = vmatprep.subr.bf16.mxu1 %v8284_v20 }
 0x2cc   :  { %1337 = vmatmul.mubr.f32.gmra.mrb[70].mxu1 %v1180_v9  ;;  %v1387_v9 = vld [vmem:[%s11047_s6 + $0x78] sm:$0xff] }
 0x2cd   :  { %7205 = vmatpush1.bf16.msra.mxu1 %v8951_v33  ;;  %5574 = vmatprep.mubr.msk.f32.mxu1 %vm1194_vm3, %v1183_v11  ;;  %v1386_v11 = vld [vmem:[%s11047_s6 + $0x70] sm:$0xff] }
 0x2ce   :  { %7206 = vmatprep.subr.bf16.mxu1 %v8284_v20 }
 0x2d0   :  { %1342 = vmatmul.mubr.f32.gmra.mrb[72].mxu1 %v1182_v13  ;;  %v1389_v13 = vld [vmem:[%s11047_s6 + $0x88] sm:$0xff] }
 0x2d1   :  { %7208 = vmatpush1.bf16.msra.mxu1 %v8955_v45  ;;  %5575 = vmatprep.mubr.msk.f32.mxu1 %vm1194_vm3, %v1185_v14  ;;  %v1388_v14 = vld [vmem:[%s11047_s6 + $0x80] sm:$0xff] }
 0x2d2   :  { %7209 = vmatprep.subr.bf16.mxu1 %v8284_v20 }
 0x2d4   :  { %1347 = vmatmul.mubr.f32.gmra.mrb[74].mxu1 %v1184_v15  ;;  %v1391_v15 = vld [vmem:[%s11047_s6 + $0x98] sm:$0xff] }
 0x2d5   :  { %7211 = vmatpush1.bf16.msra.mxu1 %v8959_v58  ;;  %5576 = vmatprep.mubr.msk.f32.mxu1 %vm1194_vm3, %v1187_v19  ;;  %v1393_v19 = vld [vmem:[%s11047_s6 + $0xa8] sm:$0xff] }
 0x2d6   :  { %7212 = vmatprep.subr.bf16.mxu1 %v8284_v20 }
 0x2d8   :  { %1352 = vmatmul.mubr.f32.gmra.mrb[76].mxu1 %v1186_v27  ;;  %v7238_v27 = vpack.c.bf16 %v1605_v26, %v1603_v23  ;;  %v5636_v23 = vld [vmem:[%s11046_s5 + $0x1b0] sm:$0xff]  ;;  %v5733_v26 = vld [vmem:[%s11046_s5 + $0x1c8] sm:$0xff] }
 0x2d9   :  { %7214 = vmatpush1.bf16.msra.mxu1 %v8963_v10  ;;  %5577 = vmatprep.mubr.msk.f32.mxu1 %vm1194_vm3, %v1189_v28  ;;  %v1392_v28 = vld [vmem:[%s11047_s6 + $0xa0] sm:$0xff] }
 0x2da   :  { %7215 = vmatprep.subr.bf16.mxu1 %v8284_v20  ;;  %7239 = vmatpush1.bf16.msra.mxu0 %v7238_v27  ;;  %v5732_v27 = vld [vmem:[%s11046_s5 + $0x1c0] sm:$0xff] }
 0x2db   :  { %7241 = vmatprep.subr.bf16.mxu0 %v7240_v43  ;;  %v5747_v43 = vld [vmem:[%s11046_s5 + $0x238] sm:$0xff] }
 0x2dc   :  { %1357 = vmatmul.mubr.f32.gmra.mrb[78].mxu1 %v1188_v29  ;;  %v1395_v29 = vld [vmem:[%s11047_s6 + $0xb8] sm:$0xff] }
 0x2dd   :  { %7217 = vmatpush1.bf16.msra.mxu1 %v8967_v25  ;;  %5578 = vmatprep.mubr.msk.f32.mxu1 %vm1194_vm3, %v1191_v30  ;;  %v1394_v30 = vld [vmem:[%s11047_s6 + $0xb0] sm:$0xff] }
 0x2de   :  { %7218 = vmatprep.subr.bf16.mxu1 %v8284_v20 }
 0x2e0   :  { %1362 = vmatmul.mubr.f32.gmra.mrb[80].mxu1 %v1190_v31  ;;  %v1397_v31 = vld [vmem:[%s11047_s6 + $0xc8] sm:$0xff] }
 0x2e1   :  { %7220 = vmatpush1.bf16.msra.mxu1 %v8971_v38  ;;  %5579 = vmatprep.mubr.msk.f32.mxu1 %vm1194_vm3, %v1193_v32  ;;  %v1396_v32 = vld [vmem:[%s11047_s6 + $0xc0] sm:$0xff] }
 0x2e2   :  { %7221 = vmatprep.subr.bf16.mxu1 %v8284_v20 }
 0x2e4   :  { %1367 = vmatmul.mubr.f32.gmra.mrb[82].mxu1 %v1192_v34  ;;  %v1399_v34 = vld [vmem:[%s11047_s6 + $0xd8] sm:$0xff] }
 0x2e5   :  { %7223 = vmatpush1.bf16.msra.mxu1 %v8975_v51  ;;  %5580 = vmatprep.mubr.msk.f32.mxu1 %vm1194_vm3, %v1373_v36  ;;  %v1398_v36 = vld [vmem:[%s11047_s6 + $0xd0] sm:$0xff] }
 0x2e6   :  { %7244 = vmatprep.subr.bf16.mxu1 %v8284_v20 }
 0x2e8   :  { %1507 = vmatmul.mubr.f32.vlgmr.msra.gmra.mrb[84].mxu1 %v1372_v41  ;;  %v1607_v41 = vld [vmem:[%s11048_s7 + $0x80] sm:$0xff] }
 0x2e9   :  { %7246 = vmatpush1.bf16.msra.mxu1 %v8923_v12  ;;  %5581 = vmatprep.mubr.msk.f32.mxu1 %vm1194_vm3, %v1375_v44  ;;  %v1609_v44 = vld [vmem:[%s11048_s7 + $0x90] sm:$0xff] }
 0x2ea   :  { %7247 = vmatprep.subr.bf16.mxu1 %v8284_v20 }
 0x2ec   :  { %1512 = vmatmul.mubr.f32.gmra.mrb[86].mxu1 %v1374_v48  ;;  %v7242_v48 = vpack.c.bf16 %v1609_v44, %v1607_v41  ;;  %v5745_v41 = vld [vmem:[%s11046_s5 + $0x228] sm:$0xff]  ;;  %v5746_v44 = vld [vmem:[%s11046_s5 + $0x230] sm:$0xff] }
 0x2ed   :  { %7249 = vmatpush1.bf16.msra.mxu1 %v8927_v24  ;;  %5582 = vmatprep.mubr.msk.f32.mxu1 %vm1194_vm3, %v1377_v49  ;;  %v5612_v49 = vld [vmem:[%s11046_s5 + $0xf0] sm:$0xff] }
 0x2ee   :  { %7250 = vmatprep.subr.bf16.mxu1 %v8284_v20  ;;  %7243 = vmatpush1.bf16.msra.mxu0 %v7242_v48  ;;  %v5748_v48 = vld [vmem:[%s11046_s5 + $0x240] sm:$0xff] }
 0x2f0   :  { %1517 = vmatmul.mubr.f32.gmra.mrb[88].mxu1 %v1376_v50  ;;  %v5615_v50 = vld [vmem:[%s11046_s5 + $0x108] sm:$0xff] }
 0x2f1   :  { %7252 = vmatpush1.bf16.msra.mxu1 %v8931_v35  ;;  %5583 = vmatprep.mubr.msk.f32.mxu1 %vm1194_vm3, %v1379_v52  ;;  %v5614_v52 = vld [vmem:[%s11046_s5 + $0x100] sm:$0xff] }
 0x2f2   :  { %7253 = vmatprep.subr.bf16.mxu1 %v8284_v20 }
 0x2f4   :  { %1522 = vmatmul.mubr.f32.gmra.mrb[90].mxu1 %v1378_v53  ;;  %v5617_v53 = vld [vmem:[%s11046_s5 + $0x118] sm:$0xff] }
 0x2f5   :  { %7255 = vmatpush1.bf16.msra.mxu1 %v8935_v46  ;;  %5584 = vmatprep.mubr.msk.f32.mxu1 %vm1194_vm3, %v1381_v54  ;;  %v5616_v54 = vld [vmem:[%s11046_s5 + $0x110] sm:$0xff] }
 0x2f6   :  { %7256 = vmatprep.subr.bf16.mxu1 %v8284_v20 }
 0x2f8   :  { %1527 = vmatmul.mubr.f32.gmra.mrb[92].mxu1 %v1380_v55  ;;  %v5619_v55 = vld [vmem:[%s11046_s5 + $0x128] sm:$0xff] }
 0x2f9   :  { %7258 = vmatpush1.bf16.msra.mxu1 %v8939_v57  ;;  %5585 = vmatprep.mubr.msk.f32.mxu1 %vm1194_vm3, %v1383_v60  ;;  %v1612_v60 = vld [vmem:[%s11048_s7 + $0xa8] sm:$0xf] }
 0x2fa   :  { %7259 = vmatprep.subr.bf16.mxu1 %v8284_v20  ;;  %5594 = vmatprep.subr.msk.mxu0 %vm291_vm0, %v1612_v60 }
 0x2fb   :  { %5595 = vmatpush1.msk.msra.mxu0 %vm291_vm0, %v1611_v4  ;;  %v5756_v4 = vld [vmem:[%s11046_s5 + $0x280] sm:$0xff] }
 0x2fc   :  { %1532 = vmatmul.mubr.f32.gmra.mrb[94].mxu1 %v1382_v2  ;;  %7286 = vmatprep.subr.bf16.mxu0 %v8284_v20  ;;  %v5625_v2 = vld [vmem:[%s11046_s5 + $0x158] sm:$0xff] }
 0x2fd   :  { %7261 = vmatpush1.bf16.msra.mxu1 %v8943_v8  ;;  %5586 = vmatprep.mubr.msk.f32.mxu1 %vm1194_vm3, %v1385_v6  ;;  %v5624_v6 = vld [vmem:[%s11046_s5 + $0x150] sm:$0xff] }
 0x2fe   :  { %7262 = vmatprep.subr.bf16.mxu1 %v8284_v20 }
 0x300   :  { %1537 = vmatmul.mubr.f32.gmra.mrb[96].mxu1 %v1384_v7  ;;  %v5627_v7 = vld [vmem:[%s11046_s5 + $0x168] sm:$0xff] }
 0x301   :  { %7264 = vmatpush1.bf16.msra.mxu1 %v8947_v21  ;;  %5587 = vmatprep.mubr.msk.f32.mxu1 %vm1194_vm3, %v1387_v9  ;;  %v5626_v9 = vld [vmem:[%s11046_s5 + $0x160] sm:$0xff] }
 0x302   :  { %7265 = vmatprep.subr.bf16.mxu1 %v8284_v20 }
 0x304   :  { %1542 = vmatmul.mubr.f32.gmra.mrb[98].mxu1 %v1386_v11  ;;  %v5629_v11 = vld [vmem:[%s11046_s5 + $0x178] sm:$0xff] }
 0x305   :  { %7267 = vmatpush1.bf16.msra.mxu1 %v8951_v33  ;;  %5588 = vmatprep.mubr.msk.f32.mxu1 %vm1194_vm3, %v1389_v13  ;;  %v5628_v13 = vld [vmem:[%s11046_s5 + $0x170] sm:$0xff] }
 0x306   :  { %7268 = vmatprep.subr.bf16.mxu1 %v8284_v20 }
 0x308   :  { %1547 = vmatmul.mubr.f32.gmra.mrb[100].mxu1 %v1388_v14  ;;  %v5631_v14 = vld [vmem:[%s11046_s5 + $0x188] sm:$0xff] }
 0x309   :  { %7270 = vmatpush1.bf16.msra.mxu1 %v8955_v45  ;;  %5589 = vmatprep.mubr.msk.f32.mxu1 %vm1194_vm3, %v1391_v15  ;;  %v5630_v15 = vld [vmem:[%s11046_s5 + $0x180] sm:$0xff] }
 0x30a   :  { %7271 = vmatprep.subr.bf16.mxu1 %v8284_v20 }
 0x30c   :  { %1552 = vmatmul.mubr.f32.gmra.mrb[102].mxu1 %v1390_v16  ;;  %v5633_v16 = vld [vmem:[%s11046_s5 + $0x198] sm:$0xff] }
 0x30d   :  { %7273 = vmatpush1.bf16.msra.mxu1 %v8959_v58  ;;  %5590 = vmatprep.mubr.msk.f32.mxu1 %vm1194_vm3, %v1393_v19  ;;  %v5634_v19 = vld [vmem:[%s11046_s5 + $0x1a0] sm:$0xff] }
 0x30e   :  { %7274 = vmatprep.subr.bf16.mxu1 %v8284_v20 }
 0x310   :  { %1557 = vmatmul.mubr.f32.gmra.mrb[104].mxu1 %v1392_v28  ;;  %v5735_v28 = vld [vmem:[%s11046_s5 + $0x1d8] sm:$0xff] }
 0x311   :  { %7276 = vmatpush1.bf16.msra.mxu1 %v8963_v10  ;;  %5591 = vmatprep.mubr.msk.f32.mxu1 %vm1194_vm3, %v1395_v29  ;;  %v5734_v29 = vld [vmem:[%s11046_s5 + $0x1d0] sm:$0xff] }
 0x312   :  { %7277 = vmatprep.subr.bf16.mxu1 %v8284_v20 }
 0x314   :  { %1562 = vmatmul.mubr.f32.gmra.mrb[106].mxu1 %v1394_v30  ;;  %v5737_v30 = vld [vmem:[%s11046_s5 + $0x1e8] sm:$0xff] }
 0x315   :  { %7279 = vmatpush1.bf16.msra.mxu1 %v8967_v25  ;;  %5592 = vmatprep.mubr.msk.f32.mxu1 %vm1194_vm3, %v1397_v31  ;;  %v5736_v31 = vld [vmem:[%s11046_s5 + $0x1e0] sm:$0xff] }
 0x316   :  { %7280 = vmatprep.subr.bf16.mxu1 %v8284_v20 }
 0x318   :  { %1567 = vmatmul.mubr.f32.gmra.mrb[108].mxu1 %v1396_v32  ;;  %v5739_v32 = vld [vmem:[%s11046_s5 + $0x1f8] sm:$0xff] }
 0x319   :  { %7282 = vmatpush1.bf16.msra.mxu1 %v8971_v38  ;;  %5593 = vmatprep.mubr.msk.f32.mxu1 %vm1194_vm3, %v1399_v34  ;;  %v5738_v34 = vld [vmem:[%s11046_s5 + $0x1f0] sm:$0xff] }
 0x31a   :  { %7283 = vmatprep.subr.bf16.mxu1 %v8284_v20 }
 0x31c   :  { %1572 = vmatmul.mubr.f32.gmra.mrb[110].mxu1 %v1398_v36  ;;  %v5741_v36 = vld [vmem:[%s11046_s5 + $0x208] sm:$0xff] }
 0x31d   :  { %7285 = vmatpush1.bf16.msra.mxu1 %v8975_v51  ;;  %5638 = vmatprep.mubr.msk.f32.mxu1 %vm1194_vm3, %v5611_v37  ;;  %v5740_v37 = vld [vmem:[%s11046_s5 + $0x200] sm:$0xff] }
 0x31e   :  { %7348 = vmatprep.subr.bf16.mxu1 %v8284_v20 }
 0x320   :  { %1974 = vmatmul.mubr.f32.vlgmr.msra.gmra.mrb[112].mxu1 %v5610_v42  ;;  %v5744_v42 = vld [vmem:[%s11046_s5 + $0x220] sm:$0xff] }
 0x321   :  { %7350 = vmatpush1.bf16.msra.mxu1 %v8923_v12  ;;  %5639 = vmatprep.mubr.msk.f32.mxu1 %vm1194_vm3, %v5613_v47  ;;  %v5749_v47 = vld [vmem:[%s11046_s5 + $0x248] sm:$0xff] }
 0x322   :  { %7351 = vmatprep.subr.bf16.mxu1 %v8284_v20 }
 0x324   :  { %1979 = vmatmul.mubr.f32.gmra.mrb[114].mxu1 %v5612_v49  ;;  %v5751_v49 = vld [vmem:[%s11046_s5 + $0x258] sm:$0xff] }
 0x325   :  { %7353 = vmatpush1.bf16.msra.mxu1 %v8927_v24  ;;  %5640 = vmatprep.mubr.msk.f32.mxu1 %vm1194_vm3, %v5615_v50  ;;  %v5750_v50 = vld [vmem:[%s11046_s5 + $0x250] sm:$0xff] }
 0x326   :  { %7354 = vmatprep.subr.bf16.mxu1 %v8284_v20 }
 0x328   :  { %1984 = vmatmul.mubr.f32.gmra.mrb[116].mxu1 %v5614_v52  ;;  %v5753_v52 = vld [vmem:[%s11046_s5 + $0x268] sm:$0xff] }
 0x329   :  { %7356 = vmatpush1.bf16.msra.mxu1 %v8931_v35  ;;  %5641 = vmatprep.mubr.msk.f32.mxu1 %vm1194_vm3, %v5617_v53  ;;  %v5752_v53 = vld [vmem:[%s11046_s5 + $0x260] sm:$0xff] }
 0x32a   :  { %7357 = vmatprep.subr.bf16.mxu1 %v8284_v20 }
 0x32c   :  { %1989 = vmatmul.mubr.f32.gmra.mrb[118].mxu1 %v5616_v54  ;;  %v5755_v54 = vld [vmem:[%s11046_s5 + $0x278] sm:$0xff] }
 0x32d   :  { %7359 = vmatpush1.bf16.msra.mxu1 %v8935_v46  ;;  %5642 = vmatprep.mubr.msk.f32.mxu1 %vm1194_vm3, %v5619_v55  ;;  %v5754_v55 = vld [vmem:[%s11046_s5 + $0x270] sm:$0xff] }
 0x32e   :  { %7360 = vmatprep.subr.bf16.mxu1 %v8284_v20 }
 0x330   :  { %1994 = vmatmul.mubr.f32.gmra.mrb[120].mxu1 %v5618_v56  ;;  %v5757_v56 = vld [vmem:[%s11046_s5 + $0x288] sm:$0xff] }
 0x331   :  { %7362 = vmatpush1.bf16.msra.mxu1 %v8939_v57  ;;  %5643 = vmatprep.mubr.msk.f32.mxu1 %vm1194_vm3, %v5621_v59 }
 0x332   :  { %7363 = vmatprep.subr.bf16.mxu1 %v8284_v20 }
 0x334   :  { %1999 = vmatmul.mubr.f32.gmra.mrb[122].mxu1 %v5620_v5  ;;  %v5759_v5 = vld [vmem:[%s11046_s5 + $0x298] sm:$0xff] }
 0x335   :  { %7365 = vmatpush1.bf16.msra.mxu1 %v8943_v8  ;;  %5644 = vmatprep.mubr.msk.f32.mxu1 %vm1194_vm3, %v5623_v61 }
 0x336   :  { %7366 = vmatprep.subr.bf16.mxu1 %v8284_v20 }
 0x338   :  { %2004 = vmatmul.mubr.f32.gmra.mrb[124].mxu1 %v5622_v62 }
 0x339   :  { %7368 = vmatpush1.bf16.msra.mxu1 %v8947_v21  ;;  %5645 = vmatprep.mubr.msk.f32.mxu1 %vm1194_vm3, %v5625_v2  ;;  %v5758_v2 = vld [vmem:[%s11046_s5 + $0x290] sm:$0xff] }
 0x33a   :  { %7369 = vmatprep.subr.bf16.mxu1 %v8284_v20 }
 0x33c   :  { %2009 = vmatmul.mubr.f32.gmra.mrb[126].mxu1 %v5624_v6  ;;  %v5775_v6 = vld [vmem:[%s11047_s6 + $0x1c8] sm:$0xff] }
 0x33d   :  { %7371 = vmatpush1.bf16.msra.mxu1 %v8951_v33  ;;  %5646 = vmatprep.mubr.msk.f32.mxu1 %vm1194_vm3, %v5627_v7 }
 0x33e   :  { %7372 = vmatprep.subr.bf16.mxu1 %v8284_v20 }
 0x340   :  { %2014 = vmatmul.mubr.f32.gmra.mrb[128].mxu1 %v5626_v9 }
 0x341   :  { %7374 = vmatpush1.bf16.msra.mxu1 %v8955_v45  ;;  %5647 = vmatprep.mubr.msk.f32.mxu1 %vm1194_vm3, %v5629_v11  ;;  %v5774_v11 = vld [vmem:[%s11047_s6 + $0x1c0] sm:$0xff] }
 0x342   :  { %7375 = vmatprep.subr.bf16.mxu1 %v8284_v20 }
 0x344   :  { %2019 = vmatmul.mubr.f32.gmra.mrb[130].mxu1 %v5628_v13  ;;  %v5777_v13 = vld [vmem:[%s11047_s6 + $0x1d8] sm:$0xff] }
 0x345   :  { %7377 = vmatpush1.bf16.msra.mxu1 %v8959_v58  ;;  %5648 = vmatprep.mubr.msk.f32.mxu1 %vm1194_vm3, %v5631_v14 }
 0x346   :  { %7378 = vmatprep.subr.bf16.mxu1 %v8284_v20 }
 0x348   :  { %2024 = vmatmul.mubr.f32.gmra.mrb[132].mxu1 %v5630_v15 }
 0x349   :  { %7380 = vmatpush1.bf16.msra.mxu1 %v8963_v10  ;;  %5649 = vmatprep.mubr.msk.f32.mxu1 %vm1194_vm3, %v5633_v16  ;;  %v5776_v16 = vld [vmem:[%s11047_s6 + $0x1d0] sm:$0xff] }
 0x34a   :  { %7381 = vmatprep.subr.bf16.mxu1 %v8284_v20 }
 0x34c   :  { %2029 = vmatmul.mubr.f32.gmra.mrb[134].mxu1 %v5632_v17  ;;  %v5779_v17 = vld [vmem:[%s11047_s6 + $0x1e8] sm:$0xff] }
 0x34d   :  { %7383 = vmatpush1.bf16.msra.mxu1 %v8967_v25  ;;  %5650 = vmatprep.mubr.msk.f32.mxu1 %vm1194_vm3, %v5635_v18 }
 0x34e   :  { %7384 = vmatprep.subr.bf16.mxu1 %v8284_v20 }
 0x350   :  { %2034 = vmatmul.mubr.f32.gmra.mrb[136].mxu1 %v5634_v19 }
 0x351   :  { %7386 = vmatpush1.bf16.msra.mxu1 %v8971_v38  ;;  %5651 = vmatprep.mubr.msk.f32.mxu1 %vm1194_vm3, %v5637_v22  ;;  %v5778_v22 = vld [vmem:[%s11047_s6 + $0x1e0] sm:$0xff] }
 0x352   :  { %7387 = vmatprep.subr.bf16.mxu1 %v8284_v20 }
 0x354   :  { %2039 = vmatmul.mubr.f32.gmra.mrb[138].mxu1 %v5636_v23  ;;  %v5781_v23 = vld [vmem:[%s11047_s6 + $0x1f8] sm:$0xff] }
 0x355   :  { %7389 = vmatpush1.bf16.msra.mxu1 %v8975_v51  ;;  %5760 = vmatprep.mubr.msk.f32.mxu1 %vm1194_vm3, %v5733_v26 }
 0x356   :  { %7390 = vmatprep.subr.bf16.mxu1 %v8284_v20 }
 0x358   :  { %2648 = vmatmul.mubr.f32.vlgmr.msra.gmra.mrb[140].mxu1 %v5732_v27 }
 0x359   :  { %7392 = vmatpush1.bf16.msra.mxu1 %v8923_v12  ;;  %5761 = vmatprep.mubr.msk.f32.mxu1 %vm1194_vm3, %v5735_v28  ;;  %v5780_v28 = vld [vmem:[%s11047_s6 + $0x1f0] sm:$0xff] }
 0x35a   :  { %7393 = vmatprep.subr.bf16.mxu1 %v8284_v20 }
 0x35c   :  { %2653 = vmatmul.mubr.f32.gmra.mrb[142].mxu1 %v5734_v29  ;;  %v5783_v29 = vld [vmem:[%s11047_s6 + $0x208] sm:$0xff] }
 0x35d   :  { %7395 = vmatpush1.bf16.msra.mxu1 %v8927_v24  ;;  %5762 = vmatprep.mubr.msk.f32.mxu1 %vm1194_vm3, %v5737_v30 }
 0x35e   :  { %7396 = vmatprep.subr.bf16.mxu1 %v8284_v20 }
 0x360   :  { %2658 = vmatmul.mubr.f32.gmra.mrb[144].mxu1 %v5736_v31 }
 0x361   :  { %7398 = vmatpush1.bf16.msra.mxu1 %v8931_v35  ;;  %5763 = vmatprep.mubr.msk.f32.mxu1 %vm1194_vm3, %v5739_v32  ;;  %v5782_v32 = vld [vmem:[%s11047_s6 + $0x200] sm:$0xff] }
 0x362   :  { %7399 = vmatprep.subr.bf16.mxu1 %v8284_v20 }
 0x364   :  { %2663 = vmatmul.mubr.f32.gmra.mrb[146].mxu1 %v5738_v34  ;;  %v5785_v34 = vld [vmem:[%s11047_s6 + $0x218] sm:$0xff] }
 0x365   :  { %7401 = vmatpush1.bf16.msra.mxu1 %v8935_v46  ;;  %5764 = vmatprep.mubr.msk.f32.mxu1 %vm1194_vm3, %v5741_v36 }
 0x366   :  { %7402 = vmatprep.subr.bf16.mxu1 %v8284_v20 }
 0x368   :  { %2668 = vmatmul.mubr.f32.gmra.mrb[148].mxu1 %v5740_v37 }
 0x369   :  { %7404 = vmatpush1.bf16.msra.mxu1 %v8939_v57  ;;  %5765 = vmatprep.mubr.msk.f32.mxu1 %vm1194_vm3, %v5743_v39  ;;  %v5784_v39 = vld [vmem:[%s11047_s6 + $0x210] sm:$0xff] }
 0x36a   :  { %7405 = vmatprep.subr.bf16.mxu1 %v8284_v20 }
 0x36c   :  { %2673 = vmatmul.mubr.f32.gmra.mrb[150].mxu1 %v5742_v40  ;;  %v5787_v40 = vld [vmem:[%s11047_s6 + $0x228] sm:$0xff] }
 0x36d   :  { %7407 = vmatpush1.bf16.msra.mxu1 %v8943_v8  ;;  %5766 = vmatprep.mubr.msk.f32.mxu1 %vm1194_vm3, %v5745_v41 }
 0x36e   :  { %7408 = vmatprep.subr.bf16.mxu1 %v8284_v20 }
 0x370   :  { %2678 = vmatmul.mubr.f32.gmra.mrb[152].mxu1 %v5744_v42 }
 0x371   :  { %7410 = vmatpush1.bf16.msra.mxu1 %v8947_v21  ;;  %5767 = vmatprep.mubr.msk.f32.mxu1 %vm1194_vm3, %v5747_v43  ;;  %v5786_v43 = vld [vmem:[%s11047_s6 + $0x220] sm:$0xff] }
 0x372   :  { %7411 = vmatprep.subr.bf16.mxu1 %v8284_v20 }
 0x374   :  { %2683 = vmatmul.mubr.f32.gmra.mrb[154].mxu1 %v5746_v44  ;;  %v5789_v44 = vld [vmem:[%s11047_s6 + $0x238] sm:$0xff] }
 0x375   :  { %7413 = vmatpush1.bf16.msra.mxu1 %v8951_v33  ;;  %5768 = vmatprep.mubr.msk.f32.mxu1 %vm1194_vm3, %v5749_v47 }
 0x376   :  { %7414 = vmatprep.subr.bf16.mxu1 %v8284_v20 }
 0x378   :  { %2688 = vmatmul.mubr.f32.gmra.mrb[156].mxu1 %v5748_v48 }
 0x379   :  { %7416 = vmatpush1.bf16.msra.mxu1 %v8955_v45  ;;  %5769 = vmatprep.mubr.msk.f32.mxu1 %vm1194_vm3, %v5751_v49  ;;  %v5788_v49 = vld [vmem:[%s11047_s6 + $0x230] sm:$0xff] }
 0x37a   :  { %7417 = vmatprep.subr.bf16.mxu1 %v8284_v20 }
 0x37c   :  { %2693 = vmatmul.mubr.f32.gmra.mrb[158].mxu1 %v5750_v50  ;;  %v5791_v50 = vld [vmem:[%s11047_s6 + $0x248] sm:$0xff] }
 0x37d   :  { %7419 = vmatpush1.bf16.msra.mxu1 %v8959_v58  ;;  %5770 = vmatprep.mubr.msk.f32.mxu1 %vm1194_vm3, %v5753_v52 }
 0x37e   :  { %7420 = vmatprep.subr.bf16.mxu1 %v8284_v20 }
 0x380   :  { %2698 = vmatmul.mubr.f32.gmra.mrb[160].mxu1 %v5752_v53 }
 0x381   :  { %7422 = vmatpush1.bf16.msra.mxu1 %v8963_v10  ;;  %5771 = vmatprep.mubr.msk.f32.mxu1 %vm1194_vm3, %v5755_v54  ;;  %v5790_v54 = vld [vmem:[%s11047_s6 + $0x240] sm:$0xff] }
 0x382   :  { %7423 = vmatprep.subr.bf16.mxu1 %v8284_v20 }
 0x383   :  { %v9531_v59 = vpop.f32.mrb[56].mxu1 }
 0x384   :  { %v1305_v60 = vpop.f32.mrb[57].mxu1  ;;  %2703 = vmatmul.mubr.f32.gmra.mrb[162].mxu1 %v5754_v55  ;;  %v5793_v55 = vld [vmem:[%s11047_s6 + $0x258] sm:$0xff] }
 0x385   :  { %7425 = vmatpush1.bf16.msra.mxu1 %v8967_v25  ;;  %5772 = vmatprep.mubr.msk.f32.mxu1 %vm1194_vm3, %v5757_v56 }
 0x386   :  { %7426 = vmatprep.subr.bf16.mxu1 %v8284_v20 }
 0x387   :  { %v9542_v61 = vpop.f32.mrb[58].mxu1 }
 0x388   :  { %v1310_v62 = vpop.f32.mrb[59].mxu1  ;;  %2708 = vmatmul.mubr.f32.gmra.mrb[164].mxu1 %v5756_v4  ;;  %v5792_v4 = vld [vmem:[%s11047_s6 + $0x250] sm:$0xff] }
 0x389   :  { %7428 = vmatpush1.bf16.msra.mxu1 %v8971_v38  ;;  %5773 = vmatprep.mubr.msk.f32.mxu1 %vm1194_vm3, %v5759_v5  ;;  %v5795_v5 = vld [vmem:[%s11047_s6 + $0x268] sm:$0xff] }
 0x38a   :  { %7429 = vmatprep.subr.bf16.mxu1 %v8284_v20 }
 0x38b   :  { %v9553_v7 = vpop.f32.mrb[60].mxu1 }
 0x38c   :  { %v1315_v9 = vpop.f32.mrb[61].mxu1  ;;  %2713 = vmatmul.mubr.f32.gmra.mrb[166].mxu1 %v5758_v2 }
 0x38d   :  { %7431 = vmatpush1.bf16.msra.mxu1 %v8975_v51  ;;  %5802 = vmatprep.mubr.msk.f32.mxu1 %vm1194_vm3, %v5775_v6  ;;  %v5794_v6 = vld [vmem:[%s11047_s6 + $0x260] sm:$0xff]  ;;  %v5797_v9 = vld [vmem:[%s11047_s6 + $0x278] sm:$0xff] }
 0x38e   :  { %7452 = vmatprep.subr.bf16.mxu1 %v8284_v20 }
 0x38f   :  { %v9564_v14 = vpop.f32.mrb[62].mxu1 }
 0x390   :  { %v1320_v15 = vpop.f32.mrb[63].mxu1  ;;  %2854 = vmatmul.mubr.f32.vlgmr.msra.gmra.mrb[168].mxu1 %v5774_v11 }
 0x391   :  { %5803 = vmatprep.mubr.msk.f32.mxu1 %vm1194_vm3, %v5777_v13  ;;  %v5796_v15 = vld [vmem:[%s11047_s6 + $0x270] sm:$0xff] }
 0x393   :  { %v9573_v18 = vpop.f32.mrb[64].mxu1 }
 0x394   :  { %v1325_v19 = vpop.f32.mrb[65].mxu1  ;;  %2859 = vmatmul.mubr.f32.gmra.mrb[170].mxu1 %v5776_v16  ;;  %v5799_v16 = vld [vmem:[%s11047_s6 + $0x288] sm:$0xff] }
 0x395   :  { %5804 = vmatprep.mubr.msk.f32.mxu1 %vm1194_vm3, %v5779_v17 }
 0x397   :  { %v9582_v26 = vpop.f32.mrb[66].mxu1 }
 0x398   :  { %v1330_v27 = vpop.f32.mrb[67].mxu1  ;;  %2864 = vmatmul.mubr.f32.gmra.mrb[172].mxu1 %v5778_v22 }
 0x399   :  { %5805 = vmatprep.mubr.msk.f32.mxu1 %vm1194_vm3, %v5781_v23  ;;  %v5798_v23 = vld [vmem:[%s11047_s6 + $0x280] sm:$0xff]  ;;  %v5801_v27 = vld [vmem:[%s11047_s6 + $0x298] sm:$0xff] }
 0x39b   :  { %v9591_v30 = vpop.f32.mrb[68].mxu1 }
 0x39c   :  { %v1335_v31 = vpop.f32.mrb[69].mxu1  ;;  %2869 = vmatmul.mubr.f32.gmra.mrb[174].mxu1 %v5780_v28 }
 0x39d   :  { %5806 = vmatprep.mubr.msk.f32.mxu1 %vm1194_vm3, %v5783_v29  ;;  %v5800_v31 = vld [vmem:[%s11047_s6 + $0x290] sm:$0xff] }
 0x39f   :  { %v9600_v36 = vpop.f32.mrb[70].mxu1 }
 0x3a0   :  { %v1340_v37 = vpop.f32.mrb[71].mxu1  ;;  %2874 = vmatmul.mubr.f32.gmra.mrb[176].mxu1 %v5782_v32 }
 0x3a1   :  { %5807 = vmatprep.mubr.msk.f32.mxu1 %vm1194_vm3, %v5785_v34 }
 0x3a3   :  { %v9609_v41 = vpop.f32.mrb[72].mxu1 }
 0x3a4   :  { %v1345_v42 = vpop.f32.mrb[73].mxu1  ;;  %2879 = vmatmul.mubr.f32.gmra.mrb[178].mxu1 %v5784_v39 }
 0x3a5   :  { %5808 = vmatprep.mubr.msk.f32.mxu1 %vm1194_vm3, %v5787_v40 }
 0x3a7   :  { %v9618_v47 = vpop.f32.mrb[74].mxu1 }
 0x3a8   :  { %v1350_v48 = vpop.f32.mrb[75].mxu1  ;;  %2884 = vmatmul.mubr.f32.gmra.mrb[180].mxu1 %v5786_v43 }
 0x3a9   :  { %5809 = vmatprep.mubr.msk.f32.mxu1 %vm1194_vm3, %v5789_v44 }
 0x3ab   :  { %v9627_v52 = vpop.f32.mrb[76].mxu1 }
 0x3ac   :  { %v1355_v53 = vpop.f32.mrb[77].mxu1  ;;  %2889 = vmatmul.mubr.f32.gmra.mrb[182].mxu1 %v5788_v49 }
 0x3ad   :  { %5810 = vmatprep.mubr.msk.f32.mxu1 %vm1194_vm3, %v5791_v50 }
 0x3af   :  { %v9636_v56 = vpop.f32.mrb[78].mxu1 }
 0x3b0   :  { %v1360_v60 = vpop.f32.mrb[79].mxu1  ;;  %2894 = vmatmul.mubr.f32.gmra.mrb[184].mxu1 %v5790_v54 }
 0x3b1   :  { %5811 = vmatprep.mubr.msk.f32.mxu1 %vm1194_vm3, %v5793_v55  ;;  %v5697_v55 = vld [vmem:[%s11048_s7 + $0xc8] sm:$0xff] }
 0x3b3   :  { %v9645_v62 = vpop.f32.mrb[80].mxu1 }
 0x3b4   :  { %v1365_v2 = vpop.f32.mrb[81].mxu1  ;;  %2899 = vmatmul.mubr.f32.gmra.mrb[186].mxu1 %v5792_v4  ;;  %v5653_v4 = vld [vmem:[%s11047_s6 + $0xe8] sm:$0xff] }
 0x3b5   :  { %5812 = vmatprep.mubr.msk.f32.mxu1 %vm1194_vm3, %v5795_v5  ;;  %v5699_v2 = vld [vmem:[%s11048_s7 + $0xd8] sm:$0xff] }
 0x3b7   :  { %v9654_v11 = vpop.f32.mrb[82].mxu1 }
 0x3b8   :  { %v1370_v13 = vpop.f32.mrb[83].mxu1  ;;  %2904 = vmatmul.mubr.f32.gmra.mrb[188].mxu1 %v5794_v6  ;;  %v5701_v6 = vld [vmem:[%s11048_s7 + $0xe8] sm:$0xff] }
 0x3b9   :  { %5813 = vmatprep.mubr.msk.f32.mxu1 %vm1194_vm3, %v5797_v9  ;;  %v5652_v9 = vld [vmem:[%s11047_s6 + $0xe0] sm:$0xff] }
 0x3bb   :  { %v1508_v17 = vpop.f32.mrb[84].mxu1 }
 0x3bc   :  { %v1577_v19 = vmax.f32 %v9531_v59, %v1508_v17  ;;  %v1510_v22 = vpop.f32.mrb[85].mxu1  ;;  %2909 = vmatmul.mubr.f32.gmra.mrb[190].mxu1 %v5796_v15  ;;  %v5655_v15 = vld [vmem:[%s11047_s6 + $0xf8] sm:$0xff]  ;;  %v7332_v17 = vpack.c.bf16 %v5701_v6, %v5699_v2  ;;  %v5668_v2 = vld [vmem:[%s11047_s6 + $0x160] sm:$0xff] }
 0x3bd   :  { %5814 = vmatprep.mubr.msk.f32.mxu1 %vm1194_vm3, %v5799_v16  ;;  %v5703_v22 = vld [vmem:[%s11048_s7 + $0xf8] sm:$0xff] }
 0x3be   :  { %5596 = vmatmul.mubr.msk.f32.vlgmr.msra.gmra.mrb[112].mxu0 %vm206_vm1, %v1577_v19  ;;  %v5700_v19 = vld [vmem:[%s11048_s7 + $0xe0] sm:$0xff] }
 0x3bf   :  { %7288 = vmatpush1.bf16.msra.mxu0 %v8923_v12  ;;  %v1513_v28 = vpop.f32.mrb[86].mxu1  ;;  %1731 = vmatprep.mubr.f32.mxu0 %v8283_v0 }
 0x3c0   :  { %v1578_v59 = vmax.f32 %v9542_v61, %v1513_v28  ;;  %v1515_v29 = vpop.f32.mrb[87].mxu1  ;;  %7289 = vmatprep.subr.bf16.mxu0 %v8284_v20  ;;  %2914 = vmatmul.mubr.f32.gmra.mrb[192].mxu1 %v5798_v23  ;;  %v5705_v23 = vld [vmem:[%s11048_s7 + $0x108] sm:$0xff] }
 0x3c1   :  { %5815 = vmatprep.mubr.msk.f32.mxu1 %vm1194_vm3, %v5801_v27  ;;  %v5654_v27 = vld [vmem:[%s11047_s6 + $0xf0] sm:$0xff]  ;;  %v5657_v29 = vld [vmem:[%s11047_s6 + $0x108] sm:$0xff] }
 0x3c2   :  { %5597 = vmatmul.mubr.msk.f32.gmra.mrb[114].mxu0 %vm206_vm1, %v1578_v59 }
 0x3c3   :  { %7291 = vmatpush1.bf16.msra.mxu0 %v8927_v24  ;;  %v1518_v12 = vpop.f32.mrb[88].mxu1  ;;  %1737 = vmatprep.mubr.f32.mxu0 %v8283_v0 }
 0x3c4   :  { %v1579_v32 = vmax.f32 %v9553_v7, %v1518_v12  ;;  %v1520_v61 = vpop.f32.mrb[89].mxu1  ;;  %7292 = vmatprep.subr.bf16.mxu0 %v8284_v20  ;;  %2919 = vmatmul.mubr.f32.gmra.mrb[194].mxu1 %v5800_v31  ;;  %v7336_v12 = vpack.c.bf16 %v5705_v23, %v5703_v22  ;;  %v5675_v23 = vld [vmem:[%s11047_s6 + $0x198] sm:$0xff] }
 0x3c5   :  { %v5704_v61 = vld [vmem:[%s11048_s7 + $0x100] sm:$0xff] }
 0x3c6   :  { %5598 = vmatmul.mubr.msk.f32.gmra.mrb[116].mxu0 %vm206_vm1, %v1579_v32  ;;  %v5702_v32 = vld [vmem:[%s11048_s7 + $0xf0] sm:$0xff] }
 0x3c7   :  { %7294 = vmatpush1.bf16.msra.mxu0 %v8931_v35  ;;  %v1523_v34 = vpop.f32.mrb[90].mxu1  ;;  %1743 = vmatprep.mubr.f32.mxu0 %v8283_v0 }
 0x3c8   :  { %v1580_v37 = vmax.f32 %v9564_v14, %v1523_v34  ;;  %v1525_v39 = vpop.f32.mrb[91].mxu1  ;;  %7295 = vmatprep.subr.bf16.mxu0 %v8284_v20  ;;  %v5707_v34 = vld [vmem:[%s11048_s7 + $0x118] sm:$0xff] }
 0x3c9   :  { %v5656_v39 = vld [vmem:[%s11047_s6 + $0x100] sm:$0xff] }
 0x3ca   :  { %5599 = vmatmul.mubr.msk.f32.gmra.mrb[118].mxu0 %vm206_vm1, %v1580_v37  ;;  %v5709_v37 = vld [vmem:[%s11048_s7 + $0x128] sm:$0xff] }
 0x3cb   :  { %7297 = vmatpush1.bf16.msra.mxu0 %v8935_v46  ;;  %v1528_v24 = vpop.f32.mrb[92].mxu1  ;;  %1749 = vmatprep.mubr.f32.mxu0 %v8283_v0 }
 0x3cc   :  { %v1581_v7 = vmax.f32 %v9573_v18, %v1528_v24  ;;  %v1530_v40 = vpop.f32.mrb[93].mxu1  ;;  %7298 = vmatprep.subr.bf16.mxu0 %v8284_v20 }
 0x3cd   :  { %v5659_v40 = vld [vmem:[%s11047_s6 + $0x118] sm:$0xff] }
 0x3ce   :  { %5600 = vmatmul.mubr.msk.f32.gmra.mrb[120].mxu0 %vm206_vm1, %v1581_v7  ;;  %v7338_v7 = vpack.c.bf16 %v5704_v61, %v5702_v32  ;;  %v5676_v32 = vld [vmem:[%s11047_s6 + $0x1a0] sm:$0xff] }
 0x3cf   :  { %7300 = vmatpush1.bf16.msra.mxu0 %v8939_v57  ;;  %v1533_v35 = vpop.f32.mrb[94].mxu1  ;;  %1755 = vmatprep.mubr.f32.mxu0 %v8283_v0 }
 0x3d0   :  { %v1582_v14 = vmax.f32 %v9582_v26, %v1533_v35  ;;  %v1535_v42 = vpop.f32.mrb[95].mxu1  ;;  %7301 = vmatprep.subr.bf16.mxu0 %v8284_v20 }
 0x3d1   :  { %v5706_v42 = vld [vmem:[%s11048_s7 + $0x110] sm:$0xff] }
 0x3d2   :  { %5601 = vmatmul.mubr.msk.f32.gmra.mrb[122].mxu0 %vm206_vm1, %v1582_v14  ;;  %v7340_v14 = vpack.c.bf16 %v5709_v37, %v5707_v34  ;;  %v5679_v34 = vld [vmem:[%s11047_s6 + $0x1b8] sm:$0xff] }
 0x3d3   :  { %7303 = vmatpush1.bf16.msra.mxu0 %v8943_v8  ;;  %v1538_v46 = vpop.f32.mrb[96].mxu1  ;;  %1761 = vmatprep.mubr.f32.mxu0 %v8283_v0 }
 0x3d4   :  { %v1583_v18 = vmax.f32 %v9591_v30, %v1538_v46  ;;  %v1540_v43 = vpop.f32.mrb[97].mxu1  ;;  %7304 = vmatprep.subr.bf16.mxu0 %v8284_v20  ;;  %v5708_v46 = vld [vmem:[%s11048_s7 + $0x120] sm:$0xff] }
 0x3d5   :  { %v5713_v43 = vld [vmem:[%s11048_s7 + $0x148] sm:$0xff] }
 0x3d6   :  { %5602 = vmatmul.mubr.msk.f32.gmra.mrb[124].mxu0 %vm206_vm1, %v1583_v18  ;;  %v5711_v18 = vld [vmem:[%s11048_s7 + $0x138] sm:$0xff] }
 0x3d7   :  { %7306 = vmatpush1.bf16.msra.mxu0 %v8947_v21  ;;  %v1543_v57 = vpop.f32.mrb[98].mxu1  ;;  %1767 = vmatprep.mubr.f32.mxu0 %v8283_v0 }
 0x3d8   :  { %v1584_v26 = vmax.f32 %v9600_v36, %v1543_v57  ;;  %v1545_v44 = vpop.f32.mrb[99].mxu1  ;;  %7307 = vmatprep.subr.bf16.mxu0 %v8284_v20  ;;  %v5658_v57 = vld [vmem:[%s11047_s6 + $0x110] sm:$0xff] }
 0x3d9   :  { %v7342_v44 = vpack.c.bf16 %v5708_v46, %v5706_v42 }
 0x3da   :  { %5603 = vmatmul.mubr.msk.f32.gmra.mrb[126].mxu0 %vm206_vm1, %v1584_v26 }
 0x3db   :  { %7309 = vmatpush1.bf16.msra.mxu0 %v8951_v33  ;;  %v1548_v8 = vpop.f32.mrb[100].mxu1  ;;  %1773 = vmatprep.mubr.f32.mxu0 %v8283_v0 }
 0x3dc   :  { %v1585_v30 = vmax.f32 %v9609_v41, %v1548_v8  ;;  %v1550_v48 = vpop.f32.mrb[101].mxu1  ;;  %7310 = vmatprep.subr.bf16.mxu0 %v8284_v20  ;;  %v5661_v8 = vld [vmem:[%s11047_s6 + $0x128] sm:$0xff] }
 0x3dd   :  { %v7344_v48 = vpack.c.bf16 %v5713_v43, %v5711_v18 }
 0x3de   :  { %5604 = vmatmul.mubr.msk.f32.gmra.mrb[128].mxu0 %vm206_vm1, %v1585_v30 }
 0x3df   :  { %7312 = vmatpush1.bf16.msra.mxu0 %v8955_v45  ;;  %v1553_v21 = vpop.f32.mrb[102].mxu1  ;;  %1779 = vmatprep.mubr.f32.mxu0 %v8283_v0 }
 0x3e0   :  { %v1586_v36 = vmax.f32 %v9618_v47, %v1553_v21  ;;  %v1555_v49 = vpop.f32.mrb[103].mxu1  ;;  %7313 = vmatprep.subr.bf16.mxu0 %v8284_v20  ;;  %v5710_v21 = vld [vmem:[%s11048_s7 + $0x130] sm:$0xff] }
 0x3e1   :  { %v5660_v49 = vld [vmem:[%s11047_s6 + $0x120] sm:$0xff] }
 0x3e2   :  { %5605 = vmatmul.mubr.msk.f32.gmra.mrb[130].mxu0 %vm206_vm1, %v1586_v36  ;;  %v5712_v36 = vld [vmem:[%s11048_s7 + $0x140] sm:$0xff] }
 0x3e3   :  { %7315 = vmatpush1.bf16.msra.mxu0 %v8959_v58  ;;  %v1558_v33 = vpop.f32.mrb[104].mxu1  ;;  %1785 = vmatprep.mubr.f32.mxu0 %v8283_v0 }
 0x3e4   :  { %v1587_v41 = vmax.f32 %v9627_v52, %v1558_v33  ;;  %v1560_v50 = vpop.f32.mrb[105].mxu1  ;;  %7316 = vmatprep.subr.bf16.mxu0 %v8284_v20 }
 0x3e5   :  { %v5663_v50 = vld [vmem:[%s11047_s6 + $0x138] sm:$0xff] }
 0x3e6   :  { %5606 = vmatmul.mubr.msk.f32.gmra.mrb[132].mxu0 %vm206_vm1, %v1587_v41  ;;  %v7346_v41 = vpack.c.bf16 %v5712_v36, %v5710_v21 }
 0x3e7   :  { %7318 = vmatpush1.bf16.msra.mxu0 %v8963_v10  ;;  %v1563_v45 = vpop.f32.mrb[106].mxu1  ;;  %1791 = vmatprep.mubr.f32.mxu0 %v8283_v0  ;;  %v5695_v10 = vld [vmem:[%s11048_s7 + $0xb8] sm:$0xff] }
 0x3e8   :  { %v1588_v47 = vmax.f32 %v9636_v56, %v1563_v45  ;;  %v1565_v53 = vpop.f32.mrb[107].mxu1  ;;  %7319 = vmatprep.subr.bf16.mxu0 %v8284_v20  ;;  %v7328_v5 = vpack.c.bf16 %v5697_v55, %v5695_v10  ;;  %v5714_v10 = vld [vmem:[%s11048_s7 + $0x150] sm:$0xf]  ;;  %v5664_v55 = vld [vmem:[%s11047_s6 + $0x140] sm:$0xff] }
 0x3e9   :  { %v5662_v53 = vld [vmem:[%s11047_s6 + $0x130] sm:$0xff] }
 0x3ea   :  { %5607 = vmatmul.mubr.msk.f32.gmra.mrb[134].mxu0 %vm206_vm1, %v1588_v47  ;;  %v5715_v47 = vld [vmem:[%s11048_s7 + $0x158] sm:$0xf] }
 0x3eb   :  { %7321 = vmatpush1.bf16.msra.mxu0 %v8967_v25  ;;  %v1568_v58 = vpop.f32.mrb[108].mxu1  ;;  %1797 = vmatprep.mubr.f32.mxu0 %v8283_v0 }
 0x3ec   :  { %v1589_v52 = vmax.f32 %v9645_v62, %v1568_v58  ;;  %v1570_v54 = vpop.f32.mrb[109].mxu1  ;;  %7322 = vmatprep.subr.bf16.mxu0 %v8284_v20  ;;  %v5694_v62 = vld [vmem:[%s11048_s7 + $0xb0] sm:$0xff] }
 0x3ee   :  { %5608 = vmatmul.mubr.msk.f32.gmra.mrb[136].mxu0 %vm206_vm1, %v1589_v52  ;;  %v5665_v52 = vld [vmem:[%s11047_s6 + $0x148] sm:$0xff] }
 0x3ef   :  { %7324 = vmatpush1.bf16.msra.mxu0 %v8971_v38  ;;  %v1573_v25 = vpop.f32.mrb[110].mxu1  ;;  %1803 = vmatprep.mubr.f32.mxu0 %v8283_v0  ;;  %v5696_v38 = vld [vmem:[%s11048_s7 + $0xc0] sm:$0xff] }
 0x3f0   :  { %v1590_v56 = vmax.f32 %v9654_v11, %v1573_v25  ;;  %v1575_v60 = vpop.f32.mrb[111].mxu1  ;;  %7325 = vmatprep.subr.bf16.mxu0 %v8284_v20  ;;  %v7330_v13 = vpack.c.bf16 %v5696_v38, %v5694_v62  ;;  %v5669_v62 = vld [vmem:[%s11047_s6 + $0x168] sm:$0xff] }
 0x3f2   :  { %5609 = vmatmul.mubr.msk.f32.gmra.mrb[138].mxu0 %vm206_vm1, %v1590_v56  ;;  %v5667_v56 = vld [vmem:[%s11047_s6 + $0x158] sm:$0xff] }
 0x3f3   :  { %7327 = vmatpush1.bf16.msra.mxu0 %v8975_v51  ;;  %5680 = vmatprep.mubr.msk.f32.mxu0 %vm1194_vm3, %v5653_v4  ;;  %v9767_v11 = vpop.f32.mrb[112].mxu1  ;;  %v5698_v51 = vld [vmem:[%s11048_s7 + $0xd0] sm:$0xff] }
 0x3f4   :  { %v1977_v16 = vpop.f32.mrb[113].mxu1  ;;  %7329 = vmatprep.subr.bf16.mxu0 %v7328_v5  ;;  %v7334_v59 = vpack.c.bf16 %v5700_v19, %v5698_v51  ;;  %v5666_v4 = vld [vmem:[%s11047_s6 + $0x150] sm:$0xff]  ;;  %v5672_v19 = vld [vmem:[%s11047_s6 + $0x180] sm:$0xff] }
 0x3f6   :  { %2180 = vmatmul.mubr.f32.vlgmr.msra.gmra.mrb[140].mxu0 %v5652_v9  ;;  %v5671_v9 = vld [vmem:[%s11047_s6 + $0x178] sm:$0xff] }
 0x3f7   :  { %5681 = vmatprep.mubr.msk.f32.mxu0 %vm1194_vm3, %v5655_v15  ;;  %v9788_v28 = vpop.f32.mrb[114].mxu1  ;;  %7331 = vmatpush1.bf16.msra.mxu0 %v7330_v13  ;;  %v5670_v15 = vld [vmem:[%s11047_s6 + $0x170] sm:$0xff] }
 0x3f8   :  { %v1982_v31 = vpop.f32.mrb[115].mxu1  ;;  %7333 = vmatprep.subr.bf16.mxu0 %v7332_v17  ;;  %v5673_v17 = vld [vmem:[%s11047_s6 + $0x188] sm:$0xff] }
 0x3f9   :  { %v5677_v31 = vld [vmem:[%s11047_s6 + $0x1a8] sm:$0xff] }
 0x3fa   :  { %2185 = vmatmul.mubr.f32.gmra.mrb[142].mxu0 %v5654_v27 }
 0x3fb   :  { %5682 = vmatprep.mubr.msk.f32.mxu0 %vm1194_vm3, %v5657_v29  ;;  %v9809_v24 = vpop.f32.mrb[116].mxu1  ;;  %7335 = vmatpush1.bf16.msra.mxu0 %v7334_v59  ;;  %v5674_v59 = vld [vmem:[%s11047_s6 + $0x190] sm:$0xff] }
 0x3fc   :  { %v1987_v35 = vpop.f32.mrb[117].mxu1  ;;  %7337 = vmatprep.subr.bf16.mxu0 %v7336_v12 }
 0x3fe   :  { %2190 = vmatmul.mubr.f32.gmra.mrb[144].mxu0 %v5656_v39  ;;  %v5678_v39 = vld [vmem:[%s11047_s6 + $0x1b0] sm:$0xff] }
 0x3ff   :  { %5683 = vmatprep.mubr.msk.f32.mxu0 %vm1194_vm3, %v5659_v40  ;;  %v9830_v26 = vpop.f32.mrb[118].mxu1  ;;  %7339 = vmatpush1.bf16.msra.mxu0 %v7338_v7 }
 0x400   :  { %v1992_v30 = vpop.f32.mrb[119].mxu1  ;;  %7341 = vmatprep.subr.bf16.mxu0 %v7340_v14 }
 0x402   :  { %2195 = vmatmul.mubr.f32.gmra.mrb[146].mxu0 %v5658_v57 }
 0x403   :  { %5684 = vmatprep.mubr.msk.f32.mxu0 %vm1194_vm3, %v5661_v8  ;;  %v9845_v33 = vpop.f32.mrb[120].mxu1  ;;  %7343 = vmatpush1.bf16.msra.mxu0 %v7342_v44 }
 0x404   :  { %v1997_v45 = vpop.f32.mrb[121].mxu1  ;;  %7345 = vmatprep.subr.bf16.mxu0 %v7344_v48 }
 0x406   :  { %2200 = vmatmul.mubr.f32.gmra.mrb[148].mxu0 %v5660_v49 }
 0x407   :  { %5685 = vmatprep.mubr.msk.f32.mxu0 %vm1194_vm3, %v5663_v50  ;;  %v9857_v58 = vpop.f32.mrb[122].mxu1  ;;  %7347 = vmatpush1.bf16.msra.mxu0 %v7346_v41 }
 0x408   :  { %v2002_v54 = vpop.f32.mrb[123].mxu1  ;;  %5716 = vmatprep.subr.msk.mxu0 %vm291_vm0, %v5715_v47 }
 0x409   :  { %v5817_v54 = vld [vmem:[%s11048_s7 + $0x168] sm:$0xff] }
 0x40a   :  { %2205 = vmatmul.mubr.f32.gmra.mrb[150].mxu0 %v5662_v53 }
 0x40b   :  { %5686 = vmatprep.mubr.msk.f32.mxu0 %vm1194_vm3, %v5665_v52  ;;  %v9870_v25 = vpop.f32.mrb[124].mxu1  ;;  %5717 = vmatpush1.msk.msra.mxu0 %vm291_vm0, %v5714_v10  ;;  %v5819_v10 = vld [vmem:[%s11048_s7 + $0x178] sm:$0xff] }
 0x40c   :  { %v2007_v60 = vpop.f32.mrb[125].mxu1 }
 0x40e   :  { %2210 = vmatmul.mubr.f32.gmra.mrb[152].mxu0 %v5664_v55  ;;  %v7432_v55 = vpack.c.bf16 %v5819_v10, %v5817_v54 }
 0x40f   :  { %5687 = vmatprep.mubr.msk.f32.mxu0 %vm1194_vm3, %v5667_v56  ;;  %v9880_v5 = vpop.f32.mrb[126].mxu1 }
 0x410   :  { %v2012_v38 = vpop.f32.mrb[127].mxu1  ;;  %7433 = vmatprep.subr.bf16.mxu0 %v7432_v55 }
 0x412   :  { %2215 = vmatmul.mubr.f32.gmra.mrb[154].mxu0 %v5666_v4 }
 0x413   :  { %5688 = vmatprep.mubr.msk.f32.mxu0 %vm1194_vm3, %v5669_v62  ;;  %v9889_v6 = vpop.f32.mrb[128].mxu1 }
 0x414   :  { %v2017_v13 = vpop.f32.mrb[129].mxu1 }
 0x416   :  { %2220 = vmatmul.mubr.f32.gmra.mrb[156].mxu0 %v5668_v2 }
 0x417   :  { %5689 = vmatprep.mubr.msk.f32.mxu0 %vm1194_vm3, %v5671_v9  ;;  %v9898_v16 = vpop.f32.mrb[130].mxu1 }
 0x418   :  { %v2022_v51 = vpop.f32.mrb[131].mxu1 }
 0x41a   :  { %2225 = vmatmul.mubr.f32.gmra.mrb[158].mxu0 %v5670_v15 }
 0x41b   :  { %5690 = vmatprep.mubr.msk.f32.mxu0 %vm1194_vm3, %v5673_v17  ;;  %v9907_v22 = vpop.f32.mrb[132].mxu1 }
 0x41c   :  { %v2027_v27 = vpop.f32.mrb[133].mxu1 }
 0x41e   :  { %2230 = vmatmul.mubr.f32.gmra.mrb[160].mxu0 %v5672_v19 }
 0x41f   :  { %5691 = vmatprep.mubr.msk.f32.mxu0 %vm1194_vm3, %v5675_v23  ;;  %v9916_v29 = vpop.f32.mrb[134].mxu1 }
 0x420   :  { %v2032_v12 = vpop.f32.mrb[135].mxu1 }
 0x422   :  { %2235 = vmatmul.mubr.f32.gmra.mrb[162].mxu0 %v5674_v59 }
 0x423   :  { %5692 = vmatprep.mubr.msk.f32.mxu0 %vm1194_vm3, %v5677_v31  ;;  %v9925_v61 = vpop.f32.mrb[136].mxu1 }
 0x424   :  { %v2037_v37 = vpop.f32.mrb[137].mxu1 }
 0x426   :  { %2240 = vmatmul.mubr.f32.gmra.mrb[164].mxu0 %v5676_v32 }
 0x427   :  { %5693 = vmatprep.mubr.msk.f32.mxu0 %vm1194_vm3, %v5679_v34  ;;  %v9934_v7 = vpop.f32.mrb[138].mxu1  ;;  %v5829_v34 = vld [vmem:[%s11048_s7 + $0x1c8] sm:$0xff] }
 0x428   :  { %v2042_v40 = vpop.f32.mrb[139].mxu1 }
 0x42a   :  { %2245 = vmatmul.mubr.f32.gmra.mrb[166].mxu0 %v5678_v39 }
 0x42b   :  { %v9936_v35 = vpop.f32.mrb[140].mxu1  ;;  %2399 = vmatprep.mubr.f32.mxu0 %v8283_v0 }
 0x42c   :  { %v2651_v14 = vpop.f32.mrb[141].mxu1 }
 0x42f   :  { %v9939_v42 = vpop.f32.mrb[142].mxu1 }
 0x430   :  { %v2656_v46 = vpop.f32.mrb[143].mxu1 }
 0x433   :  { %v9941_v18 = vpop.f32.mrb[144].mxu1 }
 0x434   :  { %v2661_v43 = vpop.f32.mrb[145].mxu1 }
 0x437   :  { %v9943_v57 = vpop.f32.mrb[146].mxu1 }
 0x438   :  { %v2666_v44 = vpop.f32.mrb[147].mxu1 }
 0x43b   :  { %v9945_v8 = vpop.f32.mrb[148].mxu1 }
 0x43c   :  { %v2671_v30 = vpop.f32.mrb[149].mxu1 }
 0x43f   :  { %v9947_v48 = vpop.f32.mrb[150].mxu1 }
 0x440   :  { %v2676_v21 = vpop.f32.mrb[151].mxu1 }
 0x443   :  { %v9949_v36 = vpop.f32.mrb[152].mxu1 }
 0x444   :  { %v2681_v49 = vpop.f32.mrb[153].mxu1 }
 0x447   :  { %v9951_v41 = vpop.f32.mrb[154].mxu1 }
 0x448   :  { %v2686_v50 = vpop.f32.mrb[155].mxu1 }
 0x44b   :  { %v9953_v45 = vpop.f32.mrb[156].mxu1 }
 0x44c   :  { %v2691_v47 = vpop.f32.mrb[157].mxu1 }
 0x44f   :  { %v9955_v53 = vpop.f32.mrb[158].mxu1 }
 0x450   :  { %v2696_v52 = vpop.f32.mrb[159].mxu1 }
 0x453   :  { %v9963_v56 = vpop.f32.mrb[160].mxu1 }
 0x454   :  { %v2701_v60 = vpop.f32.mrb[161].mxu1 }
 0x457   :  { %v9965_v4 = vpop.f32.mrb[162].mxu1 }
 0x458   :  { %v2706_v62 = vpop.f32.mrb[163].mxu1 }
 0x459   :  { %v3225_v62 = vld [vmem:[%s11050_s9 + $0x58] sm:$0xff] }
 0x45b   :  { %v9967_v38 = vpop.f32.mrb[164].mxu1 }
 0x45c   :  { %v2711_v2 = vpop.f32.mrb[165].mxu1 }
 0x45f   :  { %v9969_v9 = vpop.f32.mrb[166].mxu1 }
 0x460   :  { %v2716_v13 = vpop.f32.mrb[167].mxu1 }
 0x463   :  { %v9971_v15 = vpop.f32.mrb[168].mxu1 }
 0x464   :  { %v2924_v17 = vmax.f32 %v9936_v35, %v9971_v15  ;;  %v2857_v51 = vpop.f32.mrb[169].mxu1  ;;  %v3425_v35 = vld [vmem:[#allocation4 + $0x30] sm:$0xff]  ;;  %v3426_v15 = vld [vmem:[#allocation4 + $0x38] sm:$0xff] }
 0x465   :  { %v3224_v51 = vld [vmem:[%s11050_s9 + $0x50] sm:$0xff] }
 0x467   :  { %v9975_v19 = vpop.f32.mrb[170].mxu1 }
 0x468   :  { %v2925_v23 = vmax.f32 %v9939_v42, %v9975_v19  ;;  %v2862_v27 = vpop.f32.mrb[171].mxu1  ;;  %v3427_v42 = vld [vmem:[#allocation4 + $0x40] sm:$0xff]  ;;  %v3428_v19 = vld [vmem:[#allocation4 + $0x48] sm:$0xff] }
 0x46b   :  { %v9979_v59 = vpop.f32.mrb[172].mxu1 }
 0x46c   :  { %v2926_v31 = vmax.f32 %v9941_v18, %v9979_v59  ;;  %v2867_v12 = vpop.f32.mrb[173].mxu1  ;;  %v3429_v18 = vld [vmem:[#allocation4 + $0x50] sm:$0xff]  ;;  %v3430_v59 = vld [vmem:[#allocation4 + $0x58] sm:$0xff] }
 0x46f   :  { %v9983_v32 = vpop.f32.mrb[174].mxu1 }
 0x470   :  { %v2872_v37 = vpop.f32.mrb[175].mxu1 }
 0x471   :  { %v3220_v37 = vld [vmem:[%s11050_s9 + $0x30] sm:$0xff] }
 0x473   :  { %v9987_v39 = vpop.f32.mrb[176].mxu1 }
 0x474   :  { %v2877_v14 = vpop.f32.mrb[177].mxu1 }
 0x477   :  { %v9991_v46 = vpop.f32.mrb[178].mxu1 }
 0x478   :  { %v2882_v44 = vpop.f32.mrb[179].mxu1 }
 0x47b   :  { %v9995_v30 = vpop.f32.mrb[180].mxu1 }
 0x47c   :  { %v2887_v49 = vpop.f32.mrb[181].mxu1 }
 0x47d   :  { %v3216_v49 = vld [vmem:[%s11050_s9 + $0x10] sm:$0xff] }
 0x47f   :  { %v9999_v50 = vpop.f32.mrb[182].mxu1 }
 0x480   :  { %v2892_v52 = vpop.f32.mrb[183].mxu1 }
 0x483   :  { %v10003_v54 = vpop.f32.mrb[184].mxu1 }
 0x484   :  { %v2897_v55 = vpop.f32.mrb[185].mxu1 }
 0x487   :  { %v10007_v60 = vpop.f32.mrb[186].mxu1 }
 0x488   :  { %v2902_v2 = vpop.f32.mrb[187].mxu1 }
 0x48b   :  { %v10011_v13 = vpop.f32.mrb[188].mxu1 }
 0x48c   :  { %v2907_v27 = vpop.f32.mrb[189].mxu1 }
 0x48d   :  { %v3214_v27 = vld [vmem:[%s11050_s9] sm:$0xff] }
 0x48f   :  { %v10015_v12 = vpop.f32.mrb[190].mxu1 }
 0x490   :  { %v2912_v14 = vpop.f32.mrb[191].mxu1 }
 0x491   :  { %v3215_v14 = vld [vmem:[%s11050_s9 + $0x8] sm:$0xff] }
 0x492   :  { %v7453_v1 = vpack.c.bf16 %v3215_v14, %v3214_v27  ;;  %v3219_v27 = vld [vmem:[%s11050_s9 + $0x28] sm:$0xff] }
 0x493   :  { %v10019_v44 = vpop.f32.mrb[192].mxu1 }
 0x494   :  { %v2917_v52 = vpop.f32.mrb[193].mxu1  ;;  %7454 = vmatpush1.bf16.msra.mxu1 %v7453_v1  ;;  %v3221_v1 = vld [vmem:[%s11050_s9 + $0x38] sm:$0xff] }
 0x495   :  { %v3217_v52 = vld [vmem:[%s11050_s9 + $0x18] sm:$0xff]  ;;  %7455 = vmatprep.subr.bf16.mxu1 %v8284_v20 }
 0x496   :  { %v7456_v2 = vpack.c.bf16 %v3217_v52, %v3216_v49  ;;  %v7462_v49 = vpack.c.bf16 %v3221_v1, %v3220_v37  ;;  %v3222_v52 = vld [vmem:[%s11050_s9 + $0x40] sm:$0xff]  ;;  %v5821_v37 = vld [vmem:[%s11048_s7 + $0x188] sm:$0xff] }
 0x497   :  { %v10023_v55 = vpop.f32.mrb[194].mxu1 }
 0x498   :  { %v2922_v3 = vpop.f32.mrb[195].mxu1  ;;  %7457 = vmatpush1.bf16.msra.mxu1 %v7456_v2  ;;  %v3223_v2 = vld [vmem:[%s11050_s9 + $0x48] sm:$0xff] }
 0x499   :  { %v3218_v3 = vld [vmem:[%s11050_s9 + $0x20] sm:$0xff]  ;;  %7458 = vmatprep.subr.bf16.mxu1 %v8284_v20  ;;  %v7465_v1 = vpack.c.bf16 %v3223_v2, %v3222_v52  ;;  %v5822_v52 = vld [vmem:[%s11048_s7 + $0x190] sm:$0xff]  ;;  %v5825_v2 = vld [vmem:[%s11048_s7 + $0x1a8] sm:$0xff] }
 0x49a   :  { %v7459_v14 = vpack.c.bf16 %v3219_v27, %v3218_v3  ;;  %v5816_v3 = vld [vmem:[%s11048_s7 + $0x160] sm:$0xff]  ;;  %v5818_v27 = vld [vmem:[%s11048_s7 + $0x170] sm:$0xff] }
 0x49b   :  { %v7434_v47 = vpack.c.bf16 %v5818_v27, %v5816_v3  ;;  %v5827_v3 = vld [vmem:[%s11048_s7 + $0x1b8] sm:$0xff] }
 0x49c   :  { %7460 = vmatpush1.bf16.msra.mxu1 %v7459_v14  ;;  %v5823_v14 = vld [vmem:[%s11048_s7 + $0x198] sm:$0xff] }
 0x49d   :  { %7461 = vmatprep.subr.bf16.mxu1 %v8284_v20  ;;  %v7436_v40 = vpack.c.bf16 %v5823_v14, %v5821_v37 }
 0x4a0   :  { %7463 = vmatpush1.bf16.msra.mxu1 %v7462_v49  ;;  %v5820_v49 = vld [vmem:[%s11048_s7 + $0x180] sm:$0xff] }
 0x4a1   :  { %7464 = vmatprep.subr.bf16.mxu1 %v8284_v20  ;;  %v7438_v37 = vpack.c.bf16 %v5822_v52, %v5820_v49  ;;  %v3229_v49 = vld [vmem:[%s11050_s9 + $0x78] sm:$0xff] }
 0x4a4   :  { %7466 = vmatpush1.bf16.msra.mxu1 %v7465_v1  ;;  %v5826_v1 = vld [vmem:[%s11048_s7 + $0x1b0] sm:$0xff] }
 0x4a5   :  { %7467 = vmatprep.subr.bf16.mxu1 %v8284_v20 }
 0x4c9   :  { %v2181_v10 = vpop.f32.mrb[140].mxu0 }
 0x4ca   :  { %v2250_v21 = vmax.f32 %v9767_v11, %v2181_v10  ;;  %v2183_v43 = vpop.f32.mrb[141].mxu0  ;;  %v7468_v11 = vpack.c.bf16 %v3225_v62, %v3224_v51  ;;  %v3227_v10 = vld [vmem:[%s11050_s9 + $0x68] sm:$0xff]  ;;  %v5824_v51 = vld [vmem:[%s11048_s7 + $0x1a0] sm:$0xff] }
 0x4cb   :  { %v3226_v43 = vld [vmem:[%s11050_s9 + $0x60] sm:$0xff] }
 0x4cc   :  { %5718 = vmatmul.mubr.msk.f32.vlgmr.msra.gmra.mrb[112].mxu0 %vm206_vm1, %v2250_v21  ;;  %v7440_v21 = vpack.c.bf16 %v5827_v3, %v5825_v2  ;;  %7469 = vmatpush1.bf16.msra.mxu1 %v7468_v11  ;;  %v7442_v2 = vpack.c.bf16 %v5826_v1, %v5824_v51 }
 0x4cd   :  { %v2186_v27 = vpop.f32.mrb[142].mxu0  ;;  %2405 = vmatprep.mubr.f32.mxu0 %v8283_v0  ;;  %7435 = vmatpush1.bf16.msra.mxu0 %v7434_v47  ;;  %v5831_v47 = vld [vmem:[%s11048_s7 + $0x1d8] sm:$0xff] }
 0x4ce   :  { %v2251_v14 = vmax.f32 %v9788_v28, %v2186_v27  ;;  %v2188_v62 = vpop.f32.mrb[143].mxu0  ;;  %7437 = vmatprep.subr.bf16.mxu0 %v7436_v40  ;;  %v7471_v28 = vpack.c.bf16 %v3227_v10, %v3226_v43  ;;  %7470 = vmatprep.subr.bf16.mxu1 %v8284_v20  ;;  %v3228_v40 = vld [vmem:[%s11050_s9 + $0x70] sm:$0xff]  ;;  %v7444_v43 = vpack.c.bf16 %v5831_v47, %v5829_v34  ;;  %v5828_v10 = vld [vmem:[%s11048_s7 + $0x1c0] sm:$0xff] }
 0x4cf   :  { %v5830_v27 = vld [vmem:[%s11048_s7 + $0x1d0] sm:$0xff]  ;;  %v3230_v34 = vld [vmem:[%s11050_s9 + $0x80] sm:$0xff]  ;;  %v3231_v62 = vld [vmem:[%s11050_s9 + $0x88] sm:$0xff] }
 0x4d0   :  { %5719 = vmatmul.mubr.msk.f32.gmra.mrb[114].mxu0 %vm206_vm1, %v2251_v14  ;;  %v5833_v14 = vld [vmem:[%s11048_s7 + $0x1e8] sm:$0xff]  ;;  %7472 = vmatpush1.bf16.msra.mxu1 %v7471_v28  ;;  %v7446_v51 = vpack.c.bf16 %v5830_v27, %v5828_v10 }
 0x4d1   :  { %v2191_v52 = vpop.f32.mrb[144].mxu0  ;;  %2411 = vmatprep.mubr.f32.mxu0 %v8283_v0  ;;  %7439 = vmatpush1.bf16.msra.mxu0 %v7438_v37  ;;  %v5835_v37 = vld [vmem:[%s11048_s7 + $0x1f8] sm:$0xff]  ;;  %v5837_v27 = vld [vmem:[%s11048_s7 + $0x208] sm:$0xf] }
 0x4d2   :  { %v2252_v3 = vmax.f32 %v9809_v24, %v2191_v52  ;;  %v2193_v11 = vpop.f32.mrb[145].mxu0  ;;  %7441 = vmatprep.subr.bf16.mxu0 %v7440_v21  ;;  %v7474_v24 = vpack.c.bf16 %v3229_v49, %v3228_v40  ;;  %7473 = vmatprep.subr.bf16.mxu1 %v8284_v20  ;;  %v7448_v28 = vpack.c.bf16 %v5835_v37, %v5833_v14  ;;  %v5832_v40 = vld [vmem:[%s11048_s7 + $0x1e0] sm:$0xff]  ;;  %v5834_v49 = vld [vmem:[%s11048_s7 + $0x1f0] sm:$0xff] }
 0x4d3   :  { %v7477_v52 = vpack.c.bf16 %v3231_v62, %v3230_v34  ;;  %v7450_v11 = vpack.c.bf16 %v5834_v49, %v5832_v40  ;;  %v3234_v37 = vld [vmem:[%s11050_s9 + $0xa0] sm:$0xff] }
 0x4d4   :  { %5720 = vmatmul.mubr.msk.f32.gmra.mrb[116].mxu0 %vm206_vm1, %v2252_v3  ;;  %7475 = vmatpush1.bf16.msra.mxu1 %v7474_v24 }
 0x4d5   :  { %v2196_v21 = vpop.f32.mrb[146].mxu0  ;;  %2417 = vmatprep.mubr.f32.mxu0 %v8283_v0  ;;  %7443 = vmatpush1.bf16.msra.mxu0 %v7442_v2  ;;  %v3233_v2 = vld [vmem:[%s11050_s9 + $0x98] sm:$0xff] }
 0x4d6   :  { %v2253_v1 = vmax.f32 %v9830_v26, %v2196_v21  ;;  %v2198_v47 = vpop.f32.mrb[147].mxu0  ;;  %7445 = vmatprep.subr.bf16.mxu0 %v7444_v43  ;;  %7476 = vmatprep.subr.bf16.mxu1 %v8284_v20  ;;  %v3232_v26 = vld [vmem:[%s11050_s9 + $0x90] sm:$0xff]  ;;  %v5836_v21 = vld [vmem:[%s11048_s7 + $0x200] sm:$0xf] }
 0x4d7   :  { %v7480_v14 = vpack.c.bf16 %v3233_v2, %v3232_v26 }
 0x4d8   :  { %5721 = vmatmul.mubr.msk.f32.gmra.mrb[118].mxu0 %vm206_vm1, %v2253_v1  ;;  %7478 = vmatpush1.bf16.msra.mxu1 %v7477_v52  ;;  %v3236_v1 = vld [vmem:[%s11050_s9 + $0xb0] sm:$0xff] }
 0x4d9   :  { %v2201_v3 = vpop.f32.mrb[148].mxu0  ;;  %2423 = vmatprep.mubr.f32.mxu0 %v8283_v0  ;;  %7447 = vmatpush1.bf16.msra.mxu0 %v7446_v51 }
 0x4da   :  { %v2254_v43 = vmax.f32 %v9845_v33, %v2201_v3  ;;  %v2203_v10 = vpop.f32.mrb[149].mxu0  ;;  %7449 = vmatprep.subr.bf16.mxu0 %v7448_v28  ;;  %7479 = vmatprep.subr.bf16.mxu1 %v8284_v20  ;;  %v3235_v33 = vld [vmem:[%s11050_s9 + $0xa8] sm:$0xff] }
 0x4db   :  { %v7483_v51 = vpack.c.bf16 %v3235_v33, %v3234_v37 }
 0x4dc   :  { %5722 = vmatmul.mubr.msk.f32.gmra.mrb[120].mxu0 %vm206_vm1, %v2254_v43  ;;  %7481 = vmatpush1.bf16.msra.mxu1 %v7480_v14 }
 0x4dd   :  { %v2206_v24 = vpop.f32.mrb[150].mxu0  ;;  %2429 = vmatprep.mubr.f32.mxu0 %v8283_v0  ;;  %7451 = vmatpush1.bf16.msra.mxu0 %v7450_v11 }
 0x4de   :  { %v2255_v34 = vmax.f32 %v9857_v58, %v2206_v24  ;;  %v2208_v62 = vpop.f32.mrb[151].mxu0  ;;  %5838 = vmatprep.subr.msk.mxu0 %vm291_vm0, %v5837_v27  ;;  %7482 = vmatprep.subr.bf16.mxu1 %v8284_v20  ;;  %v3237_v58 = vld [vmem:[%s11050_s9 + $0xb8] sm:$0xff] }
 0x4df   :  { %v7486_v49 = vpack.c.bf16 %v3237_v58, %v3236_v1  ;;  %v3419_v1 = vld [vmem:[#allocation4] sm:$0xff]  ;;  %v3420_v58 = vld [vmem:[#allocation4 + $0x8] sm:$0xff] }
 0x4e0   :  { %5723 = vmatmul.mubr.msk.f32.gmra.mrb[122].mxu0 %vm206_vm1, %v2255_v34  ;;  %7484 = vmatpush1.bf16.msra.mxu1 %v7483_v51 }
 0x4e1   :  { %v2211_v47 = vpop.f32.mrb[152].mxu0  ;;  %2435 = vmatprep.mubr.f32.mxu0 %v8283_v0  ;;  %5839 = vmatpush1.msk.msra.mxu0 %vm291_vm0, %v5836_v21 }
 0x4e2   :  { %v2256_v28 = vmax.f32 %v9870_v25, %v2211_v47  ;;  %v2213_v40 = vpop.f32.mrb[153].mxu0  ;;  %7494 = vmatprep.subr.bf16.mxu0 %v8284_v20  ;;  %7485 = vmatprep.subr.bf16.mxu1 %v8284_v20  ;;  %v3421_v47 = vld [vmem:[#allocation4 + $0x10] sm:$0xff] }
 0x4e3   :  { %v3424_v40 = vld [vmem:[#allocation4 + $0x28] sm:$0xff] }
 0x4e4   :  { %5724 = vmatmul.mubr.msk.f32.gmra.mrb[124].mxu0 %vm206_vm1, %v2256_v28  ;;  %7487 = vmatpush1.bf16.msra.mxu1 %v7486_v49  ;;  %v3422_v28 = vld [vmem:[#allocation4 + $0x18] sm:$0xff] }
 0x4e5   :  { %v2216_v52 = vpop.f32.mrb[154].mxu0  ;;  %2441 = vmatprep.mubr.f32.mxu0 %v8283_v0  ;;  %7488 = vmatprep.subr.bf16.mxu1 %v8284_v20 }
 0x4e6   :  { %v2257_v26 = vmax.f32 %v9880_v5, %v2216_v52  ;;  %v2218_v2 = vpop.f32.mrb[155].mxu0  ;;  %v7507_v52 = vpack.c.bf16 %v3428_v19, %v3427_v42 }
 0x4e7   :  { %v11076_v2 = vmax.f32 %v9947_v48, %v9991_v46  ;;  %v3435_v48 = vld [vmem:[#allocation4 + $0x80] sm:$0xff]  ;;  %v3436_v46 = vld [vmem:[#allocation4 + $0x88] sm:$0xff] }
 0x4e8   :  { %5725 = vmatmul.mubr.msk.f32.gmra.mrb[126].mxu0 %vm206_vm1, %v2257_v26  ;;  %v7510_v26 = vpack.c.bf16 %v3430_v59, %v3429_v18 }
 0x4e9   :  { %v2221_v25 = vpop.f32.mrb[156].mxu0  ;;  %2447 = vmatprep.mubr.f32.mxu0 %v8283_v0 }
 0x4ea   :  { %v2258_v3 = vmax.f32 %v9889_v6, %v2221_v25  ;;  %v2223_v11 = vpop.f32.mrb[157].mxu0 }
 0x4ec   :  { %5726 = vmatmul.mubr.msk.f32.gmra.mrb[128].mxu0 %vm206_vm1, %v2258_v3  ;;  %v11077_v3 = vmax.f32 %v9949_v36, %v9995_v30  ;;  %v3437_v36 = vld [vmem:[#allocation4 + $0x90] sm:$0xff]  ;;  %v3438_v30 = vld [vmem:[#allocation4 + $0x98] sm:$0xff] }
 0x4ed   :  { %v2226_v43 = vpop.f32.mrb[158].mxu0  ;;  %2453 = vmatprep.mubr.f32.mxu0 %v8283_v0 }
 0x4ee   :  { %v2259_v10 = vmax.f32 %v9898_v16, %v2226_v43  ;;  %v2228_v5 = vpop.f32.mrb[159].mxu0  ;;  %v11078_v43 = vmax.f32 %v9951_v41, %v9999_v50  ;;  %v3439_v41 = vld [vmem:[#allocation4 + $0xa0] sm:$0xff]  ;;  %v3440_v50 = vld [vmem:[#allocation4 + $0xa8] sm:$0xff] }
 0x4ef   :  { %v11079_v5 = vmax.f32 %v9953_v45, %v10003_v54  ;;  %v3441_v45 = vld [vmem:[#allocation4 + $0xb0] sm:$0xff]  ;;  %v3442_v54 = vld [vmem:[#allocation4 + $0xb8] sm:$0xff] }
 0x4f0   :  { %5727 = vmatmul.mubr.msk.f32.gmra.mrb[130].mxu0 %vm206_vm1, %v2259_v10  ;;  %v7519_v10 = vpack.c.bf16 %v3436_v46, %v3435_v48 }
 0x4f1   :  { %v2231_v27 = vpop.f32.mrb[160].mxu0  ;;  %2459 = vmatprep.mubr.f32.mxu0 %v8283_v0 }
 0x4f2   :  { %v2260_v14 = vmax.f32 %v9907_v22, %v2231_v27  ;;  %v2233_v37 = vpop.f32.mrb[161].mxu0  ;;  %v7522_v27 = vpack.c.bf16 %v3438_v30, %v3437_v36 }
 0x4f3   :  { %v7525_v37 = vpack.c.bf16 %v3440_v50, %v3439_v41 }
 0x4f4   :  { %5728 = vmatmul.mubr.msk.f32.gmra.mrb[132].mxu0 %vm206_vm1, %v2260_v14  ;;  %v11080_v14 = vmax.f32 %v9955_v53, %v10007_v60  ;;  %v11082_v53 = vmax.f32 %v9965_v4, %v10015_v12  ;;  %v11084_v60 = vmax.f32 %v9969_v9, %v10023_v55  ;;  %v3238_v4 = vld [vmem:[%s11050_s9 + $0xc0] sm:$0xff]  ;;  %v3443_v12 = vld [vmem:[#allocation4 + $0xc0] sm:$0xff]  ;;  %v3240_v9 = vld [vmem:[%s11050_s9 + $0xd0] sm:$0xff] }
 0x4f5   :  { %v2236_v6 = vpop.f32.mrb[162].mxu0  ;;  %2465 = vmatprep.mubr.f32.mxu0 %v8283_v0  ;;  %v3241_v55 = vld [vmem:[%s11050_s9 + $0xd8] sm:$0xff] }
 0x4f6   :  { %v2261_v33 = vmax.f32 %v9916_v29, %v2236_v6  ;;  %v2238_v24 = vpop.f32.mrb[163].mxu0  ;;  %v7495_v29 = vpack.c.bf16 %v3420_v58, %v3419_v1  ;;  %v11081_v6 = vmax.f32 %v9963_v56, %v10011_v13  ;;  %v11083_v56 = vmax.f32 %v9967_v38, %v10019_v44  ;;  %v3239_v13 = vld [vmem:[%s11050_s9 + $0xc8] sm:$0xff]  ;;  %v3444_v38 = vld [vmem:[#allocation4 + $0xc8] sm:$0xff] }
 0x4f7   :  { %v7489_v24 = vpack.c.bf16 %v3239_v13, %v3238_v4  ;;  %v7531_v44 = vpack.c.bf16 %v3444_v38, %v3443_v12  ;;  %v11086_v58 = vsub.s32 1, %v8791_v63 }
 0x4f8   :  { %5729 = vmatmul.mubr.msk.f32.gmra.mrb[134].mxu0 %vm206_vm1, %v2261_v33  ;;  %v7528_v33 = vpack.c.bf16 %v3442_v54, %v3441_v45 }
 0x4f9   :  { %v2241_v16 = vpop.f32.mrb[164].mxu0  ;;  %2471 = vmatprep.mubr.f32.mxu0 %v8283_v0  ;;  %7490 = vmatpush1.bf16.msra.mxu1 %v7489_v24 }
 0x4fa   :  { %v2262_v34 = vmax.f32 %v9925_v61, %v2241_v16  ;;  %v2243_v62 = vpop.f32.mrb[165].mxu0  ;;  %v7498_v61 = vpack.c.bf16 %v3422_v28, %v3421_v47  ;;  %7491 = vmatprep.subr.bf16.mxu1 %v8284_v20  ;;  %v3445_v16 = vld [vmem:[#allocation4 + $0xd0] sm:$0xff] }
 0x4fb   :  { %v3446_v62 = vld [vmem:[#allocation4 + $0xd8] sm:$0xff] }
 0x4fc   :  { %5730 = vmatmul.mubr.msk.f32.gmra.mrb[136].mxu0 %vm206_vm1, %v2262_v34  ;;  %v7492_v34 = vpack.c.bf16 %v3241_v55, %v3240_v9 }
 0x4fd   :  { %v2246_v22 = vpop.f32.mrb[166].mxu0  ;;  %2477 = vmatprep.mubr.f32.mxu0 %v8283_v0 }
 0x4fe   :  { %v2263_v21 = vmax.f32 %v9934_v7, %v2246_v22  ;;  %v2248_v51 = vpop.f32.mrb[167].mxu0  ;;  %v3423_v7 = vld [vmem:[#allocation4 + $0x20] sm:$0xff]  ;;  %v7534_v22 = vpack.c.bf16 %v3446_v62, %v3445_v16  ;;  %7493 = vmatpush1.bf16.msra.mxu1 %v7492_v34 }
 0x4ff   :  { %v7501_v49 = vpack.c.bf16 %v3424_v40, %v3423_v7  ;;  %7536 = vmatprep.subr.bf16.mxu1 %v8284_v20  ;;  %v11085_v51 = vsub.s32 0, %v8791_v63 }
 0x500   :  { %5731 = vmatmul.mubr.msk.f32.gmra.mrb[138].mxu0 %vm206_vm1, %v2263_v21  ;;  %v1152_v21 = vld [vmem:[%s11049_s8] sm:$0x3] }
 0x501   :  { %3073 = vmatprep.mubr.f32.mxu0 %v8283_v0  ;;  %v10318_v1 = vrot.slane %v1152_v21, %v11085_v51 }
 0x504   :  { %5840 = vmatmul.mubr.msk.f32.vlgmr.msra.gmra.mrb[112].mxu0 %vm206_vm1, %v2924_v17  ;;  %v7504_v17 = vpack.c.bf16 %v3426_v15, %v3425_v35 }
 0x505   :  { %3079 = vmatprep.mubr.f32.mxu0 %v8283_v0  ;;  %7496 = vmatpush1.bf16.msra.mxu0 %v7495_v29  ;;  %v10322_v29 = vrot.slane %v1152_v21, %v11086_v58 }
 0x506   :  { %7497 = vmatprep.subr.bf16.mxu0 %v8284_v20 }
 0x508   :  { %5841 = vmatmul.mubr.msk.f32.gmra.mrb[114].mxu0 %vm206_vm1, %v2925_v23  ;;  %v11074_v23 = vmax.f32 %v9943_v57, %v9983_v32  ;;  %v3431_v57 = vld [vmem:[#allocation4 + $0x60] sm:$0xff]  ;;  %v3432_v32 = vld [vmem:[#allocation4 + $0x68] sm:$0xff] }
 0x509   :  { %3085 = vmatprep.mubr.f32.mxu0 %v8283_v0  ;;  %7499 = vmatpush1.bf16.msra.mxu0 %v7498_v61  ;;  %v7513_v25 = vpack.c.bf16 %v3432_v32, %v3431_v57 }
 0x50a   :  { %7500 = vmatprep.subr.bf16.mxu0 %v8284_v20 }
 0x50c   :  { %5842 = vmatmul.mubr.msk.f32.gmra.mrb[116].mxu0 %vm206_vm1, %v2926_v31  ;;  %v11075_v31 = vmax.f32 %v9945_v8, %v9987_v39  ;;  %v3433_v8 = vld [vmem:[#allocation4 + $0x70] sm:$0xff]  ;;  %v3434_v39 = vld [vmem:[#allocation4 + $0x78] sm:$0xff] }
 0x50d   :  { %3091 = vmatprep.mubr.f32.mxu0 %v8283_v0  ;;  %7502 = vmatpush1.bf16.msra.mxu0 %v7501_v49  ;;  %v7516_v11 = vpack.c.bf16 %v3434_v39, %v3433_v8 }
 0x50e   :  { %7503 = vmatprep.subr.bf16.mxu0 %v8284_v20 }
 0x510   :  { %5843 = vmatmul.mubr.msk.f32.gmra.mrb[118].mxu0 %vm206_vm1, %v11074_v23 }
 0x511   :  { %3097 = vmatprep.mubr.f32.mxu0 %v8283_v0  ;;  %7505 = vmatpush1.bf16.msra.mxu0 %v7504_v17 }
 0x512   :  { %7506 = vmatprep.subr.bf16.mxu0 %v8284_v20 }
 0x514   :  { %5844 = vmatmul.mubr.msk.f32.gmra.mrb[120].mxu0 %vm206_vm1, %v11075_v31 }
 0x515   :  { %3103 = vmatprep.mubr.f32.mxu0 %v8283_v0  ;;  %7508 = vmatpush1.bf16.msra.mxu0 %v7507_v52 }
 0x516   :  { %7509 = vmatprep.subr.bf16.mxu0 %v8284_v20 }
 0x518   :  { %5845 = vmatmul.mubr.msk.f32.gmra.mrb[122].mxu0 %vm206_vm1, %v11076_v2 }
 0x519   :  { %3109 = vmatprep.mubr.f32.mxu0 %v8283_v0  ;;  %7511 = vmatpush1.bf16.msra.mxu0 %v7510_v26 }
 0x51a   :  { %7512 = vmatprep.subr.bf16.mxu0 %v8284_v20 }
 0x51c   :  { %5846 = vmatmul.mubr.msk.f32.gmra.mrb[124].mxu0 %vm206_vm1, %v11077_v3 }
 0x51d   :  { %3115 = vmatprep.mubr.f32.mxu0 %v8283_v0  ;;  %7514 = vmatpush1.bf16.msra.mxu0 %v7513_v25 }
 0x51e   :  { %7515 = vmatprep.subr.bf16.mxu0 %v8284_v20 }
 0x520   :  { %5847 = vmatmul.mubr.msk.f32.gmra.mrb[126].mxu0 %vm206_vm1, %v11078_v43 }
 0x521   :  { %3121 = vmatprep.mubr.f32.mxu0 %v8283_v0  ;;  %7517 = vmatpush1.bf16.msra.mxu0 %v7516_v11 }
 0x522   :  { %7518 = vmatprep.subr.bf16.mxu0 %v8284_v20 }
 0x524   :  { %5848 = vmatmul.mubr.msk.f32.gmra.mrb[128].mxu0 %vm206_vm1, %v11079_v5 }
 0x525   :  { %3127 = vmatprep.mubr.f32.mxu0 %v8283_v0  ;;  %7520 = vmatpush1.bf16.msra.mxu0 %v7519_v10 }
 0x526   :  { %7521 = vmatprep.subr.bf16.mxu0 %v8284_v20 }
 0x528   :  { %5849 = vmatmul.mubr.msk.f32.gmra.mrb[130].mxu0 %vm206_vm1, %v11080_v14 }
 0x529   :  { %3133 = vmatprep.mubr.f32.mxu0 %v8283_v0  ;;  %7523 = vmatpush1.bf16.msra.mxu0 %v7522_v27 }
 0x52a   :  { %7524 = vmatprep.subr.bf16.mxu0 %v8284_v20 }
 0x52c   :  { %5850 = vmatmul.mubr.msk.f32.gmra.mrb[132].mxu0 %vm206_vm1, %v11081_v6 }
 0x52d   :  { %3139 = vmatprep.mubr.f32.mxu0 %v8283_v0  ;;  %7526 = vmatpush1.bf16.msra.mxu0 %v7525_v37 }
 0x52e   :  { %7527 = vmatprep.subr.bf16.mxu0 %v8284_v20 }
 0x530   :  { %5851 = vmatmul.mubr.msk.f32.gmra.mrb[134].mxu0 %vm206_vm1, %v11082_v53 }
 0x531   :  { %3145 = vmatprep.mubr.f32.mxu0 %v8283_v0  ;;  %7529 = vmatpush1.bf16.msra.mxu0 %v7528_v33 }
 0x532   :  { %7530 = vmatprep.subr.bf16.mxu0 %v8284_v20 }
 0x534   :  { %5852 = vmatmul.mubr.msk.f32.gmra.mrb[136].mxu0 %vm206_vm1, %v11083_v56 }
 0x535   :  { %3151 = vmatprep.mubr.f32.mxu0 %v8283_v0  ;;  %7532 = vmatpush1.bf16.msra.mxu0 %v7531_v44 }
 0x536   :  { %7533 = vmatprep.subr.bf16.mxu0 %v8284_v20 }
 0x538   :  { %5853 = vmatmul.mubr.msk.f32.gmra.mrb[138].mxu0 %vm206_vm1, %v11084_v60 }
 0x539   :  { %7535 = vmatpush1.bf16.msra.mxu0 %v7534_v22 }
 0x53a   :  { %7578 = vmatprep.subr.bf16.mxu0 %v8284_v20 }
 0x5d7   :  { %v3075_v47 = vpop.f32.mrb[112].mxu0 }
 0x5d8   :  { %v8025_v28 = vadd.f32 %v3075_v47, %v10318_v1  ;;  %v3077_v61 = vpop.f32.mrb[113].mxu0 }
 0x5d9   :  { %v8026_v7 = vadd.f32 %v3077_v61, %v10322_v29 }
 0x5da   :  { %v3186_v35 = vmax.f32 %v8025_v28, 0.0 }
 0x5db   :  { %v3187_v40 = vmax.f32 %v8026_v7, 0.0  ;;  %v3081_v49 = vpop.f32.mrb[114].mxu0 }
 0x5dc   :  { %v8027_v15 = vadd.f32 %v3081_v49, %v10318_v1  ;;  %v3083_v17 = vpop.f32.mrb[115].mxu0 }
 0x5dd   :  { %v8028_v42 = vadd.f32 %v3083_v17, %v10322_v29  ;;  %5854 = vmatprep.mubr.msk.f32.mxu1 %vm1194_vm3, %v3187_v40  ;;  %5868 = vmatprep.mubr.msk.f32.mxu0 %vm1194_vm3, %v3187_v40 }
 0x5de   :  { %3349 = vmatmul.mubr.f32.vlgmr.msra.gmra.mrb[196].mxu1 %v3186_v35  ;;  %3512 = vmatmul.mubr.f32.vlgmr.msra.gmra.mrb[168].mxu0 %v3186_v35  ;;  %v3188_v23 = vmax.f32 %v8027_v15, 0.0 }
 0x5df   :  { %v3189_v63 = vmax.f32 %v8028_v42, 0.0  ;;  %v3087_v19 = vpop.f32.mrb[116].mxu0 }
 0x5e0   :  { %v8029_v52 = vadd.f32 %v3087_v19, %v10318_v1  ;;  %v3089_v18 = vpop.f32.mrb[117].mxu0 }
 0x5e1   :  { %v8030_v59 = vadd.f32 %v3089_v18, %v10322_v29  ;;  %5855 = vmatprep.mubr.msk.f32.mxu1 %vm1194_vm3, %v3189_v63  ;;  %5869 = vmatprep.mubr.msk.f32.mxu0 %vm1194_vm3, %v3189_v63 }
 0x5e2   :  { %3354 = vmatmul.mubr.f32.gmra.mrb[198].mxu1 %v3188_v23  ;;  %3517 = vmatmul.mubr.f32.gmra.mrb[170].mxu0 %v3188_v23  ;;  %v3190_v57 = vmax.f32 %v8029_v52, 0.0 }
 0x5e3   :  { %v3191_v31 = vmax.f32 %v8030_v59, 0.0  ;;  %v3093_v26 = vpop.f32.mrb[118].mxu0 }
 0x5e4   :  { %v8031_v32 = vadd.f32 %v3093_v26, %v10318_v1  ;;  %v3095_v2 = vpop.f32.mrb[119].mxu0 }
 0x5e5   :  { %v8032_v25 = vadd.f32 %v3095_v2, %v10322_v29  ;;  %5856 = vmatprep.mubr.msk.f32.mxu1 %vm1194_vm3, %v3191_v31  ;;  %5870 = vmatprep.mubr.msk.f32.mxu0 %vm1194_vm3, %v3191_v31 }
 0x5e6   :  { %3359 = vmatmul.mubr.f32.gmra.mrb[200].mxu1 %v3190_v57  ;;  %3522 = vmatmul.mubr.f32.gmra.mrb[172].mxu0 %v3190_v57  ;;  %v3192_v3 = vmax.f32 %v8031_v32, 0.0 }
 0x5e7   :  { %v3193_v8 = vmax.f32 %v8032_v25, 0.0  ;;  %v3099_v39 = vpop.f32.mrb[120].mxu0 }
 0x5e8   :  { %v8033_v11 = vadd.f32 %v3099_v39, %v10318_v1  ;;  %v3101_v48 = vpop.f32.mrb[121].mxu0 }
 0x5e9   :  { %v8034_v46 = vadd.f32 %v3101_v48, %v10322_v29  ;;  %5857 = vmatprep.mubr.msk.f32.mxu1 %vm1194_vm3, %v3193_v8  ;;  %5871 = vmatprep.mubr.msk.f32.mxu0 %vm1194_vm3, %v3193_v8 }
 0x5ea   :  { %3364 = vmatmul.mubr.f32.gmra.mrb[202].mxu1 %v3192_v3  ;;  %3527 = vmatmul.mubr.f32.gmra.mrb[174].mxu0 %v3192_v3  ;;  %v3194_v36 = vmax.f32 %v8033_v11, 0.0 }
 0x5eb   :  { %v3195_v43 = vmax.f32 %v8034_v46, 0.0  ;;  %v3105_v10 = vpop.f32.mrb[122].mxu0 }
 0x5ec   :  { %v8035_v30 = vadd.f32 %v3105_v10, %v10318_v1  ;;  %v3107_v5 = vpop.f32.mrb[123].mxu0 }
 0x5ed   :  { %v8036_v27 = vadd.f32 %v3107_v5, %v10322_v29  ;;  %5858 = vmatprep.mubr.msk.f32.mxu1 %vm1194_vm3, %v3195_v43  ;;  %5872 = vmatprep.mubr.msk.f32.mxu0 %vm1194_vm3, %v3195_v43 }
 0x5ee   :  { %3369 = vmatmul.mubr.f32.gmra.mrb[204].mxu1 %v3194_v36  ;;  %3532 = vmatmul.mubr.f32.gmra.mrb[176].mxu0 %v3194_v36  ;;  %v3196_v14 = vmax.f32 %v8035_v30, 0.0 }
 0x5ef   :  { %v3197_v41 = vmax.f32 %v8036_v27, 0.0  ;;  %v3111_v50 = vpop.f32.mrb[124].mxu0 }
 0x5f0   :  { %v8037_v37 = vadd.f32 %v3111_v50, %v10318_v1  ;;  %v3113_v45 = vpop.f32.mrb[125].mxu0 }
 0x5f1   :  { %v8038_v54 = vadd.f32 %v3113_v45, %v10322_v29  ;;  %5859 = vmatprep.mubr.msk.f32.mxu1 %vm1194_vm3, %v3197_v41  ;;  %5873 = vmatprep.mubr.msk.f32.mxu0 %vm1194_vm3, %v3197_v41 }
 0x5f2   :  { %3374 = vmatmul.mubr.f32.gmra.mrb[206].mxu1 %v3196_v14  ;;  %3537 = vmatmul.mubr.f32.gmra.mrb[178].mxu0 %v3196_v14  ;;  %v3198_v53 = vmax.f32 %v8037_v37, 0.0 }
 0x5f3   :  { %v3199_v6 = vmax.f32 %v8038_v54, 0.0  ;;  %v3117_v33 = vpop.f32.mrb[126].mxu0 }
 0x5f4   :  { %v8039_v56 = vadd.f32 %v3117_v33, %v10318_v1  ;;  %v3119_v60 = vpop.f32.mrb[127].mxu0 }
 0x5f5   :  { %v8040_v4 = vadd.f32 %v3119_v60, %v10322_v29  ;;  %5860 = vmatprep.mubr.msk.f32.mxu1 %vm1194_vm3, %v3199_v6  ;;  %5874 = vmatprep.mubr.msk.f32.mxu0 %vm1194_vm3, %v3199_v6 }
 0x5f6   :  { %3379 = vmatmul.mubr.f32.gmra.mrb[208].mxu1 %v3198_v53  ;;  %3542 = vmatmul.mubr.f32.gmra.mrb[180].mxu0 %v3198_v53  ;;  %v3200_v24 = vmax.f32 %v8039_v56, 0.0 }
 0x5f7   :  { %v3201_v13 = vmax.f32 %v8040_v4, 0.0  ;;  %v3123_v12 = vpop.f32.mrb[128].mxu0 }
 0x5f8   :  { %v8041_v38 = vadd.f32 %v3123_v12, %v10318_v1  ;;  %v3125_v44 = vpop.f32.mrb[129].mxu0 }
 0x5f9   :  { %v8042_v9 = vadd.f32 %v3125_v44, %v10322_v29  ;;  %5861 = vmatprep.mubr.msk.f32.mxu1 %vm1194_vm3, %v3201_v13  ;;  %5875 = vmatprep.mubr.msk.f32.mxu0 %vm1194_vm3, %v3201_v13 }
 0x5fa   :  { %3384 = vmatmul.mubr.f32.gmra.mrb[210].mxu1 %v3200_v24  ;;  %3547 = vmatmul.mubr.f32.gmra.mrb[182].mxu0 %v3200_v24  ;;  %v3202_v34 = vmax.f32 %v8041_v38, 0.0 }
 0x5fb   :  { %v3203_v55 = vmax.f32 %v8042_v9, 0.0  ;;  %v3129_v16 = vpop.f32.mrb[130].mxu0 }
 0x5fc   :  { %v8043_v62 = vadd.f32 %v3129_v16, %v10318_v1  ;;  %v3131_v22 = vpop.f32.mrb[131].mxu0 }
 0x5fd   :  { %v8044_v21 = vadd.f32 %v3131_v22, %v10322_v29  ;;  %5862 = vmatprep.mubr.msk.f32.mxu1 %vm1194_vm3, %v3203_v55  ;;  %5876 = vmatprep.mubr.msk.f32.mxu0 %vm1194_vm3, %v3203_v55 }
 0x5fe   :  { %3389 = vmatmul.mubr.f32.gmra.mrb[212].mxu1 %v3202_v34  ;;  %3552 = vmatmul.mubr.f32.gmra.mrb[184].mxu0 %v3202_v34  ;;  %v3204_v47 = vmax.f32 %v8043_v62, 0.0 }
 0x5ff   :  { %v3205_v51 = vmax.f32 %v8044_v21, 0.0  ;;  %v3135_v58 = vpop.f32.mrb[132].mxu0 }
 0x600   :  { %v8045_v28 = vadd.f32 %v3135_v58, %v10318_v1  ;;  %v3137_v61 = vpop.f32.mrb[133].mxu0 }
 0x601   :  { %v8046_v7 = vadd.f32 %v3137_v61, %v10322_v29  ;;  %5863 = vmatprep.mubr.msk.f32.mxu1 %vm1194_vm3, %v3205_v51  ;;  %5877 = vmatprep.mubr.msk.f32.mxu0 %vm1194_vm3, %v3205_v51 }
 0x602   :  { %3394 = vmatmul.mubr.f32.gmra.mrb[214].mxu1 %v3204_v47  ;;  %3557 = vmatmul.mubr.f32.gmra.mrb[186].mxu0 %v3204_v47  ;;  %v3206_v35 = vmax.f32 %v8045_v28, 0.0 }
 0x603   :  { %v3207_v40 = vmax.f32 %v8046_v7, 0.0  ;;  %v3141_v49 = vpop.f32.mrb[134].mxu0 }
 0x604   :  { %v8047_v15 = vadd.f32 %v3141_v49, %v10318_v1  ;;  %v3143_v17 = vpop.f32.mrb[135].mxu0 }
 0x605   :  { %v8048_v42 = vadd.f32 %v3143_v17, %v10322_v29  ;;  %5864 = vmatprep.mubr.msk.f32.mxu1 %vm1194_vm3, %v3207_v40  ;;  %5878 = vmatprep.mubr.msk.f32.mxu0 %vm1194_vm3, %v3207_v40 }
 0x606   :  { %3399 = vmatmul.mubr.f32.gmra.mrb[216].mxu1 %v3206_v35  ;;  %3562 = vmatmul.mubr.f32.gmra.mrb[188].mxu0 %v3206_v35  ;;  %v3208_v23 = vmax.f32 %v8047_v15, 0.0 }
 0x607   :  { %v3209_v63 = vmax.f32 %v8048_v42, 0.0  ;;  %v3147_v19 = vpop.f32.mrb[136].mxu0 }
 0x608   :  { %v8049_v52 = vadd.f32 %v3147_v19, %v10318_v1  ;;  %v3149_v18 = vpop.f32.mrb[137].mxu0 }
 0x609   :  { %v8050_v59 = vadd.f32 %v3149_v18, %v10322_v29  ;;  %5865 = vmatprep.mubr.msk.f32.mxu1 %vm1194_vm3, %v3209_v63  ;;  %5879 = vmatprep.mubr.msk.f32.mxu0 %vm1194_vm3, %v3209_v63 }
 0x60a   :  { %3404 = vmatmul.mubr.f32.gmra.mrb[218].mxu1 %v3208_v23  ;;  %3567 = vmatmul.mubr.f32.gmra.mrb[190].mxu0 %v3208_v23  ;;  %v3210_v57 = vmax.f32 %v8049_v52, 0.0 }
 0x60b   :  { %v3211_v31 = vmax.f32 %v8050_v59, 0.0  ;;  %v3153_v26 = vpop.f32.mrb[138].mxu0 }
 0x60c   :  { %v8051_v32 = vadd.f32 %v3153_v26, %v10318_v1  ;;  %v3155_v2 = vpop.f32.mrb[139].mxu0 }
 0x60d   :  { %v8052_v25 = vadd.f32 %v3155_v2, %v10322_v29  ;;  %5866 = vmatprep.mubr.msk.f32.mxu1 %vm1194_vm3, %v3211_v31  ;;  %5880 = vmatprep.mubr.msk.f32.mxu0 %vm1194_vm3, %v3211_v31 }
 0x60e   :  { %3409 = vmatmul.mubr.f32.gmra.mrb[220].mxu1 %v3210_v57  ;;  %3572 = vmatmul.mubr.f32.gmra.mrb[192].mxu0 %v3210_v57  ;;  %v3212_v39 = vmax.f32 %v8051_v32, 0.0 }
 0x60f   :  { %v3213_v8 = vmax.f32 %v8052_v25, 0.0 }
 0x611   :  { %5867 = vmatprep.mubr.msk.f32.mxu1 %vm1194_vm3, %v3213_v8  ;;  %5881 = vmatprep.mubr.msk.f32.mxu0 %vm1194_vm3, %v3213_v8 }
 0x612   :  { %3414 = vmatmul.mubr.f32.gmra.mrb[222].mxu1 %v3212_v39  ;;  %3577 = vmatmul.mubr.f32.gmra.mrb[194].mxu0 %v3212_v39 }
 0x613   :  { %6367 = vmatprep.mubr.msk.f32.mxu1 %vm8285_vm4, %v8283_v0  ;;  %6429 = vmatprep.mubr.msk.f32.mxu0 %vm8285_vm4, %v8283_v0 }
 0x6b1   :  { %v3350_v1 = vpop.f32.mrb[196].mxu1  ;;  %v3513_v29 = vpop.f32.mrb[168].mxu0 }
 0x6b2   :  { %v3582_v3 = vmax.f32 %v3350_v1, %v3513_v29  ;;  %v3352_v11 = vpop.f32.mrb[197].mxu1  ;;  %v3515_v48 = vpop.f32.mrb[169].mxu0 }
 0x6b5   :  { %v3355_v46 = vpop.f32.mrb[198].mxu1  ;;  %v3518_v43 = vpop.f32.mrb[170].mxu0 }
 0x6b6   :  { %v3583_v10 = vmax.f32 %v3355_v46, %v3518_v43  ;;  %v3357_v36 = vpop.f32.mrb[199].mxu1  ;;  %v3520_v30 = vpop.f32.mrb[171].mxu0 }
 0x6b8   :  { %v10384_v5 = vpack.c.bf16 %v3583_v10, %v3582_v3 }
 0x6b9   :  { %v3360_v27 = vpop.f32.mrb[200].mxu1  ;;  %v3523_v41 = vpop.f32.mrb[172].mxu0 }
 0x6ba   :  { %v3584_v50 = vmax.f32 %v3360_v27, %v3523_v41  ;;  %v3362_v14 = vpop.f32.mrb[201].mxu1  ;;  %v3525_v37 = vpop.f32.mrb[173].mxu0  ;;  %7538 = vmatpush3.bf16.msra.mxu1 %v10384_v5 }
 0x6bb   :  { %7539 = vmatprep.subr.bf16.mxu1 %v8284_v20 }
 0x6bd   :  { %v3365_v45 = vpop.f32.mrb[202].mxu1  ;;  %v3528_v54 = vpop.f32.mrb[174].mxu0 }
 0x6be   :  { %v3585_v6 = vmax.f32 %v3365_v45, %v3528_v54  ;;  %v3367_v33 = vpop.f32.mrb[203].mxu1  ;;  %v3530_v53 = vpop.f32.mrb[175].mxu0  ;;  %v3604_v45 = vld [vmem:[#allocation6] sm:$0xff]  ;;  %v3679_v54 = vld [vmem:[#allocation7] sm:$0xff] }
 0x6bf   :  { %v3754_v33 = vld [vmem:[%s11054_s13] sm:$0xff]  ;;  %v3755_v53 = vld [vmem:[%s11054_s13 + $0x8] sm:$0xff] }
 0x6c0   :  { %v10388_v56 = vpack.c.bf16 %v3585_v6, %v3584_v50  ;;  %v3843_v6 = vld [vmem:[#allocation6 + $0x8] sm:$0xff] }
 0x6c1   :  { %v3370_v60 = vpop.f32.mrb[204].mxu1  ;;  %v3533_v4 = vpop.f32.mrb[176].mxu0 }
 0x6c2   :  { %v3586_v13 = vmax.f32 %v3370_v60, %v3533_v4  ;;  %v3372_v12 = vpop.f32.mrb[205].mxu1  ;;  %v3535_v24 = vpop.f32.mrb[177].mxu0  ;;  %7541 = vmatpush3.bf16.msra.mxu1 %v10388_v56  ;;  %v7579_v60 = vpack.c.bf16 %v3755_v53, %v3754_v33  ;;  %v3756_v4 = vld [vmem:[%s11054_s13 + $0x10] sm:$0xff]  ;;  %v5901_v33 = vld [vmem:[%s11054_s13 + $0xd8] sm:$0xff] }
 0x6c3   :  { %7542 = vmatprep.subr.bf16.mxu1 %v8284_v20  ;;  %v3758_v24 = vld [vmem:[%s11054_s13 + $0x20] sm:$0xff] }
 0x6c4   :  { %7580 = vmatpush3.bf16.msra.mxu0 %v7579_v60 }
 0x6c5   :  { %v3375_v38 = vpop.f32.mrb[206].mxu1  ;;  %v3538_v44 = vpop.f32.mrb[178].mxu0  ;;  %7581 = vmatprep.subr.bf16.mxu0 %v8284_v20 }
 0x6c6   :  { %v3587_v9 = vmax.f32 %v3375_v38, %v3538_v44  ;;  %v3377_v55 = vpop.f32.mrb[207].mxu1  ;;  %v3540_v16 = vpop.f32.mrb[179].mxu0  ;;  %v3759_v38 = vld [vmem:[%s11054_s13 + $0x28] sm:$0xff] }
 0x6c7   :  { %v7585_v44 = vpack.c.bf16 %v3759_v38, %v3758_v24  ;;  %v3760_v55 = vld [vmem:[%s11054_s13 + $0x30] sm:$0xff]  ;;  %v3761_v16 = vld [vmem:[%s11054_s13 + $0x38] sm:$0xff] }
 0x6c8   :  { %v10392_v34 = vpack.c.bf16 %v3587_v9, %v3586_v13  ;;  %v3757_v13 = vld [vmem:[%s11054_s13 + $0x18] sm:$0xff] }
 0x6c9   :  { %v3380_v62 = vpop.f32.mrb[208].mxu1  ;;  %v3543_v22 = vpop.f32.mrb[180].mxu0  ;;  %v7582_v12 = vpack.c.bf16 %v3757_v13, %v3756_v4  ;;  %v4083_v9 = vld [vmem:[#allocation6 + $0x10] sm:$0xff] }
 0x6ca   :  { %v3588_v21 = vmax.f32 %v3380_v62, %v3543_v22  ;;  %v3382_v51 = vpop.f32.mrb[209].mxu1  ;;  %v3545_v58 = vpop.f32.mrb[181].mxu0  ;;  %7544 = vmatpush3.bf16.msra.mxu1 %v10392_v34  ;;  %v7588_v62 = vpack.c.bf16 %v3761_v16, %v3760_v55  ;;  %v3762_v22 = vld [vmem:[%s11054_s13 + $0x40] sm:$0xff]  ;;  %v5906_v55 = vld [vmem:[%s11054_s13 + $0xe8] sm:$0xff] }
 0x6cb   :  { %7545 = vmatprep.subr.bf16.mxu1 %v8284_v20  ;;  %7583 = vmatpush3.bf16.msra.mxu0 %v7582_v12  ;;  %v3764_v58 = vld [vmem:[%s11054_s13 + $0x50] sm:$0xff] }
 0x6cc   :  { %7584 = vmatprep.subr.bf16.mxu0 %v8284_v20 }
 0x6cd   :  { %v3385_v47 = vpop.f32.mrb[210].mxu1  ;;  %v3548_v28 = vpop.f32.mrb[182].mxu0 }
 0x6ce   :  { %v3589_v61 = vmax.f32 %v3385_v47, %v3548_v28  ;;  %v3387_v7 = vpop.f32.mrb[211].mxu1  ;;  %v3550_v40 = vpop.f32.mrb[183].mxu0  ;;  %v3765_v47 = vld [vmem:[%s11054_s13 + $0x58] sm:$0xff] }
 0x6cf   :  { %7586 = vmatpush3.bf16.msra.mxu0 %v7585_v44  ;;  %v7594_v28 = vpack.c.bf16 %v3765_v47, %v3764_v58  ;;  %v3767_v7 = vld [vmem:[%s11054_s13 + $0x68] sm:$0xff]  ;;  %v4158_v40 = vld [vmem:[#allocation7 + $0x10] sm:$0xff]  ;;  %v5908_v58 = vld [vmem:[%s11054_s13 + $0xf8] sm:$0xff] }
 0x6d0   :  { %v10396_v49 = vpack.c.bf16 %v3589_v61, %v3588_v21  ;;  %7587 = vmatprep.subr.bf16.mxu0 %v8284_v20  ;;  %v3763_v21 = vld [vmem:[%s11054_s13 + $0x48] sm:$0xff]  ;;  %v3766_v61 = vld [vmem:[%s11054_s13 + $0x60] sm:$0xff] }
 0x6d1   :  { %v3390_v35 = vpop.f32.mrb[212].mxu1  ;;  %v3553_v15 = vpop.f32.mrb[184].mxu0  ;;  %v7591_v51 = vpack.c.bf16 %v3763_v21, %v3762_v22 }
 0x6d2   :  { %v3590_v17 = vmax.f32 %v3390_v35, %v3553_v15  ;;  %v3392_v42 = vpop.f32.mrb[213].mxu1  ;;  %v3555_v63 = vpop.f32.mrb[185].mxu0  ;;  %7547 = vmatpush3.bf16.msra.mxu1 %v10396_v49  ;;  %v7597_v35 = vpack.c.bf16 %v3767_v7, %v3766_v61  ;;  %v4323_v15 = vld [vmem:[#allocation6 + $0x18] sm:$0xff]  ;;  %v5910_v61 = vld [vmem:[%s11054_s13 + $0x108] sm:$0xff] }
 0x6d3   :  { %7548 = vmatprep.subr.bf16.mxu1 %v8284_v20  ;;  %7589 = vmatpush3.bf16.msra.mxu0 %v7588_v62  ;;  %v4638_v42 = vld [vmem:[#allocation7 + $0x20] sm:$0xff] }
 0x6d4   :  { %7590 = vmatprep.subr.bf16.mxu0 %v8284_v20 }
 0x6d5   :  { %v3395_v19 = vpop.f32.mrb[214].mxu1  ;;  %v3558_v23 = vpop.f32.mrb[186].mxu0 }
 0x6d6   :  { %v3591_v52 = vmax.f32 %v3395_v19, %v3558_v23  ;;  %v3397_v18 = vpop.f32.mrb[215].mxu1  ;;  %v3560_v59 = vpop.f32.mrb[187].mxu0  ;;  %v4803_v23 = vld [vmem:[#allocation6 + $0x28] sm:$0xff] }
 0x6d7   :  { %7592 = vmatpush3.bf16.msra.mxu0 %v7591_v51  ;;  %v5907_v51 = vld [vmem:[%s11054_s13 + $0xf0] sm:$0xff] }
 0x6d8   :  { %v10400_v31 = vpack.c.bf16 %v3591_v52, %v3590_v17  ;;  %7593 = vmatprep.subr.bf16.mxu0 %v8284_v20  ;;  %v4563_v17 = vld [vmem:[#allocation6 + $0x20] sm:$0xff]  ;;  %v7708_v47 = vpack.c.bf16 %v5908_v58, %v5907_v51  ;;  %v5941_v51 = vld [vmem:[%s11054_s13 + $0x1d0] sm:$0xff]  ;;  %v5942_v58 = vld [vmem:[%s11054_s13 + $0x1d8] sm:$0xff] }
 0x6d9   :  { %v3400_v26 = vpop.f32.mrb[216].mxu1  ;;  %v3563_v57 = vpop.f32.mrb[188].mxu0 }
 0x6da   :  { %v3592_v32 = vmax.f32 %v3400_v26, %v3563_v57  ;;  %v3402_v2 = vpop.f32.mrb[217].mxu1  ;;  %v3565_v25 = vpop.f32.mrb[189].mxu0  ;;  %7550 = vmatpush3.bf16.msra.mxu1 %v10400_v31  ;;  %v5043_v26 = vld [vmem:[#allocation6 + $0x30] sm:$0xff]  ;;  %v5888_v57 = vld [vmem:[%s11054_s13 + $0x70] sm:$0xff] }
 0x6db   :  { %7551 = vmatprep.subr.bf16.mxu1 %v8284_v20  ;;  %7595 = vmatpush3.bf16.msra.mxu0 %v7594_v28  ;;  %v3918_v2 = vld [vmem:[#allocation7 + $0x8] sm:$0xff]  ;;  %v5909_v28 = vld [vmem:[%s11054_s13 + $0x100] sm:$0xff] }
 0x6dc   :  { %7596 = vmatprep.subr.bf16.mxu0 %v8284_v20  ;;  %v7711_v7 = vpack.c.bf16 %v5910_v61, %v5909_v28  ;;  %v5944_v28 = vld [vmem:[%s11054_s13 + $0x1e8] sm:$0xff] }
 0x6dd   :  { %v3405_v8 = vpop.f32.mrb[218].mxu1  ;;  %v3568_v39 = vpop.f32.mrb[190].mxu0 }
 0x6de   :  { %v3593_v1 = vmax.f32 %v3405_v8, %v3568_v39  ;;  %v3407_v29 = vpop.f32.mrb[219].mxu1  ;;  %v3570_v3 = vpop.f32.mrb[191].mxu0 }
 0x6df   :  { %7598 = vmatpush3.bf16.msra.mxu0 %v7597_v35  ;;  %v5891_v29 = vld [vmem:[%s11054_s13 + $0x88] sm:$0xff]  ;;  %v5912_v35 = vld [vmem:[%s11054_s13 + $0x118] sm:$0xff] }
 0x6e0   :  { %v10404_v11 = vpack.c.bf16 %v3593_v1, %v3592_v32  ;;  %7620 = vmatprep.subr.bf16.mxu0 %v8284_v20  ;;  %v5889_v32 = vld [vmem:[%s11054_s13 + $0x78] sm:$0xff]  ;;  %v5890_v1 = vld [vmem:[%s11054_s13 + $0x80] sm:$0xff] }
 0x6e1   :  { %v3410_v48 = vpop.f32.mrb[220].mxu1  ;;  %v3573_v46 = vpop.f32.mrb[192].mxu0  ;;  %v7642_v25 = vpack.c.bf16 %v5889_v32, %v5888_v57  ;;  %v7645_v3 = vpack.c.bf16 %v5891_v29, %v5890_v1  ;;  %v5922_v57 = vld [vmem:[%s11054_s13 + $0x150] sm:$0xff]  ;;  %v5923_v32 = vld [vmem:[%s11054_s13 + $0x158] sm:$0xff] }
 0x6e2   :  { %v3594_v43 = vmax.f32 %v3410_v48, %v3573_v46  ;;  %v3412_v10 = vpop.f32.mrb[221].mxu1  ;;  %v3575_v36 = vpop.f32.mrb[193].mxu0  ;;  %7553 = vmatpush3.bf16.msra.mxu1 %v10404_v11  ;;  %v5892_v48 = vld [vmem:[%s11054_s13 + $0x90] sm:$0xff]  ;;  %v5893_v46 = vld [vmem:[%s11054_s13 + $0x98] sm:$0xff] }
 0x6e3   :  { %7554 = vmatprep.subr.bf16.mxu1 %v8284_v20  ;;  %v5894_v10 = vld [vmem:[%s11054_s13 + $0xa0] sm:$0xff]  ;;  %v5895_v36 = vld [vmem:[%s11054_s13 + $0xa8] sm:$0xff]  ;;  %v5926_v29 = vld [vmem:[%s11054_s13 + $0x170] sm:$0xff] }
 0x6e5   :  { %v3415_v30 = vpop.f32.mrb[222].mxu1  ;;  %v3578_v27 = vpop.f32.mrb[194].mxu0 }
 0x6e6   :  { %v3595_v41 = vmax.f32 %v3415_v30, %v3578_v27  ;;  %v3417_v50 = vpop.f32.mrb[223].mxu1  ;;  %v3580_v14 = vpop.f32.mrb[195].mxu0  ;;  %v7651_v30 = vpack.c.bf16 %v5895_v36, %v5894_v10  ;;  %v5896_v27 = vld [vmem:[%s11054_s13 + $0xb0] sm:$0xff] }
 0x6e7   :  { %v5898_v14 = vld [vmem:[%s11054_s13 + $0xc0] sm:$0xff]  ;;  %v5930_v36 = vld [vmem:[%s11054_s13 + $0x190] sm:$0xff] }
 0x6e8   :  { %v10408_v37 = vpack.c.bf16 %v3595_v41, %v3594_v43  ;;  %v7648_v43 = vpack.c.bf16 %v5893_v46, %v5892_v48  ;;  %v5897_v41 = vld [vmem:[%s11054_s13 + $0xb8] sm:$0xff]  ;;  %v5928_v46 = vld [vmem:[%s11054_s13 + $0x180] sm:$0xff] }
 0x6e9   :  { %v7654_v50 = vpack.c.bf16 %v5897_v41, %v5896_v27  ;;  %v5932_v41 = vld [vmem:[%s11054_s13 + $0x1a0] sm:$0xff] }
 0x6ea   :  { %7556 = vmatpush3.bf16.msra.mxu1 %v10408_v37 }
 0x6eb   :  { %7557 = vmatprep.subr.bf16.mxu1 %v8284_v20 }
 0x6ed   :  { %6368 = vmatmul.mubr.msk.f32.vlgmr.msra.gmra.mrb[224].mxu1 %vm3605_vm5, %v3604_v45  ;;  %v5899_v45 = vld [vmem:[%s11054_s13 + $0xc8] sm:$0xff] }
 0x6ee   :  { %7559 = vmatpush3.bf16.msra.mxu1 %v10384_v5  ;;  %6398 = vmatprep.mubr.msk.f32.mxu1 %vm8285_vm4, %v8283_v0 }
 0x6ef   :  { %7560 = vmatprep.subr.bf16.mxu1 %v8284_v20 }
 0x6f2   :  { %7562 = vmatpush3.bf16.msra.mxu1 %v10388_v56 }
 0x6f3   :  { %7563 = vmatprep.subr.bf16.mxu1 %v8284_v20 }
 0x6f6   :  { %7565 = vmatpush3.bf16.msra.mxu1 %v10392_v34 }
 0x6f7   :  { %7566 = vmatprep.subr.bf16.mxu1 %v8284_v20 }
 0x6fa   :  { %7568 = vmatpush3.bf16.msra.mxu1 %v10396_v49 }
 0x6fb   :  { %7569 = vmatprep.subr.bf16.mxu1 %v8284_v20 }
 0x6fe   :  { %7571 = vmatpush3.bf16.msra.mxu1 %v10400_v31 }
 0x6ff   :  { %7572 = vmatprep.subr.bf16.mxu1 %v8284_v20 }
 0x702   :  { %7574 = vmatpush3.bf16.msra.mxu1 %v10404_v11 }
 0x703   :  { %7575 = vmatprep.subr.bf16.mxu1 %v8284_v20 }
 0x706   :  { %7577 = vmatpush3.bf16.msra.mxu1 %v10408_v37 }
 0x707   :  { %7599 = vmatprep.subr.bf16.mxu1 %v8284_v20 }
 0x709   :  { %6399 = vmatmul.mubr.msk.f32.vlgmr.msra.gmra.mrb[226].mxu1 %vm3605_vm5, %v3679_v54  ;;  %v7657_v54 = vpack.c.bf16 %v5899_v45, %v5898_v14  ;;  %v5934_v45 = vld [vmem:[%s11054_s13 + $0x1b0] sm:$0xff] }
 0x70a   :  { %7601 = vmatpush3.bf16.msra.mxu1 %v10384_v5  ;;  %6460 = vmatprep.mubr.msk.f32.mxu1 %vm8285_vm4, %v8283_v0 }
 0x70b   :  { %7602 = vmatprep.subr.bf16.mxu1 %v8284_v20 }
 0x70e   :  { %7604 = vmatpush3.bf16.msra.mxu1 %v10388_v56 }
 0x70f   :  { %7605 = vmatprep.subr.bf16.mxu1 %v8284_v20 }
 0x712   :  { %7607 = vmatpush3.bf16.msra.mxu1 %v10392_v34 }
 0x713   :  { %7608 = vmatprep.subr.bf16.mxu1 %v8284_v20 }
 0x716   :  { %7610 = vmatpush3.bf16.msra.mxu1 %v10396_v49 }
 0x717   :  { %7611 = vmatprep.subr.bf16.mxu1 %v8284_v20 }
 0x71a   :  { %7613 = vmatpush3.bf16.msra.mxu1 %v10400_v31 }
 0x71b   :  { %7614 = vmatprep.subr.bf16.mxu1 %v8284_v20 }
 0x71e   :  { %7616 = vmatpush3.bf16.msra.mxu1 %v10404_v11 }
 0x71f   :  { %7617 = vmatprep.subr.bf16.mxu1 %v8284_v20 }
 0x722   :  { %7619 = vmatpush3.bf16.msra.mxu1 %v10408_v37 }
 0x723   :  { %7662 = vmatprep.subr.bf16.mxu1 %v8284_v20 }
 0x725   :  { %6461 = vmatmul.mubr.msk.f32.vlgmr.msra.gmra.mrb[228].mxu1 %vm3605_vm5, %v3843_v6  ;;  %v5900_v6 = vld [vmem:[%s11054_s13 + $0xd0] sm:$0xff] }
 0x726   :  { %7664 = vmatpush3.bf16.msra.mxu1 %v10384_v5  ;;  %6553 = vmatprep.mubr.msk.f32.mxu1 %vm8285_vm4, %v8283_v0  ;;  %v7660_v53 = vpack.c.bf16 %v5901_v33, %v5900_v6 }
 0x727   :  { %7665 = vmatprep.subr.bf16.mxu1 %v8284_v20 }
 0x72a   :  { %7667 = vmatpush3.bf16.msra.mxu1 %v10388_v56 }
 0x72b   :  { %7668 = vmatprep.subr.bf16.mxu1 %v8284_v20 }
 0x72e   :  { %7670 = vmatpush3.bf16.msra.mxu1 %v10392_v34 }
 0x72f   :  { %7671 = vmatprep.subr.bf16.mxu1 %v8284_v20 }
 0x732   :  { %7673 = vmatpush3.bf16.msra.mxu1 %v10396_v49 }
 0x733   :  { %7674 = vmatprep.subr.bf16.mxu1 %v8284_v20 }
 0x736   :  { %7676 = vmatpush3.bf16.msra.mxu1 %v10400_v31 }
 0x737   :  { %7677 = vmatprep.subr.bf16.mxu1 %v8284_v20 }
 0x73a   :  { %7679 = vmatpush3.bf16.msra.mxu1 %v10404_v11 }
 0x73b   :  { %7680 = vmatprep.subr.bf16.mxu1 %v8284_v20 }
 0x73e   :  { %7682 = vmatpush3.bf16.msra.mxu1 %v10408_v37 }
 0x73f   :  { %7683 = vmatprep.subr.bf16.mxu1 %v8284_v20 }
 0x741   :  { %6554 = vmatmul.mubr.msk.f32.vlgmr.msra.gmra.mrb[230].mxu1 %vm3605_vm5, %v4083_v9  ;;  %v5905_v9 = vld [vmem:[%s11054_s13 + $0xe0] sm:$0xff] }
 0x742   :  { %7685 = vmatpush3.bf16.msra.mxu1 %v10384_v5  ;;  %6584 = vmatprep.mubr.msk.f32.mxu1 %vm8285_vm4, %v8283_v0  ;;  %v7705_v62 = vpack.c.bf16 %v5906_v55, %v5905_v9  ;;  %v5939_v9 = vld [vmem:[%s11054_s13 + $0x1c0] sm:$0xff]  ;;  %v5940_v55 = vld [vmem:[%s11054_s13 + $0x1c8] sm:$0xff] }
 0x743   :  { %7686 = vmatprep.subr.bf16.mxu1 %v8284_v20 }
 0x746   :  { %7688 = vmatpush3.bf16.msra.mxu1 %v10388_v56 }
 0x747   :  { %7689 = vmatprep.subr.bf16.mxu1 %v8284_v20 }
 0x74a   :  { %7691 = vmatpush3.bf16.msra.mxu1 %v10392_v34 }
 0x74b   :  { %7692 = vmatprep.subr.bf16.mxu1 %v8284_v20 }
 0x74e   :  { %7694 = vmatpush3.bf16.msra.mxu1 %v10396_v49 }
 0x74f   :  { %7695 = vmatprep.subr.bf16.mxu1 %v8284_v20 }
 0x752   :  { %7697 = vmatpush3.bf16.msra.mxu1 %v10400_v31 }
 0x753   :  { %7698 = vmatprep.subr.bf16.mxu1 %v8284_v20 }
 0x756   :  { %7700 = vmatpush3.bf16.msra.mxu1 %v10404_v11 }
 0x757   :  { %7701 = vmatprep.subr.bf16.mxu1 %v8284_v20 }
 0x75a   :  { %7703 = vmatpush3.bf16.msra.mxu1 %v10408_v37 }
 0x75b   :  { %7725 = vmatprep.subr.bf16.mxu1 %v8284_v20 }
 0x75d   :  { %6585 = vmatmul.mubr.msk.f32.vlgmr.msra.gmra.mrb[232].mxu1 %vm3605_vm5, %v4158_v40  ;;  %v5911_v40 = vld [vmem:[%s11054_s13 + $0x110] sm:$0xff] }
 0x75e   :  { %7727 = vmatpush3.bf16.msra.mxu1 %v10384_v5  ;;  %6646 = vmatprep.mubr.msk.f32.mxu1 %vm8285_vm4, %v8283_v0 }
 0x75f   :  { %7728 = vmatprep.subr.bf16.mxu1 %v8284_v20 }
 0x762   :  { %7730 = vmatpush3.bf16.msra.mxu1 %v10388_v56 }
 0x763   :  { %7731 = vmatprep.subr.bf16.mxu1 %v8284_v20 }
 0x766   :  { %7733 = vmatpush3.bf16.msra.mxu1 %v10392_v34 }
 0x767   :  { %7734 = vmatprep.subr.bf16.mxu1 %v8284_v20 }
 0x76a   :  { %7736 = vmatpush3.bf16.msra.mxu1 %v10396_v49 }
 0x76b   :  { %7737 = vmatprep.subr.bf16.mxu1 %v8284_v20 }
 0x76e   :  { %7739 = vmatpush3.bf16.msra.mxu1 %v10400_v31 }
 0x76f   :  { %7740 = vmatprep.subr.bf16.mxu1 %v8284_v20 }
 0x772   :  { %7742 = vmatpush3.bf16.msra.mxu1 %v10404_v11 }
 0x773   :  { %7743 = vmatprep.subr.bf16.mxu1 %v8284_v20 }
 0x776   :  { %7745 = vmatpush3.bf16.msra.mxu1 %v10408_v37 }
 0x777   :  { %7788 = vmatprep.subr.bf16.mxu1 %v8284_v20 }
 0x779   :  { %6647 = vmatmul.mubr.msk.f32.vlgmr.msra.gmra.mrb[234].mxu1 %vm3605_vm5, %v4323_v15  ;;  %v7714_v15 = vpack.c.bf16 %v5912_v35, %v5911_v40  ;;  %v5946_v40 = vld [vmem:[%s11054_s13 + $0x1f8] sm:$0xff] }
 0x77a   :  { %7790 = vmatpush3.bf16.msra.mxu1 %v10384_v5  ;;  %6739 = vmatprep.mubr.msk.f32.mxu1 %vm8285_vm4, %v8283_v0 }
 0x77b   :  { %7791 = vmatprep.subr.bf16.mxu1 %v8284_v20 }
 0x77e   :  { %7793 = vmatpush3.bf16.msra.mxu1 %v10388_v56 }
 0x77f   :  { %7794 = vmatprep.subr.bf16.mxu1 %v8284_v20 }
 0x782   :  { %7796 = vmatpush3.bf16.msra.mxu1 %v10392_v34 }
 0x783   :  { %7797 = vmatprep.subr.bf16.mxu1 %v8284_v20 }
 0x786   :  { %7799 = vmatpush3.bf16.msra.mxu1 %v10396_v49 }
 0x787   :  { %7800 = vmatprep.subr.bf16.mxu1 %v8284_v20 }
 0x78a   :  { %7802 = vmatpush3.bf16.msra.mxu1 %v10400_v31 }
 0x78b   :  { %7803 = vmatprep.subr.bf16.mxu1 %v8284_v20 }
 0x78e   :  { %7805 = vmatpush3.bf16.msra.mxu1 %v10404_v11 }
 0x78f   :  { %7806 = vmatprep.subr.bf16.mxu1 %v8284_v20 }
 0x792   :  { %7808 = vmatpush3.bf16.msra.mxu1 %v10408_v37 }
 0x793   :  { %7809 = vmatprep.subr.bf16.mxu1 %v8284_v20 }
 0x795   :  { %6740 = vmatmul.mubr.msk.f32.vlgmr.msra.gmra.mrb[236].mxu1 %vm3605_vm5, %v4563_v17  ;;  %v5913_v17 = vld [vmem:[%s11054_s13 + $0x120] sm:$0xff] }
 0x796   :  { %7811 = vmatpush3.bf16.msra.mxu1 %v10384_v5  ;;  %6770 = vmatprep.mubr.msk.f32.mxu1 %vm8285_vm4, %v8283_v0 }
 0x797   :  { %7812 = vmatprep.subr.bf16.mxu1 %v8284_v20 }
 0x79a   :  { %7814 = vmatpush3.bf16.msra.mxu1 %v10388_v56 }
 0x79b   :  { %7815 = vmatprep.subr.bf16.mxu1 %v8284_v20 }
 0x79e   :  { %7817 = vmatpush3.bf16.msra.mxu1 %v10392_v34 }
 0x79f   :  { %7818 = vmatprep.subr.bf16.mxu1 %v8284_v20 }
 0x7a2   :  { %7820 = vmatpush3.bf16.msra.mxu1 %v10396_v49 }
 0x7a3   :  { %7821 = vmatprep.subr.bf16.mxu1 %v8284_v20 }
 0x7a6   :  { %7823 = vmatpush3.bf16.msra.mxu1 %v10400_v31 }
 0x7a7   :  { %7824 = vmatprep.subr.bf16.mxu1 %v8284_v20 }
 0x7aa   :  { %7826 = vmatpush3.bf16.msra.mxu1 %v10404_v11 }
 0x7ab   :  { %7827 = vmatprep.subr.bf16.mxu1 %v8284_v20 }
 0x7ae   :  { %7829 = vmatpush3.bf16.msra.mxu1 %v10408_v37 }
 0x7af   :  { %7851 = vmatprep.subr.bf16.mxu1 %v8284_v20 }
 0x7b1   :  { %6771 = vmatmul.mubr.msk.f32.vlgmr.msra.gmra.mrb[238].mxu1 %vm3605_vm5, %v4638_v42  ;;  %v5914_v42 = vld [vmem:[%s11054_s13 + $0x128] sm:$0xff] }
 0x7b2   :  { %7853 = vmatpush3.bf16.msra.mxu1 %v10384_v5  ;;  %6832 = vmatprep.mubr.msk.f32.mxu1 %vm8285_vm4, %v8283_v0 }
 0x7b3   :  { %7854 = vmatprep.subr.bf16.mxu1 %v8284_v20 }
 0x7b6   :  { %7856 = vmatpush3.bf16.msra.mxu1 %v10388_v56 }
 0x7b7   :  { %7857 = vmatprep.subr.bf16.mxu1 %v8284_v20 }
 0x7ba   :  { %7859 = vmatpush3.bf16.msra.mxu1 %v10392_v34 }
 0x7bb   :  { %7860 = vmatprep.subr.bf16.mxu1 %v8284_v20 }
 0x7be   :  { %7862 = vmatpush3.bf16.msra.mxu1 %v10396_v49 }
 0x7bf   :  { %7863 = vmatprep.subr.bf16.mxu1 %v8284_v20 }
 0x7c0   :  { %v3675_v63 = vpop.f32.mrb[224].mxu1 }
 0x7c1   :  { %v6369_v19 = vpop.f32.mrb[225].mxu1 }
 0x7c2   :  { %7865 = vmatpush3.bf16.msra.mxu1 %v10400_v31  ;;  %v5915_v19 = vld [vmem:[%s11054_s13 + $0x130] sm:$0xff] }
 0x7c3   :  { %7866 = vmatprep.subr.bf16.mxu1 %v8284_v20 }
 0x7c6   :  { %7868 = vmatpush3.bf16.msra.mxu1 %v10404_v11 }
 0x7c7   :  { %7869 = vmatprep.subr.bf16.mxu1 %v8284_v20 }
 0x7ca   :  { %7871 = vmatpush3.bf16.msra.mxu1 %v10408_v37 }
 0x7cb   :  { %7914 = vmatprep.subr.bf16.mxu1 %v8284_v20 }
 0x7cd   :  { %6833 = vmatmul.mubr.msk.f32.vlgmr.msra.gmra.mrb[240].mxu1 %vm3605_vm5, %v4803_v23  ;;  %v5916_v23 = vld [vmem:[%s11054_s13 + $0x138] sm:$0xff] }
 0x7ce   :  { %7916 = vmatpush3.bf16.msra.mxu1 %v10384_v5  ;;  %6925 = vmatprep.mubr.msk.f32.mxu1 %vm8285_vm4, %v8283_v0 }
 0x7cf   :  { %7917 = vmatprep.subr.bf16.mxu1 %v8284_v20 }
 0x7d2   :  { %7919 = vmatpush3.bf16.msra.mxu1 %v10388_v56 }
 0x7d3   :  { %7920 = vmatprep.subr.bf16.mxu1 %v8284_v20 }
 0x7d6   :  { %7922 = vmatpush3.bf16.msra.mxu1 %v10392_v34 }
 0x7d7   :  { %7923 = vmatprep.subr.bf16.mxu1 %v8284_v20 }
 0x7da   :  { %7925 = vmatpush3.bf16.msra.mxu1 %v10396_v49 }
 0x7db   :  { %7926 = vmatprep.subr.bf16.mxu1 %v8284_v20 }
 0x7dc   :  { %v3749_v52 = vpop.f32.mrb[226].mxu1 }
 0x7dd   :  { %v3753_v18 = vmax.f32 %v3675_v63, %v3749_v52  ;;  %v6400_v59 = vpop.f32.mrb[227].mxu1  ;;  %v7717_v63 = vpack.c.bf16 %v5914_v42, %v5913_v17  ;;  %v7720_v52 = vpack.c.bf16 %v5916_v23, %v5915_v19  ;;  %v5948_v17 = vld [vmem:[%s11054_s13 + $0x208] sm:$0xff]  ;;  %v5950_v19 = vld [vmem:[%s11054_s13 + $0x218] sm:$0xff] }
 0x7de   :  { %7928 = vmatpush3.bf16.msra.mxu1 %v10400_v31  ;;  %v5918_v59 = vld [vmem:[%s11054_s13 + $0x148] sm:$0xff] }
 0x7df   :  { %6430 = vmatmul.mubr.msk.f32.vlgmr.msra.gmra.mrb[196].mxu0 %vm3605_vm5, %v3753_v18  ;;  %7929 = vmatprep.subr.bf16.mxu1 %v8284_v20  ;;  %v5917_v18 = vld [vmem:[%s11054_s13 + $0x140] sm:$0xff] }
 0x7e0   :  { %7622 = vmatpush3.bf16.msra.mxu0 %v10384_v5  ;;  %6491 = vmatprep.mubr.msk.f32.mxu0 %vm8285_vm4, %v8283_v0 }
 0x7e1   :  { %7623 = vmatprep.subr.bf16.mxu0 %v8284_v20 }
 0x7e2   :  { %7931 = vmatpush3.bf16.msra.mxu1 %v10404_v11 }
 0x7e3   :  { %7932 = vmatprep.subr.bf16.mxu1 %v8284_v20 }
 0x7e4   :  { %7625 = vmatpush3.bf16.msra.mxu0 %v10388_v56 }
 0x7e5   :  { %7626 = vmatprep.subr.bf16.mxu0 %v8284_v20 }
 0x7e6   :  { %7934 = vmatpush3.bf16.msra.mxu1 %v10408_v37 }
 0x7e7   :  { %7935 = vmatprep.subr.bf16.mxu1 %v8284_v20 }
 0x7e8   :  { %7628 = vmatpush3.bf16.msra.mxu0 %v10392_v34 }
 0x7e9   :  { %7629 = vmatprep.subr.bf16.mxu0 %v8284_v20  ;;  %6926 = vmatmul.mubr.msk.f32.vlgmr.msra.gmra.mrb[242].mxu1 %vm3605_vm5, %v5043_v26  ;;  %v7723_v26 = vpack.c.bf16 %v5918_v59, %v5917_v18  ;;  %v5952_v18 = vld [vmem:[%s11054_s13 + $0x228] sm:$0xff] }
 0x7ea   :  { %7937 = vmatpush3.bf16.msra.mxu1 %v10384_v5  ;;  %6956 = vmatprep.mubr.msk.f32.mxu1 %vm8285_vm4, %v8283_v0 }
 0x7eb   :  { %7938 = vmatprep.subr.bf16.mxu1 %v8284_v20 }
 0x7ec   :  { %7631 = vmatpush3.bf16.msra.mxu0 %v10396_v49 }
 0x7ed   :  { %7632 = vmatprep.subr.bf16.mxu0 %v8284_v20 }
 0x7ee   :  { %7940 = vmatpush3.bf16.msra.mxu1 %v10388_v56 }
 0x7ef   :  { %7941 = vmatprep.subr.bf16.mxu1 %v8284_v20 }
 0x7f0   :  { %7634 = vmatpush3.bf16.msra.mxu0 %v10400_v31 }
 0x7f1   :  { %7635 = vmatprep.subr.bf16.mxu0 %v8284_v20 }
 0x7f2   :  { %7943 = vmatpush3.bf16.msra.mxu1 %v10392_v34 }
 0x7f3   :  { %7944 = vmatprep.subr.bf16.mxu1 %v8284_v20 }
 0x7f4   :  { %7637 = vmatpush3.bf16.msra.mxu0 %v10404_v11 }
 0x7f5   :  { %7638 = vmatprep.subr.bf16.mxu0 %v8284_v20 }
 0x7f6   :  { %7946 = vmatpush3.bf16.msra.mxu1 %v10396_v49 }
 0x7f7   :  { %7947 = vmatprep.subr.bf16.mxu1 %v8284_v20 }
 0x7f8   :  { %7640 = vmatpush3.bf16.msra.mxu0 %v10408_v37  ;;  %v3913_v8 = vpop.f32.mrb[228].mxu1 }
 0x7f9   :  { %7641 = vmatprep.subr.bf16.mxu0 %v8284_v20  ;;  %v6462_v39 = vpop.f32.mrb[229].mxu1 }
 0x7fa   :  { %7949 = vmatpush3.bf16.msra.mxu1 %v10400_v31  ;;  %v5925_v39 = vld [vmem:[%s11054_s13 + $0x168] sm:$0xff] }
 0x7fb   :  { %6492 = vmatmul.mubr.msk.f32.vlgmr.msra.gmra.mrb[198].mxu0 %vm3605_vm5, %v3918_v2  ;;  %7950 = vmatprep.subr.bf16.mxu1 %v8284_v20  ;;  %v4398_v2 = vld [vmem:[#allocation7 + $0x18] sm:$0xff] }
 0x7fc   :  { %7643 = vmatpush3.bf16.msra.mxu0 %v7642_v25  ;;  %6522 = vmatprep.mubr.msk.f32.mxu0 %vm8285_vm4, %v8283_v0  ;;  %v7768_v25 = vpack.c.bf16 %v5923_v32, %v5922_v57  ;;  %v5961_v57 = vld [vmem:[%s11054_s13 + $0x258] sm:$0xff] }
 0x7fd   :  { %7644 = vmatprep.subr.bf16.mxu0 %v8284_v20 }
 0x7fe   :  { %7952 = vmatpush3.bf16.msra.mxu1 %v10404_v11 }
 0x7ff   :  { %7953 = vmatprep.subr.bf16.mxu1 %v8284_v20 }
 0x800   :  { %7646 = vmatpush3.bf16.msra.mxu0 %v7645_v3  ;;  %v5927_v3 = vld [vmem:[%s11054_s13 + $0x178] sm:$0xff] }
 0x801   :  { %7647 = vmatprep.subr.bf16.mxu0 %v8284_v20  ;;  %v7774_v48 = vpack.c.bf16 %v5927_v3, %v5926_v29  ;;  %v5966_v3 = vld [vmem:[%s11054_s13 + $0x280] sm:$0xff] }
 0x802   :  { %7955 = vmatpush3.bf16.msra.mxu1 %v10408_v37 }
 0x803   :  { %7977 = vmatprep.subr.bf16.mxu1 %v8284_v20 }
 0x804   :  { %7649 = vmatpush3.bf16.msra.mxu0 %v7648_v43  ;;  %v5929_v43 = vld [vmem:[%s11054_s13 + $0x188] sm:$0xff] }
 0x805   :  { %7650 = vmatprep.subr.bf16.mxu0 %v8284_v20  ;;  %v7777_v10 = vpack.c.bf16 %v5929_v43, %v5928_v46  ;;  %v5968_v43 = vld [vmem:[%s11054_s13 + $0x290] sm:$0xff] }
 0x808   :  { %7652 = vmatpush3.bf16.msra.mxu0 %v7651_v30  ;;  %v5931_v30 = vld [vmem:[%s11054_s13 + $0x198] sm:$0xff] }
 0x809   :  { %7653 = vmatprep.subr.bf16.mxu0 %v8284_v20  ;;  %v7780_v27 = vpack.c.bf16 %v5931_v30, %v5930_v36 }
 0x80c   :  { %7655 = vmatpush3.bf16.msra.mxu0 %v7654_v50  ;;  %v5933_v50 = vld [vmem:[%s11054_s13 + $0x1a8] sm:$0xff] }
 0x80d   :  { %7656 = vmatprep.subr.bf16.mxu0 %v8284_v20  ;;  %v7783_v14 = vpack.c.bf16 %v5933_v50, %v5932_v41 }
 0x810   :  { %7658 = vmatpush3.bf16.msra.mxu0 %v7657_v54  ;;  %v5935_v54 = vld [vmem:[%s11054_s13 + $0x1b8] sm:$0xff] }
 0x811   :  { %7659 = vmatprep.subr.bf16.mxu0 %v8284_v20  ;;  %v7786_v6 = vpack.c.bf16 %v5935_v54, %v5934_v45  ;;  %v5283_v45 = vld [vmem:[#allocation9] sm:$0xff]  ;;  %v5284_v54 = vld [vmem:[#allocation9 + $0x8] sm:$0xff] }
 0x814   :  { %7661 = vmatpush3.bf16.msra.mxu0 %v7660_v53  ;;  %v4153_v60 = vpop.f32.mrb[230].mxu1 }
 0x815   :  { %7704 = vmatprep.subr.bf16.mxu0 %v8284_v20  ;;  %v6555_v4 = vpop.f32.mrb[231].mxu1 }
 0x830   :  { %v4228_v13 = vpop.f32.mrb[232].mxu1 }
 0x831   :  { %v4232_v12 = vmax.f32 %v4153_v60, %v4228_v13  ;;  %v6586_v24 = vpop.f32.mrb[233].mxu1 }
 0x84c   :  { %v10700_v38 = vpop.f32.mrb[234].mxu1 }
 0x84d   :  { %v6648_v44 = vpop.f32.mrb[235].mxu1 }
 0x868   :  { %v4633_v33 = vpop.f32.mrb[236].mxu1 }
 0x869   :  { %v6741_v53 = vpop.f32.mrb[237].mxu1 }
 0x86a   :  { %v5286_v53 = vld [vmem:[#allocation9 + $0x18] sm:$0xff] }
 0x884   :  { %v4708_v60 = vpop.f32.mrb[238].mxu1 }
 0x885   :  { %v4712_v4 = vmax.f32 %v4633_v33, %v4708_v60  ;;  %v6772_v13 = vpop.f32.mrb[239].mxu1  ;;  %v7978_v33 = vpack.c.bf16 %v5284_v54, %v5283_v45  ;;  %v5387_v45 = vld [vmem:[#allocation10 + $0x50] sm:$0xff]  ;;  %v5388_v54 = vld [vmem:[#allocation10 + $0x58] sm:$0xff] }
 0x886   :  { %v5288_v13 = vld [vmem:[#allocation9 + $0x28] sm:$0xff] }
 0x8a0   :  { %v10824_v24 = vpop.f32.mrb[240].mxu1 }
 0x8a1   :  { %v6834_v44 = vpop.f32.mrb[241].mxu1 }
 0x8a2   :  { %v5289_v44 = vld [vmem:[#allocation9 + $0x30] sm:$0xff] }
 0x8bc   :  { %v10950_v30 = vpop.f32.mrb[242].mxu1 }
 0x8ce   :  { %v3988_v16 = vpop.f32.mrb[198].mxu0 }
 0x8cf   :  { %v3992_v22 = vmax.f32 %v3913_v8, %v3988_v16  ;;  %v6493_v21 = vpop.f32.mrb[199].mxu0  ;;  %v5924_v8 = vld [vmem:[%s11054_s13 + $0x160] sm:$0xff] }
 0x8d0   :  { %v7771_v1 = vpack.c.bf16 %v5925_v39, %v5924_v8  ;;  %v5964_v39 = vld [vmem:[%s11054_s13 + $0x270] sm:$0xff] }
 0x8d1   :  { %6523 = vmatmul.mubr.msk.f32.vlgmr.msra.gmra.mrb[196].mxu0 %vm3605_vm5, %v3992_v22 }
 0x8d2   :  { %7706 = vmatpush3.bf16.msra.mxu0 %v7705_v62  ;;  %6615 = vmatprep.mubr.msk.f32.mxu0 %vm8285_vm4, %v8283_v0  ;;  %v7831_v62 = vpack.c.bf16 %v5940_v55, %v5939_v9  ;;  %v5290_v9 = vld [vmem:[#allocation9 + $0x38] sm:$0xff] }
 0x8d3   :  { %7707 = vmatprep.subr.bf16.mxu0 %v8284_v20  ;;  %v7987_v55 = vpack.c.bf16 %v5290_v9, %v5289_v44 }
 0x8d6   :  { %7709 = vmatpush3.bf16.msra.mxu0 %v7708_v47  ;;  %v7834_v47 = vpack.c.bf16 %v5942_v58, %v5941_v51  ;;  %v5294_v51 = vld [vmem:[#allocation9 + $0x58] sm:$0xff] }
 0x8d7   :  { %7710 = vmatprep.subr.bf16.mxu0 %v8284_v20 }
 0x8da   :  { %7712 = vmatpush3.bf16.msra.mxu0 %v7711_v7  ;;  %v5945_v7 = vld [vmem:[%s11054_s13 + $0x1f0] sm:$0xff] }
 0x8db   :  { %7713 = vmatprep.subr.bf16.mxu0 %v8284_v20  ;;  %v7840_v35 = vpack.c.bf16 %v5946_v40, %v5945_v7  ;;  %v5974_v7 = vld [vmem:[%s11054_s13 + $0x2a8] sm:$0xff] }
 0x8de   :  { %7715 = vmatpush3.bf16.msra.mxu0 %v7714_v15  ;;  %v5947_v15 = vld [vmem:[%s11054_s13 + $0x200] sm:$0xff] }
 0x8df   :  { %7716 = vmatprep.subr.bf16.mxu0 %v8284_v20  ;;  %v7843_v42 = vpack.c.bf16 %v5948_v17, %v5947_v15 }
 0x8e2   :  { %7718 = vmatpush3.bf16.msra.mxu0 %v7717_v63  ;;  %v5949_v63 = vld [vmem:[%s11054_s13 + $0x210] sm:$0xff] }
 0x8e3   :  { %7719 = vmatprep.subr.bf16.mxu0 %v8284_v20  ;;  %v7846_v23 = vpack.c.bf16 %v5950_v19, %v5949_v63  ;;  %v5976_v63 = vld [vmem:[%s11054_s13 + $0x2b8] sm:$0xff] }
 0x8e6   :  { %7721 = vmatpush3.bf16.msra.mxu0 %v7720_v52  ;;  %v5951_v52 = vld [vmem:[%s11054_s13 + $0x220] sm:$0xff] }
 0x8e7   :  { %7722 = vmatprep.subr.bf16.mxu0 %v8284_v20  ;;  %v7849_v59 = vpack.c.bf16 %v5952_v18, %v5951_v52  ;;  %v5979_v18 = vld [vmem:[%s11054_s13 + $0x2d0] sm:$0xff] }
 0x8ea   :  { %7724 = vmatpush3.bf16.msra.mxu0 %v7723_v26 }
 0x8eb   :  { %7746 = vmatprep.subr.bf16.mxu0 %v8284_v20 }
 0x8ed   :  { %6616 = vmatmul.mubr.msk.f32.vlgmr.msra.gmra.mrb[196].mxu0 %vm3605_vm5, %v4232_v12  ;;  %v5118_v12 = vld [vmem:[#allocation7 + $0x30] sm:$0xff] }
 0x8ee   :  { %7748 = vmatpush3.bf16.msra.mxu0 %v10384_v5  ;;  %6677 = vmatprep.mubr.msk.f32.mxu0 %vm8285_vm4, %v8283_v0 }
 0x8ef   :  { %7749 = vmatprep.subr.bf16.mxu0 %v8284_v20  ;;  %6957 = vmatmul.mubr.msk.f32.vlgmr.msra.gmra.mrb[244].mxu1 %vm3605_vm5, %v5118_v12 }
 0x8f0   :  { %7022 = vmatprep.mubr.msk.f32.mxu1 %vm8285_vm4, %v8283_v0  ;;  %7979 = vmatpush3.bf16.msra.mxu1 %v7978_v33  ;;  %v5389_v33 = vld [vmem:[#allocation10 + $0x60] sm:$0xff] }
 0x8f1   :  { %7980 = vmatprep.subr.bf16.mxu1 %v8284_v20 }
 0x8f2   :  { %7751 = vmatpush3.bf16.msra.mxu0 %v10388_v56 }
 0x8f3   :  { %7752 = vmatprep.subr.bf16.mxu0 %v8284_v20 }
 0x8f6   :  { %7754 = vmatpush3.bf16.msra.mxu0 %v10392_v34 }
 0x8f7   :  { %7755 = vmatprep.subr.bf16.mxu0 %v8284_v20 }
 0x8fa   :  { %7757 = vmatpush3.bf16.msra.mxu0 %v10396_v49 }
 0x8fb   :  { %7758 = vmatprep.subr.bf16.mxu0 %v8284_v20 }
 0x8fe   :  { %7760 = vmatpush3.bf16.msra.mxu0 %v10400_v31 }
 0x8ff   :  { %7761 = vmatprep.subr.bf16.mxu0 %v8284_v20 }
 0x902   :  { %7763 = vmatpush3.bf16.msra.mxu0 %v10404_v11 }
 0x903   :  { %7764 = vmatprep.subr.bf16.mxu0 %v8284_v20 }
 0x906   :  { %7766 = vmatpush3.bf16.msra.mxu0 %v10408_v37 }
 0x907   :  { %7767 = vmatprep.subr.bf16.mxu0 %v8284_v20 }
 0x909   :  { %6678 = vmatmul.mubr.msk.f32.vlgmr.msra.gmra.mrb[200].mxu0 %vm3605_vm5, %v4398_v2  ;;  %v5962_v2 = vld [vmem:[%s11054_s13 + $0x260] sm:$0xff] }
 0x90a   :  { %7769 = vmatpush3.bf16.msra.mxu0 %v7768_v25  ;;  %6708 = vmatprep.mubr.msk.f32.mxu0 %vm8285_vm4, %v8283_v0  ;;  %v5963_v25 = vld [vmem:[%s11054_s13 + $0x268] sm:$0xff] }
 0x90b   :  { %7770 = vmatprep.subr.bf16.mxu0 %v8284_v20  ;;  %v7903_v8 = vpack.c.bf16 %v5963_v25, %v5962_v2  ;;  %v5297_v2 = vld [vmem:[#allocation9 + $0x70] sm:$0xff]  ;;  %v5298_v25 = vld [vmem:[#allocation9 + $0x78] sm:$0xff] }
 0x90e   :  { %7772 = vmatpush3.bf16.msra.mxu0 %v7771_v1  ;;  %v5965_v1 = vld [vmem:[%s11054_s13 + $0x278] sm:$0xff] }
 0x90f   :  { %7773 = vmatprep.subr.bf16.mxu0 %v8284_v20  ;;  %v7906_v29 = vpack.c.bf16 %v5965_v1, %v5964_v39  ;;  %v5377_v39 = vld [vmem:[#allocation10] sm:$0xff]  ;;  %v5378_v1 = vld [vmem:[#allocation10 + $0x8] sm:$0xff] }
 0x912   :  { %7775 = vmatpush3.bf16.msra.mxu0 %v7774_v48  ;;  %v5967_v48 = vld [vmem:[%s11054_s13 + $0x288] sm:$0xff] }
 0x913   :  { %7776 = vmatprep.subr.bf16.mxu0 %v8284_v20  ;;  %v7909_v46 = vpack.c.bf16 %v5967_v48, %v5966_v3  ;;  %v8002_v3 = vpack.c.bf16 %v5378_v1, %v5377_v39  ;;  %v5380_v48 = vld [vmem:[#allocation10 + $0x18] sm:$0xff] }
 0x916   :  { %7778 = vmatpush3.bf16.msra.mxu0 %v7777_v10  ;;  %v5969_v10 = vld [vmem:[%s11054_s13 + $0x298] sm:$0xff] }
 0x917   :  { %7779 = vmatprep.subr.bf16.mxu0 %v8284_v20  ;;  %v7912_v36 = vpack.c.bf16 %v5969_v10, %v5968_v43  ;;  %v5381_v43 = vld [vmem:[#allocation10 + $0x20] sm:$0xff]  ;;  %v5382_v10 = vld [vmem:[#allocation10 + $0x28] sm:$0xff] }
 0x91a   :  { %7781 = vmatpush3.bf16.msra.mxu0 %v7780_v27  ;;  %v6927_v27 = vpop.f32.mrb[243].mxu1 }
 0x91b   :  { %7782 = vmatprep.subr.bf16.mxu0 %v8284_v20 }
 0x91e   :  { %7784 = vmatpush3.bf16.msra.mxu0 %v7783_v14 }
 0x91f   :  { %7785 = vmatprep.subr.bf16.mxu0 %v8284_v20 }
 0x922   :  { %7787 = vmatpush3.bf16.msra.mxu0 %v7786_v6  ;;  %v5285_v6 = vld [vmem:[#allocation9 + $0x10] sm:$0xff] }
 0x923   :  { %7830 = vmatprep.subr.bf16.mxu0 %v8284_v20  ;;  %v7981_v60 = vpack.c.bf16 %v5286_v53, %v5285_v6  ;;  %v8017_v6 = vpack.c.bf16 %v5388_v54, %v5387_v45  ;;  %v5390_v53 = vld [vmem:[#allocation10 + $0x68] sm:$0xff] }
 0x925   :  { %7982 = vmatpush3.bf16.msra.mxu1 %v7981_v60  ;;  %v8020_v60 = vpack.c.bf16 %v5390_v53, %v5389_v33 }
 0x926   :  { %7983 = vmatprep.subr.bf16.mxu1 %v8284_v20 }
 0x9c2   :  { %v10952_v41 = vpop.f32.mrb[244].mxu1 }
 0x9c3   :  { %v5192_v50 = vmax.f32 %v10950_v30, %v10952_v41  ;;  %v6958_v14 = vpop.f32.mrb[245].mxu1  ;;  %v5384_v30 = vld [vmem:[#allocation10 + $0x38] sm:$0xff]  ;;  %v5385_v41 = vld [vmem:[#allocation10 + $0x40] sm:$0xff] }
 0x9dc   :  { %v4468_v16 = vpop.f32.mrb[200].mxu0 }
 0x9dd   :  { %v4472_v22 = vmax.f32 %v10700_v38, %v4468_v16  ;;  %v6679_v21 = vpop.f32.mrb[201].mxu0  ;;  %v5943_v38 = vld [vmem:[%s11054_s13 + $0x1e0] sm:$0xff]  ;;  %v5291_v16 = vld [vmem:[#allocation9 + $0x40] sm:$0xff] }
 0x9de   :  { %v7837_v61 = vpack.c.bf16 %v5944_v28, %v5943_v38  ;;  %v5293_v21 = vld [vmem:[#allocation9 + $0x50] sm:$0xff]  ;;  %v5296_v38 = vld [vmem:[#allocation9 + $0x68] sm:$0xff] }
 0x9df   :  { %6709 = vmatmul.mubr.msk.f32.vlgmr.msra.gmra.mrb[196].mxu0 %vm3605_vm5, %v4472_v22  ;;  %v7993_v58 = vpack.c.bf16 %v5294_v51, %v5293_v21 }
 0x9e0   :  { %7832 = vmatpush3.bf16.msra.mxu0 %v7831_v62  ;;  %6801 = vmatprep.mubr.msk.f32.mxu0 %vm8285_vm4, %v8283_v0  ;;  %v5292_v62 = vld [vmem:[#allocation9 + $0x48] sm:$0xff] }
 0x9e1   :  { %7833 = vmatprep.subr.bf16.mxu0 %v8284_v20  ;;  %v7990_v22 = vpack.c.bf16 %v5292_v62, %v5291_v16  ;;  %v5392_v16 = vld [vmem:[#allocation10 + $0x78] sm:$0xff] }
 0x9e4   :  { %7835 = vmatpush3.bf16.msra.mxu0 %v7834_v47  ;;  %v5295_v47 = vld [vmem:[#allocation9 + $0x60] sm:$0xff] }
 0x9e5   :  { %7836 = vmatprep.subr.bf16.mxu0 %v8284_v20  ;;  %v7996_v28 = vpack.c.bf16 %v5296_v38, %v5295_v47  ;;  %v5989_v47 = vld [vmem:[%s11059_s18] ss:$0 sm:$0xff] }
 0x9e8   :  { %7838 = vmatpush3.bf16.msra.mxu0 %v7837_v61  ;;  %v5973_v61 = vld [vmem:[%s11054_s13 + $0x2a0] sm:$0xff] }
 0x9e9   :  { %7839 = vmatprep.subr.bf16.mxu0 %v8284_v20 }
 0x9ec   :  { %7841 = vmatpush3.bf16.msra.mxu0 %v7840_v35  ;;  %v7957_v35 = vpack.c.bf16 %v5974_v7, %v5973_v61 }
 0x9ed   :  { %7842 = vmatprep.subr.bf16.mxu0 %v8284_v20 }
 0x9f0   :  { %7844 = vmatpush3.bf16.msra.mxu0 %v7843_v42  ;;  %v5975_v42 = vld [vmem:[%s11054_s13 + $0x2b0] sm:$0xff] }
 0x9f1   :  { %7845 = vmatprep.subr.bf16.mxu0 %v8284_v20  ;;  %v7960_v19 = vpack.c.bf16 %v5976_v63, %v5975_v42 }
 0x9f4   :  { %7847 = vmatpush3.bf16.msra.mxu0 %v7846_v23  ;;  %v5978_v23 = vld [vmem:[%s11054_s13 + $0x2c8] sm:$0xff] }
 0x9f5   :  { %7848 = vmatprep.subr.bf16.mxu0 %v8284_v20 }
 0x9f8   :  { %7850 = vmatpush3.bf16.msra.mxu0 %v7849_v59  ;;  %v5980_v59 = vld [vmem:[%s11054_s13 + $0x2d8] sm:$0xff] }
 0x9f9   :  { %7872 = vmatprep.subr.bf16.mxu0 %v8284_v20 }
 0x9fb   :  { %6802 = vmatmul.mubr.msk.f32.vlgmr.msra.gmra.mrb[196].mxu0 %vm3605_vm5, %v4712_v4  ;;  %v5287_v4 = vld [vmem:[#allocation9 + $0x20] sm:$0xff] }
 0x9fc   :  { %7874 = vmatpush3.bf16.msra.mxu0 %v10384_v5  ;;  %6863 = vmatprep.mubr.msk.f32.mxu0 %vm8285_vm4, %v8283_v0  ;;  %v5956_v5 = vld [vmem:[%s11054_s13 + $0x230] sm:$0xff]  ;;  %v7984_v12 = vpack.c.bf16 %v5288_v13, %v5287_v4  ;;  %v5882_v4 = vld [vmem:[%s11055_s14] ss:$0 sm:$0xff] }
 0x9fd   :  { %7875 = vmatprep.subr.bf16.mxu0 %v8284_v20 }
 0x9fe   :  { %7985 = vmatpush3.bf16.msra.mxu1 %v7984_v12 }
 0x9ff   :  { %7986 = vmatprep.subr.bf16.mxu1 %v8284_v20 }
 0xa00   :  { %7877 = vmatpush3.bf16.msra.mxu0 %v10388_v56  ;;  %v5957_v56 = vld [vmem:[%s11054_s13 + $0x238] sm:$0xff] }
 0xa01   :  { %7878 = vmatprep.subr.bf16.mxu0 %v8284_v20 }
 0xa02   :  { %7988 = vmatpush3.bf16.msra.mxu1 %v7987_v55  ;;  %v5391_v55 = vld [vmem:[#allocation10 + $0x70] sm:$0xff] }
 0xa03   :  { %7989 = vmatprep.subr.bf16.mxu1 %v8284_v20  ;;  %v8023_v62 = vpack.c.bf16 %v5392_v16, %v5391_v55 }
 0xa04   :  { %7880 = vmatpush3.bf16.msra.mxu0 %v10392_v34  ;;  %v4878_v34 = vld [vmem:[#allocation7 + $0x28] sm:$0xff] }
 0xa05   :  { %7881 = vmatprep.subr.bf16.mxu0 %v8284_v20 }
 0xa06   :  { %7991 = vmatpush3.bf16.msra.mxu1 %v7990_v22  ;;  %v5988_v22 = vld [vmem:[%s11057_s16] ss:$0 sm:$0xff] }
 0xa07   :  { %7992 = vmatprep.subr.bf16.mxu1 %v8284_v20 }
 0xa08   :  { %7883 = vmatpush3.bf16.msra.mxu0 %v10396_v49  ;;  %v7894_v49 = vpack.c.bf16 %v5957_v56, %v5956_v5  ;;  %v7966_v5 = vpack.c.bf16 %v5980_v59, %v5979_v18  ;;  %v5981_v56 = vld [vmem:[%s11054_s13 + $0x2e0] sm:$0xff] }
 0xa09   :  { %7884 = vmatprep.subr.bf16.mxu0 %v8284_v20 }
 0xa0a   :  { %7994 = vmatpush3.bf16.msra.mxu1 %v7993_v58 }
 0xa0b   :  { %7995 = vmatprep.subr.bf16.mxu1 %v8284_v20 }
 0xa0c   :  { %7886 = vmatpush3.bf16.msra.mxu0 %v10400_v31  ;;  %v5958_v31 = vld [vmem:[%s11054_s13 + $0x240] sm:$0xff] }
 0xa0d   :  { %7887 = vmatprep.subr.bf16.mxu0 %v8284_v20 }
 0xa0e   :  { %7997 = vmatpush3.bf16.msra.mxu1 %v7996_v28 }
 0xa0f   :  { %7998 = vmatprep.subr.bf16.mxu1 %v8284_v20 }
 0xa10   :  { %7889 = vmatpush3.bf16.msra.mxu0 %v10404_v11  ;;  %v5959_v11 = vld [vmem:[%s11054_s13 + $0x248] sm:$0xff] }
 0xa11   :  { %7890 = vmatprep.subr.bf16.mxu0 %v8284_v20  ;;  %v7897_v26 = vpack.c.bf16 %v5959_v11, %v5958_v31  ;;  %v5983_v31 = vld [vmem:[%s11054_s13 + $0x2f0] sm:$0xff]  ;;  %v5984_v11 = vld [vmem:[%s11054_s13 + $0x2f8] sm:$0xff] }
 0xa14   :  { %7892 = vmatpush3.bf16.msra.mxu0 %v10408_v37  ;;  %v5960_v37 = vld [vmem:[%s11054_s13 + $0x250] sm:$0xff] }
 0xa15   :  { %7893 = vmatprep.subr.bf16.mxu0 %v8284_v20  ;;  %v7900_v32 = vpack.c.bf16 %v5961_v57, %v5960_v37  ;;  %v5985_v37 = vld [vmem:[%s11054_s13 + $0x300] sm:$0xff]  ;;  %v5986_v57 = vld [vmem:[%s11054_s13 + $0x308] sm:$0xff] }
 0xa17   :  { %6864 = vmatmul.mubr.msk.f32.vlgmr.msra.gmra.mrb[202].mxu0 %vm3605_vm5, %v4878_v34  ;;  %v5982_v34 = vld [vmem:[%s11054_s13 + $0x2e8] sm:$0xff] }
 0xa18   :  { %7895 = vmatpush3.bf16.msra.mxu0 %v7894_v49  ;;  %6894 = vmatprep.mubr.msk.f32.mxu0 %vm8285_vm4, %v8283_v0  ;;  %v7969_v49 = vpack.c.bf16 %v5982_v34, %v5981_v56 }
 0xa19   :  { %7896 = vmatprep.subr.bf16.mxu0 %v8284_v20 }
 0xa1c   :  { %7898 = vmatpush3.bf16.msra.mxu0 %v7897_v26  ;;  %v7972_v26 = vpack.c.bf16 %v5984_v11, %v5983_v31 }
 0xa1d   :  { %7899 = vmatprep.subr.bf16.mxu0 %v8284_v20 }
 0xa20   :  { %7901 = vmatpush3.bf16.msra.mxu0 %v7900_v32  ;;  %v7975_v32 = vpack.c.bf16 %v5986_v57, %v5985_v37 }
 0xa21   :  { %7902 = vmatprep.subr.bf16.mxu0 %v8284_v20 }
 0xa24   :  { %7904 = vmatpush3.bf16.msra.mxu0 %v7903_v8  ;;  %v7999_v8 = vpack.c.bf16 %v5298_v25, %v5297_v2 }
 0xa25   :  { %7905 = vmatprep.subr.bf16.mxu0 %v8284_v20 }
 0xa26   :  { %8000 = vmatpush3.bf16.msra.mxu1 %v7999_v8 }
 0xa28   :  { %7907 = vmatpush3.bf16.msra.mxu0 %v7906_v29  ;;  %v5379_v29 = vld [vmem:[#allocation10 + $0x10] sm:$0xff] }
 0xa29   :  { %7908 = vmatprep.subr.bf16.mxu0 %v8284_v20 }
 0xa2c   :  { %7910 = vmatpush3.bf16.msra.mxu0 %v7909_v46  ;;  %v8005_v46 = vpack.c.bf16 %v5380_v48, %v5379_v29 }
 0xa2d   :  { %7911 = vmatprep.subr.bf16.mxu0 %v8284_v20 }
 0xa30   :  { %7913 = vmatpush3.bf16.msra.mxu0 %v7912_v36  ;;  %v8008_v36 = vpack.c.bf16 %v5382_v10, %v5381_v43 }
 0xa31   :  { %7956 = vmatprep.subr.bf16.mxu0 %v8284_v20 }
 0xaea   :  { %v4948_v40 = vpop.f32.mrb[202].mxu0 }
 0xaeb   :  { %v4952_v15 = vmax.f32 %v10824_v24, %v4948_v40  ;;  %v6865_v17 = vpop.f32.mrb[203].mxu0  ;;  %v5977_v24 = vld [vmem:[%s11054_s13 + $0x2c0] sm:$0xff] }
 0xaec   :  { %v7963_v52 = vpack.c.bf16 %v5978_v23, %v5977_v24 }
 0xaed   :  { %6895 = vmatmul.mubr.msk.f32.vlgmr.msra.gmra.mrb[196].mxu0 %vm3605_vm5, %v4952_v15 }
 0xaee   :  { %7958 = vmatpush3.bf16.msra.mxu0 %v7957_v35  ;;  %6987 = vmatprep.mubr.msk.f32.mxu0 %vm8285_vm4, %v8283_v0 }
 0xaef   :  { %7959 = vmatprep.subr.bf16.mxu0 %v8284_v20 }
 0xaf2   :  { %7961 = vmatpush3.bf16.msra.mxu0 %v7960_v19 }
 0xaf3   :  { %7962 = vmatprep.subr.bf16.mxu0 %v8284_v20 }
 0xaf6   :  { %7964 = vmatpush3.bf16.msra.mxu0 %v7963_v52 }
 0xaf7   :  { %7965 = vmatprep.subr.bf16.mxu0 %v8284_v20 }
 0xafa   :  { %7967 = vmatpush3.bf16.msra.mxu0 %v7966_v5 }
 0xafb   :  { %7968 = vmatprep.subr.bf16.mxu0 %v8284_v20 }
 0xafe   :  { %7970 = vmatpush3.bf16.msra.mxu0 %v7969_v49 }
 0xaff   :  { %7971 = vmatprep.subr.bf16.mxu0 %v8284_v20 }
 0xb02   :  { %7973 = vmatpush3.bf16.msra.mxu0 %v7972_v26 }
 0xb03   :  { %7974 = vmatprep.subr.bf16.mxu0 %v8284_v20 }
 0xb06   :  { %7976 = vmatpush3.bf16.msra.mxu0 %v7975_v32 }
 0xb07   :  { %8001 = vmatprep.subr.bf16.mxu0 %v8284_v20 }
 0xb09   :  { %6988 = vmatmul.mubr.msk.f32.vlgmr.msra.gmra.mrb[196].mxu0 %vm3605_vm5, %v5192_v50  ;;  %v5386_v50 = vld [vmem:[#allocation10 + $0x48] sm:$0xff] }
 0xb0a   :  { %7057 = vmatprep.mubr.msk.f32.mxu0 %vm8285_vm4, %v8283_v0  ;;  %8003 = vmatpush3.bf16.msra.mxu0 %v8002_v3  ;;  %v5383_v0 = vld [vmem:[#allocation10 + $0x30] sm:$0xff]  ;;  %v8014_v14 = vpack.c.bf16 %v5386_v50, %v5385_v41 }
 0xb0b   :  { %8004 = vmatprep.subr.bf16.mxu0 %v8284_v20  ;;  %v8011_v27 = vpack.c.bf16 %v5384_v30, %v5383_v0 }
 0xb0e   :  { %8006 = vmatpush3.bf16.msra.mxu0 %v8005_v46 }
 0xb0f   :  { %8007 = vmatprep.subr.bf16.mxu0 %v8284_v20 }
 0xb12   :  { %8009 = vmatpush3.bf16.msra.mxu0 %v8008_v36 }
 0xb13   :  { %8010 = vmatprep.subr.bf16.mxu0 %v8284_v20 }
 0xb16   :  { %8012 = vmatpush3.bf16.msra.mxu0 %v8011_v27 }
 0xb17   :  { %8013 = vmatprep.subr.bf16.mxu0 %v8284_v20 }
 0xb1a   :  { %8015 = vmatpush3.bf16.msra.mxu0 %v8014_v14 }
 0xb1b   :  { %8016 = vmatprep.subr.bf16.mxu0 %v8284_v20 }
 0xb1e   :  { %8018 = vmatpush3.bf16.msra.mxu0 %v8017_v6 }
 0xb1f   :  { %8019 = vmatprep.subr.bf16.mxu0 %v8284_v20 }
 0xb22   :  { %8021 = vmatpush3.bf16.msra.mxu0 %v8020_v60 }
 0xb23   :  { %8022 = vmatprep.subr.bf16.mxu0 %v8284_v20 }
 0xb26   :  { %8024 = vmatpush3.bf16.msra.mxu0 %v8023_v62 }
 0xbdc   :  { %v5277_v13 = vpop.f32.mrb[196].mxu0 }
 0xbdd   :  { %v8053_v12 = vadd.f32 %v5882_v4, %v5277_v13  ;;  %v6989_v44 = vpop.f32.mrb[197].mxu0 }
 0xbdf   :  { %v5282_v9 = vmax.f32 %v8053_v12, 0.0 }
 0xbe1   :  { %7023 = vmatmul.mubr.f32.vlgmr.msra.gmra.mrb[246].mxu1 %v5282_v9 }
 0xcb4   :  { %v5372_v21 = vpop.f32.mrb[246].mxu1 }
 0xcb5   :  { %v5373_v51 = vadd.f32 %v5988_v22, %v5372_v21  ;;  %v7024_v20 = vpop.f32.mrb[247].mxu1 }
 0xcb7   :  { %v5376_v58 = vmax.f32 %v5373_v51, 0.0 }
 0xcb9   :  { %7058 = vmatmul.mubr.f32.vlgmr.msra.gmra.mrb[204].mxu0 %v5376_v58 }
 0xd8c   :  { %v5466_v38 = vpop.f32.mrb[204].mxu0 }
 0xd8d   :  { %v5467_v28 = vadd.f32 %v5989_v47, %v5466_v38  ;;  %v7059_v61 = vpop.f32.mrb[205].mxu0 }
 0xd8f   :  { %8133 = vtanh.f32 %v5467_v28 }
 0xd99   :  { %v8134_v7 = vpop.eup %8133 }
 0xd9a   :  { %5471 = vst [vmem:[%s11060_s19] sm:$0xff] %v8134_v7 }
 0xd9b   :  { %5476 = vsyncpa [#allocation3], 1 }
 0xd9c   :  { %5477 = vsyncpa [#allocation5], 1 }
 0xd9d   :  { %5478 = vsyncpa [#allocation8], 1 }
 0xd9e   :  { %5479 = vsyncpa [#allocation11], 1 }

</bundles_post_ra>
